<compile_context>
chip_gen: v7x
topology: tpu7x:2x2x1
jax: 0.10.0
libtpu: 0.0.40
codegen_flags: <defaults>
</compile_context>

<pallas_src>
import math

import jax
import jax.numpy as jnp
from jax import lax
from jax.experimental import pallas as pl
from jax.experimental.pallas import tpu as pltpu

_EPS = 1e-5


def _row_tile(P, target=256):
    """Largest multiple-of-8 divisor of P that is <= target (P if none)."""
    if P % 8:
        return P
    t = min(target, P)
    t -= t % 8
    while t >= 8 and P % t:
        t -= 8
    return t if t >= 8 else P


# ----------------------------------------------------------------------------
# Kernel 1: conv1 (1x1, bias dropped -- cancelled by BN1) + per-tile BN1 stats.
#   x: (TP, Cin)  w: (Cin, Cmid)  ->  h_pre: (TP, Cmid), sum/sumsq: (1,1,Cmid)
# ----------------------------------------------------------------------------
def _conv1_kernel(x_ref, w_ref, h_ref, s_ref, q_ref):
    h = jnp.dot(x_ref[...], w_ref[...], preferred_element_type=jnp.float32)
    h_ref[...] = h
    s_ref[0] = jnp.sum(h, axis=0, keepdims=True)
    q_ref[0] = jnp.sum(h * h, axis=0, keepdims=True)


# ----------------------------------------------------------------------------
# Kernel 2: BN1+ReLU1, then ConvTranspose2d(3x3, s2, p1, op1) decomposed into
# its four output-parity classes.  One image per grid step.
#   parity outputs (columns of wd4):   [p00 | p01 | p10 | p11]
#   shifted inputs  (rows of wd4):      h00=h[m,n], h01=h[m,n+1],
#                                       h10=h[m+1,n], h11=h[m+1,n+1]
# Shifted inputs are offset reads of a zero-padded VMEM copy of h.
# Also accumulates per-image BN2 partial sums over the (HW, 4*Cmid) result.
# ----------------------------------------------------------------------------
def _make_deconv_kernel(H, W, pad):
    HW = H * W

    def kernel(hp_ref, m1_ref, i1_ref, mrt_ref, wd4_ref,
               d_ref, s_ref, q_ref, buf_ref):
        Cm = hp_ref.shape[2]
        # BN1 (batch stats, gamma=1, beta=0) + ReLU1.
        h = jnp.maximum((hp_ref[0] - m1_ref[...]) * i1_ref[...], 0.0)
        # Zero-padded copy of h: shifted neighbours become plain offset reads.
        buf_ref[pl.ds(HW, pad), :] = jnp.zeros((pad, Cm), jnp.float32)
        buf_ref[pl.ds(0, HW), :] = h
        mrt = mrt_ref[...]                          # 0.0 where n == W-1
        h01 = buf_ref[pl.ds(1, HW), :] * mrt        # h[m, n+1]
        h10 = buf_ref[pl.ds(W, HW), :]              # h[m+1, n]   (pad handles m==H-1)
        h11 = buf_ref[pl.ds(W + 1, HW), :] * mrt    # h[m+1, n+1]

        mm = lambda a, w: jnp.dot(a, w, preferred_element_type=jnp.float32)
        d = (mm(h, wd4_ref[0]) + mm(h01, wd4_ref[1])
             + mm(h10, wd4_ref[2]) + mm(h11, wd4_ref[3]))   # (HW, 4*Cm)
        d_ref[0] = d
        s_ref[0] = jnp.sum(d, axis=0, keepdims=True)
        q_ref[0] = jnp.sum(d * d, axis=0, keepdims=True)

    return kernel


# ----------------------------------------------------------------------------
# Kernel 3: BN2+ReLU2 then conv3 as one block-diagonal matmul (all four
# parity classes at once, lane-dense (TP, 4*Cout) output) + BN3 partial sums.
# ----------------------------------------------------------------------------
def _conv3_kernel(d_ref, m2_ref, i2_ref, w3_ref, z_ref, s_ref, q_ref):
    d = jnp.maximum((d_ref[...] - m2_ref[...]) * i2_ref[...], 0.0)
    z = jnp.dot(d, w3_ref[...], preferred_element_type=jnp.float32)
    z_ref[...] = z
    s_ref[0] = jnp.sum(z, axis=0, keepdims=True)
    q_ref[0] = jnp.sum(z * z, axis=0, keepdims=True)


# ----------------------------------------------------------------------------
# Kernel 4: BN3 + ReLU3 (elementwise, lane-dense).
# ----------------------------------------------------------------------------
def _bn3_kernel(z_ref, m3_ref, i3_ref, o_ref):
    o_ref[...] = jnp.maximum((z_ref[...] - m3_ref[...]) * i3_ref[...], 0.0)


# ----------------------------------------------------------------------------
# BN finalization (tiny (1, C) XLA glue between kernels).
# ----------------------------------------------------------------------------
def _bn_stats(sum_tiles, sq_tiles, count, groups=1):
    s = jnp.sum(sum_tiles, axis=0)[0]      # (G*C,)
    q = jnp.sum(sq_tiles, axis=0)[0]
    if groups > 1:
        C = s.shape[0] // groups
        s = s.reshape(groups, C).sum(0)
        q = q.reshape(groups, C).sum(0)
    mean = s / count
    var = jnp.maximum(q / count - mean * mean, 0.0)
    inv = lax.rsqrt(var + _EPS)
    if groups > 1:
        mean = jnp.tile(mean, groups)
        inv = jnp.tile(inv, groups)
    return mean.reshape(1, -1), inv.reshape(1, -1)


# ----------------------------------------------------------------------------
# Wrapper
# ----------------------------------------------------------------------------
@jax.jit
def decoder_block_forward(x_nchw, params):
    N, Cin, H, Wd = x_nchw.shape
    Cm = params["w1"].shape[1]
    Cout = params["w3"].shape[1]
    P = N * H * Wd
    HW = H * Wd
    f32 = jnp.float32

    x2d = jnp.transpose(x_nchw, (0, 2, 3, 1)).astype(f32).reshape(P, Cin)
    cp = pltpu.CompilerParams(dimension_semantics=("parallel",))

    # -------- stage 1: conv1 + BN1 partial stats (row-tiled, pipelined) -----
    tp = _row_tile(P)
    nt = P // tp
    h_pre, s1, q1 = pl.pallas_call(
        _conv1_kernel,
        out_shape=(jax.ShapeDtypeStruct((P, Cm), f32),
                   jax.ShapeDtypeStruct((nt, 1, Cm), f32),
                   jax.ShapeDtypeStruct((nt, 1, Cm), f32)),
        grid=(nt,),
        in_specs=[pl.BlockSpec((tp, Cin), lambda i: (i, 0)),
                  pl.BlockSpec((Cin, Cm), lambda i: (0, 0))],
        out_specs=(pl.BlockSpec((tp, Cm), lambda i: (i, 0)),
                   pl.BlockSpec((1, 1, Cm), lambda i: (i, 0, 0)),
                   pl.BlockSpec((1, 1, Cm), lambda i: (i, 0, 0))),
        compiler_params=cp,
    )(x2d, params["w1"])
    mean1, inv1 = _bn_stats(s1, q1, float(P))

    # -------- stage 2: BN1+ReLU1 + parity-packed deconv + BN2 partial stats -
    wd = params["wd"].astype(f32)                    # (ky, kx, ci, co)
    Z = jnp.zeros((Cm, Cm), f32)
    Wt = lambda ky, kx: wd[ky, kx]
    wd4 = jnp.stack([
        jnp.concatenate([Wt(1, 1), Wt(1, 2), Wt(2, 1), Wt(2, 2)], axis=1),  # h00
        jnp.concatenate([Z,        Wt(1, 0), Z,        Wt(2, 0)], axis=1),  # h01
        jnp.concatenate([Z,        Z,        Wt(0, 1), Wt(0, 2)], axis=1),  # h10
        jnp.concatenate([Z,        Z,        Z,        Wt(0, 0)], axis=1),  # h11
    ], axis=0)                                       # (4, Cm, 4*Cm)

    mask_rt = (jnp.arange(HW) % Wd < Wd - 1).astype(f32).reshape(HW, 1)
    pad = ((Wd + 1 + 7) // 8) * 8
    hp3 = h_pre.reshape(N, HW, Cm)

    d_pre, s2, q2 = pl.pallas_call(
        _make_deconv_kernel(H, Wd, pad),
        out_shape=(jax.ShapeDtypeStruct((N, HW, 4 * Cm), f32),
                   jax.ShapeDtypeStruct((N, 1, 4 * Cm), f32),
                   jax.ShapeDtypeStruct((N, 1, 4 * Cm), f32)),
        grid=(N,),
        in_specs=[pl.BlockSpec((1, HW, Cm), lambda b: (b, 0, 0)),
                  pl.BlockSpec((1, Cm), lambda b: (0, 0)),
                  pl.BlockSpec((1, Cm), lambda b: (0, 0)),
                  pl.BlockSpec((HW, 1), lambda b: (0, 0)),
                  pl.BlockSpec((4, Cm, 4 * Cm), lambda b: (0, 0, 0))],
        out_specs=(pl.BlockSpec((1, HW, 4 * Cm), lambda b: (b, 0, 0)),
                   pl.BlockSpec((1, 1, 4 * Cm), lambda b: (b, 0, 0)),
                   pl.BlockSpec((1, 1, 4 * Cm), lambda b: (b, 0, 0))),
        scratch_shapes=[pltpu.VMEM((HW + pad, Cm), f32)],
        compiler_params=cp,
    )(hp3, mean1, inv1, mask_rt, wd4)
    mean2, inv2 = _bn_stats(s2, q2, float(4 * P), groups=4)

    # -------- stage 3: BN2+ReLU2 + block-diag conv3 + BN3 partial stats -----
    w3b = jnp.kron(jnp.eye(4, dtype=f32), params["w3"].astype(f32))  # (4Cm,4Cout)
    d2 = d_pre.reshape(P, 4 * Cm)
    z_pre, s3, q3 = pl.pallas_call(
        _conv3_kernel,
        out_shape=(jax.ShapeDtypeStruct((P, 4 * Cout), f32),
                   jax.ShapeDtypeStruct((nt, 1, 4 * Cout), f32),
                   jax.ShapeDtypeStruct((nt, 1, 4 * Cout), f32)),
        grid=(nt,),
        in_specs=[pl.BlockSpec((tp, 4 * Cm), lambda i: (i, 0)),
                  pl.BlockSpec((1, 4 * Cm), lambda i: (0, 0)),
                  pl.BlockSpec((1, 4 * Cm), lambda i: (0, 0)),
                  pl.BlockSpec((4 * Cm, 4 * Cout), lambda i: (0, 0))],
        out_specs=(pl.BlockSpec((tp, 4 * Cout), lambda i: (i, 0)),
                   pl.BlockSpec((1, 1, 4 * Cout), lambda i: (i, 0, 0)),
                   pl.BlockSpec((1, 1, 4 * Cout), lambda i: (i, 0, 0))),
        compiler_params=cp,
    )(d2, mean2, inv2, w3b)
    mean3, inv3 = _bn_stats(s3, q3, float(4 * P), groups=4)

    # -------- stage 4: BN3 + ReLU3 -------------------------------------------
    y = pl.pallas_call(
        _bn3_kernel,
        out_shape=jax.ShapeDtypeStruct((P, 4 * Cout), f32),
        grid=(nt,),
        in_specs=[pl.BlockSpec((tp, 4 * Cout), lambda i: (i, 0)),
                  pl.BlockSpec((1, 4 * Cout), lambda i: (0, 0)),
                  pl.BlockSpec((1, 4 * Cout), lambda i: (0, 0))],
        out_specs=pl.BlockSpec((tp, 4 * Cout), lambda i: (i, 0)),
        compiler_params=cp,
    )(z_pre, mean3, inv3)

    # Parity interleave + NCHW (layout glue only).
    y = y.reshape(N, H, Wd, 2, 2, Cout)             # (n, m, w, py, px, c)
    y = jnp.transpose(y, (0, 5, 1, 3, 2, 4))        # (n, c, m, py, w, px)
    return y.reshape(N, Cout, 2 * H, 2 * Wd)


# ----------------------------------------------------------------------------
# Deterministic parameter init (matches the PyTorch shapes / init scheme).
# Biases are kept for the reference model but are exact no-ops under
# training-mode BatchNorm, so the kernels never read them.
# ----------------------------------------------------------------------------
def init_params(key, in_channels, n_filters):
    Cmid = in_channels // 4
    k1, k2, k3, k4, k5, k6 = jax.random.split(key, 6)
    return {
        "w1": jax.random.normal(k1, (in_channels, Cmid), jnp.float32)
              * math.sqrt(2.0 / Cmid),
        "b1": 0.01 * jax.random.normal(k2, (1, Cmid), jnp.float32),
        "wd": jax.random.normal(k3, (3, 3, Cmid, Cmid), jnp.float32)
              * math.sqrt(2.0 / (9 * Cmid)),
        "bd": 0.01 * jax.random.normal(k4, (1, Cmid), jnp.float32),
        "w3": jax.random.normal(k5, (Cmid, n_filters), jnp.float32)
              * math.sqrt(2.0 / n_filters),
        "b3": 0.01 * jax.random.normal(k6, (1, n_filters), jnp.float32),
    }


# ----------------------------------------------------------------------------
# Pure-JAX reference (lax convs, biases included) for correctness checking.
# ----------------------------------------------------------------------------
def _reference(x_nchw, params):
    def bn_relu(t):
        mean = t.mean(axis=(0, 2, 3), keepdims=True)
        var = ((t - mean) ** 2).mean(axis=(0, 2, 3), keepdims=True)
        return jnp.maximum((t - mean) * lax.rsqrt(var + _EPS), 0.0)

    dn = ("NCHW", "OIHW", "NCHW")
    w1 = jnp.transpose(params["w1"])[:, :, None, None]
    h = lax.conv_general_dilated(x_nchw, w1, (1, 1), "VALID",
                                 dimension_numbers=dn)
    h = bn_relu(h + params["b1"].reshape(1, -1, 1, 1))

    wd = params["wd"]                                    # (ky, kx, ci, co)
    wconv = jnp.transpose(wd[::-1, ::-1], (3, 2, 0, 1))  # OIHW, flipped/swapped
    d = lax.conv_general_dilated(h, wconv, (1, 1), ((1, 2), (1, 2)),
                                 lhs_dilation=(2, 2), dimension_numbers=dn)
    d = bn_relu(d + params["bd"].reshape(1, -1, 1, 1))

    w3 = jnp.transpose(params["w3"])[:, :, None, None]
    z = lax.conv_general_dilated(d, w3, (1, 1), "VALID",
                                 dimension_numbers=dn)
    return bn_relu(z + params["b3"].reshape(1, -1, 1, 1))


if __name__ == "__main__":
    N, Cin, H, W = 2, 16, 16, 16
    n_filters = 8

    key = jax.random.PRNGKey(0)
    kp, kx = jax.random.split(key)
    params = init_params(kp, Cin, n_filters)
    x = jax.random.normal(kx, (N, Cin, H, W), jnp.float32)

    y = jax.block_until_ready(decoder_block_forward(x, params))
    assert y.shape == (N, n_filters, 2 * H, 2 * W), y.shape

    y_ref = jax.block_until_ready(_reference(x, params))
    max_err = float(jnp.max(jnp.abs(y - y_ref)))
    assert max_err < 1e-3, f"mismatch vs reference: {max_err}"

    print("KERNEL_OK")
</pallas_src>

<mosaic_0001>
module attributes {stable_mosaic.version = 11 : i64} {
  func.func @kernel(%arg0: i32, %arg1: memref<1x256x4xf32, #tpu.memory_space<vmem>>, %arg2: memref<1x4xf32, #tpu.memory_space<vmem>>, %arg3: memref<1x4xf32, #tpu.memory_space<vmem>>, %arg4: memref<256x1xf32, #tpu.memory_space<vmem>>, %arg5: memref<4x4x16xf32, #tpu.memory_space<vmem>>, %arg6: memref<1x256x16xf32, #tpu.memory_space<vmem>>, %arg7: memref<1x1x16xf32, #tpu.memory_space<vmem>>, %arg8: memref<1x1x16xf32, #tpu.memory_space<vmem>>, %arg9: memref<280x4xf32, #tpu.memory_space<vmem>>) attributes {dimension_semantics = [#tpu.dimension_semantics<parallel>], iteration_bounds = array<i64: 2>, scalar_prefetch = 0 : i64, scratch_operands = 1 : i64, tpu.core_type = #tpu.core_type<tc>, window_params = [{transform_indices = @transform_0, window_bounds = array<i64: 1, 256, 4>}, {pipeline_mode = #tpu.pipeline_mode<synchronous>, transform_indices = @transform_1, window_bounds = array<i64: 1, 4>}, {pipeline_mode = #tpu.pipeline_mode<synchronous>, transform_indices = @transform_2, window_bounds = array<i64: 1, 4>}, {pipeline_mode = #tpu.pipeline_mode<synchronous>, transform_indices = @transform_3, window_bounds = array<i64: 256, 1>}, {pipeline_mode = #tpu.pipeline_mode<synchronous>, transform_indices = @transform_4, window_bounds = array<i64: 4, 4, 16>}, {transform_indices = @transform_5, window_bounds = array<i64: 1, 256, 16>}, {transform_indices = @transform_6, window_bounds = array<i64: 1, 1, 16>}, {transform_indices = @transform_7, window_bounds = array<i64: 1, 1, 16>}]} {
    %c0 = arith.constant 0 : index
    %c0_0 = arith.constant 0 : index
    %c0_1 = arith.constant 0 : index
    %0 = vector.load %arg1[%c0, %c0_0, %c0_1] : memref<1x256x4xf32, #tpu.memory_space<vmem>>, vector<1x256x4xf32>
    %1 = vector.shape_cast %0 : vector<1x256x4xf32> to vector<256x4xf32>
    %c0_2 = arith.constant 0 : index
    %c0_3 = arith.constant 0 : index
    %2 = vector.load %arg2[%c0_2, %c0_3] : memref<1x4xf32, #tpu.memory_space<vmem>>, vector<1x4xf32>
    %3 = vector.broadcast %2 : vector<1x4xf32> to vector<256x4xf32>
    %4 = arith.subf %1, %3 : vector<256x4xf32>
    %c0_4 = arith.constant 0 : index
    %c0_5 = arith.constant 0 : index
    %5 = vector.load %arg3[%c0_4, %c0_5] : memref<1x4xf32, #tpu.memory_space<vmem>>, vector<1x4xf32>
    %6 = vector.broadcast %5 : vector<1x4xf32> to vector<256x4xf32>
    %7 = arith.mulf %4, %6 : vector<256x4xf32>
    %cst = arith.constant 0.000000e+00 : f32
    %8 = vector.broadcast %cst : f32 to vector<256x4xf32>
    %9 = arith.maximumf %7, %8 : vector<256x4xf32>
    %cst_6 = arith.constant 0.000000e+00 : f32
    %10 = vector.broadcast %cst_6 : f32 to vector<24x4xf32>
    %c256 = arith.constant 256 : index
    %c0_7 = arith.constant 0 : index
    %11 = vector.load %arg9[%c256, %c0_7] : memref<280x4xf32, #tpu.memory_space<vmem>>, vector<24x4xf32>
    tpu.vector_store %arg9[%c256, %c0_7], %10 {strides = array<i32>} : memref<280x4xf32, #tpu.memory_space<vmem>>, vector<24x4xf32>,
    %c0_8 = arith.constant 0 : index
    %c0_9 = arith.constant 0 : index
    %12 = vector.load %arg9[%c0_8, %c0_9] : memref<280x4xf32, #tpu.memory_space<vmem>>, vector<256x4xf32>
    tpu.vector_store %arg9[%c0_8, %c0_9], %9 {strides = array<i32>} : memref<280x4xf32, #tpu.memory_space<vmem>>, vector<256x4xf32>,
    %c0_10 = arith.constant 0 : index
    %c0_11 = arith.constant 0 : index
    %13 = vector.load %arg4[%c0_10, %c0_11] : memref<256x1xf32, #tpu.memory_space<vmem>>, vector<256x1xf32>
    %c1 = arith.constant 1 : index
    %c0_12 = arith.constant 0 : index
    %14 = vector.load %arg9[%c1, %c0_12] : memref<280x4xf32, #tpu.memory_space<vmem>>, vector<256x4xf32>
    %15 = vector.broadcast %13 : vector<256x1xf32> to vector<256x4xf32>
    %16 = arith.mulf %14, %15 : vector<256x4xf32>
    %c16 = arith.constant 16 : index
    %c0_13 = arith.constant 0 : index
    %17 = vector.load %arg9[%c16, %c0_13] : memref<280x4xf32, #tpu.memory_space<vmem>>, vector<256x4xf32>
    %c17 = arith.constant 17 : index
    %c0_14 = arith.constant 0 : index
    %18 = vector.load %arg9[%c17, %c0_14] : memref<280x4xf32, #tpu.memory_space<vmem>>, vector<256x4xf32>
    %19 = vector.broadcast %13 : vector<256x1xf32> to vector<256x4xf32>
    %20 = arith.mulf %18, %19 : vector<256x4xf32>
    %c0_15 = arith.constant 0 : index
    %c0_16 = arith.constant 0 : index
    %c0_17 = arith.constant 0 : index
    %21 = vector.load %arg5[%c0_15, %c0_16, %c0_17] : memref<4x4x16xf32, #tpu.memory_space<vmem>>, vector<1x4x16xf32>
    %22 = vector.shape_cast %21 : vector<1x4x16xf32> to vector<4x16xf32>
    %cst_18 = arith.constant dense<0.000000e+00> : vector<256x16xf32>
    %23 = tpu.matmul %9, %22, %cst_18 {dimension_numbers = #tpu.dot_dimension_numbers<[1], [0], [0], [1], [0, 0, 1, 1], [], []>} : vector<256x4xf32>, vector<4x16xf32>, vector<256x16xf32> -> vector<256x16xf32>
    %c1_19 = arith.constant 1 : index
    %c0_20 = arith.constant 0 : index
    %c0_21 = arith.constant 0 : index
    %24 = vector.load %arg5[%c1_19, %c0_20, %c0_21] : memref<4x4x16xf32, #tpu.memory_space<vmem>>, vector<1x4x16xf32>
    %25 = vector.shape_cast %24 : vector<1x4x16xf32> to vector<4x16xf32>
    %cst_22 = arith.constant dense<0.000000e+00> : vector<256x16xf32>
    %26 = tpu.matmul %16, %25, %cst_22 {dimension_numbers = #tpu.dot_dimension_numbers<[1], [0], [0], [1], [0, 0, 1, 1], [], []>} : vector<256x4xf32>, vector<4x16xf32>, vector<256x16xf32> -> vector<256x16xf32>
    %27 = arith.addf %23, %26 : vector<256x16xf32>
    %c2 = arith.constant 2 : index
    %c0_23 = arith.constant 0 : index
    %c0_24 = arith.constant 0 : index
    %28 = vector.load %arg5[%c2, %c0_23, %c0_24] : memref<4x4x16xf32, #tpu.memory_space<vmem>>, vector<1x4x16xf32>
    %29 = vector.shape_cast %28 : vector<1x4x16xf32> to vector<4x16xf32>
    %cst_25 = arith.constant dense<0.000000e+00> : vector<256x16xf32>
    %30 = tpu.matmul %17, %29, %cst_25 {dimension_numbers = #tpu.dot_dimension_numbers<[1], [0], [0], [1], [0, 0, 1, 1], [], []>} : vector<256x4xf32>, vector<4x16xf32>, vector<256x16xf32> -> vector<256x16xf32>
    %31 = arith.addf %27, %30 : vector<256x16xf32>
    %c3 = arith.constant 3 : index
    %c0_26 = arith.constant 0 : index
    %c0_27 = arith.constant 0 : index
    %32 = vector.load %arg5[%c3, %c0_26, %c0_27] : memref<4x4x16xf32, #tpu.memory_space<vmem>>, vector<1x4x16xf32>
    %33 = vector.shape_cast %32 : vector<1x4x16xf32> to vector<4x16xf32>
    %cst_28 = arith.constant dense<0.000000e+00> : vector<256x16xf32>
    %34 = tpu.matmul %20, %33, %cst_28 {dimension_numbers = #tpu.dot_dimension_numbers<[1], [0], [0], [1], [0, 0, 1, 1], [], []>} : vector<256x4xf32>, vector<4x16xf32>, vector<256x16xf32> -> vector<256x16xf32>
    %35 = arith.addf %31, %34 : vector<256x16xf32>
    %c0_29 = arith.constant 0 : index
    %c0_30 = arith.constant 0 : index
    %c0_31 = arith.constant 0 : index
    %36 = vector.load %arg6[%c0_29, %c0_30, %c0_31] : memref<1x256x16xf32, #tpu.memory_space<vmem>>, vector<1x256x16xf32>
    %37 = vector.shape_cast %36 : vector<1x256x16xf32> to vector<256x16xf32>
    %38 = vector.shape_cast %35 : vector<256x16xf32> to vector<1x256x16xf32>
    tpu.vector_store %arg6[%c0_29, %c0_30, %c0_31], %38 {strides = array<i32>} : memref<1x256x16xf32, #tpu.memory_space<vmem>>, vector<1x256x16xf32>,
    %cst_32 = arith.constant dense<0.000000e+00> : vector<16xf32>
    %39 = vector.multi_reduction <add>, %35, %cst_32 [0] : vector<256x16xf32> to vector<16xf32>
    %40 = vector.shape_cast %39 : vector<16xf32> to vector<1x16xf32>
    %c0_33 = arith.constant 0 : index
    %c0_34 = arith.constant 0 : index
    %c0_35 = arith.constant 0 : index
    %41 = vector.load %arg7[%c0_33, %c0_34, %c0_35] : memref<1x1x16xf32, #tpu.memory_space<vmem>>, vector<1x1x16xf32>
    %42 = vector.shape_cast %41 : vector<1x1x16xf32> to vector<1x16xf32>
    %43 = vector.shape_cast %40 : vector<1x16xf32> to vector<1x1x16xf32>
    tpu.vector_store %arg7[%c0_33, %c0_34, %c0_35], %43 {strides = array<i32>} : memref<1x1x16xf32, #tpu.memory_space<vmem>>, vector<1x1x16xf32>,
    %44 = arith.mulf %35, %35 : vector<256x16xf32>
    %cst_36 = arith.constant dense<0.000000e+00> : vector<16xf32>
    %45 = vector.multi_reduction <add>, %44, %cst_36 [0] : vector<256x16xf32> to vector<16xf32>
    %46 = vector.shape_cast %45 : vector<16xf32> to vector<1x16xf32>
    %c0_37 = arith.constant 0 : index
    %c0_38 = arith.constant 0 : index
    %c0_39 = arith.constant 0 : index
    %47 = vector.load %arg8[%c0_37, %c0_38, %c0_39] : memref<1x1x16xf32, #tpu.memory_space<vmem>>, vector<1x1x16xf32>
    %48 = vector.shape_cast %47 : vector<1x1x16xf32> to vector<1x16xf32>
    %49 = vector.shape_cast %46 : vector<1x16xf32> to vector<1x1x16xf32>
    tpu.vector_store %arg8[%c0_37, %c0_38, %c0_39], %49 {strides = array<i32>} : memref<1x1x16xf32, #tpu.memory_space<vmem>>, vector<1x1x16xf32>,
    return
  }
  func.func @transform_0(%arg0: i32) -> (i32, i32, i32) {
    %c0_i32 = arith.constant 0 : i32
    %c0_i32_0 = arith.constant 0 : i32
    %c0_i32_1 = arith.constant 0 : i32
    return %arg0, %c0_i32, %c0_i32_0 : i32, i32, i32
  }
  func.func @transform_1(%arg0: i32) -> (i32, i32) {
    %c0_i32 = arith.constant 0 : i32
    %c0_i32_0 = arith.constant 0 : i32
    %c0_i32_1 = arith.constant 0 : i32
    return %c0_i32, %c0_i32_0 : i32, i32
  }
  func.func @transform_2(%arg0: i32) -> (i32, i32) {
    %c0_i32 = arith.constant 0 : i32
    %c0_i32_0 = arith.constant 0 : i32
    %c0_i32_1 = arith.constant 0 : i32
    return %c0_i32, %c0_i32_0 : i32, i32
  }
  func.func @transform_3(%arg0: i32) -> (i32, i32) {
    %c0_i32 = arith.constant 0 : i32
    %c0_i32_0 = arith.constant 0 : i32
    %c0_i32_1 = arith.constant 0 : i32
    return %c0_i32, %c0_i32_0 : i32, i32
  }
  func.func @transform_4(%arg0: i32) -> (i32, i32, i32) {
    %c0_i32 = arith.constant 0 : i32
    %c0_i32_0 = arith.constant 0 : i32
    %c0_i32_1 = arith.constant 0 : i32
    %c0_i32_2 = arith.constant 0 : i32
    return %c0_i32, %c0_i32_0, %c0_i32_1 : i32, i32, i32
  }
  func.func @transform_5(%arg0: i32) -> (i32, i32, i32) {
    %c0_i32 = arith.constant 0 : i32
    %c0_i32_0 = arith.constant 0 : i32
    %c0_i32_1 = arith.constant 0 : i32
    return %arg0, %c0_i32, %c0_i32_0 : i32, i32, i32
  }
  func.func @transform_6(%arg0: i32) -> (i32, i32, i32) {
    %c0_i32 = arith.constant 0 : i32
    %c0_i32_0 = arith.constant 0 : i32
    %c0_i32_1 = arith.constant 0 : i32
    return %arg0, %c0_i32, %c0_i32_0 : i32, i32, i32
  }
  func.func @transform_7(%arg0: i32) -> (i32, i32, i32) {
    %c0_i32 = arith.constant 0 : i32
    %c0_i32_0 = arith.constant 0 : i32
    %c0_i32_1 = arith.constant 0 : i32
    return %arg0, %c0_i32, %c0_i32_0 : i32, i32, i32
  }
}

module attributes {stable_mosaic.version = 11 : i64} {
  func.func @_conv1_kernel(%arg0: i32, %arg1: memref<256x16xf32, #tpu.memory_space<vmem>>, %arg2: memref<16x4xf32, #tpu.memory_space<vmem>>, %arg3: memref<256x4xf32, #tpu.memory_space<vmem>>, %arg4: memref<1x1x4xf32, #tpu.memory_space<vmem>>, %arg5: memref<1x1x4xf32, #tpu.memory_space<vmem>>) attributes {dimension_semantics = [#tpu.dimension_semantics<parallel>], iteration_bounds = array<i64: 2>, scalar_prefetch = 0 : i64, scratch_operands = 0 : i64, tpu.core_type = #tpu.core_type<tc>, window_params = [{transform_indices = @transform_0, window_bounds = array<i64: 256, 16>}, {pipeline_mode = #tpu.pipeline_mode<synchronous>, transform_indices = @transform_1, window_bounds = array<i64: 16, 4>}, {transform_indices = @transform_2, window_bounds = array<i64: 256, 4>}, {transform_indices = @transform_3, window_bounds = array<i64: 1, 1, 4>}, {transform_indices = @transform_4, window_bounds = array<i64: 1, 1, 4>}]} {
    %c0 = arith.constant 0 : index
    %c0_0 = arith.constant 0 : index
    %0 = vector.load %arg1[%c0, %c0_0] : memref<256x16xf32, #tpu.memory_space<vmem>>, vector<256x16xf32>
    %c0_1 = arith.constant 0 : index
    %c0_2 = arith.constant 0 : index
    %1 = vector.load %arg2[%c0_1, %c0_2] : memref<16x4xf32, #tpu.memory_space<vmem>>, vector<16x4xf32>
    %cst = arith.constant dense<0.000000e+00> : vector<256x4xf32>
    %2 = tpu.matmul %0, %1, %cst {dimension_numbers = #tpu.dot_dimension_numbers<[1], [0], [0], [1], [0, 0, 1, 1], [], []>} : vector<256x16xf32>, vector<16x4xf32>, vector<256x4xf32> -> vector<256x4xf32>
    %c0_3 = arith.constant 0 : index
    %c0_4 = arith.constant 0 : index
    %3 = vector.load %arg3[%c0_3, %c0_4] : memref<256x4xf32, #tpu.memory_space<vmem>>, vector<256x4xf32>
    tpu.vector_store %arg3[%c0_3, %c0_4], %2 {strides = array<i32>} : memref<256x4xf32, #tpu.memory_space<vmem>>, vector<256x4xf32>,
    %cst_5 = arith.constant dense<0.000000e+00> : vector<4xf32>
    %4 = vector.multi_reduction <add>, %2, %cst_5 [0] : vector<256x4xf32> to vector<4xf32>
    %5 = vector.shape_cast %4 : vector<4xf32> to vector<1x4xf32>
    %c0_6 = arith.constant 0 : index
    %c0_7 = arith.constant 0 : index
    %c0_8 = arith.constant 0 : index
    %6 = vector.load %arg4[%c0_6, %c0_7, %c0_8] : memref<1x1x4xf32, #tpu.memory_space<vmem>>, vector<1x1x4xf32>
    %7 = vector.shape_cast %6 : vector<1x1x4xf32> to vector<1x4xf32>
    %8 = vector.shape_cast %5 : vector<1x4xf32> to vector<1x1x4xf32>
    tpu.vector_store %arg4[%c0_6, %c0_7, %c0_8], %8 {strides = array<i32>} : memref<1x1x4xf32, #tpu.memory_space<vmem>>, vector<1x1x4xf32>,
    %9 = arith.mulf %2, %2 : vector<256x4xf32>
    %cst_9 = arith.constant dense<0.000000e+00> : vector<4xf32>
    %10 = vector.multi_reduction <add>, %9, %cst_9 [0] : vector<256x4xf32> to vector<4xf32>
    %11 = vector.shape_cast %10 : vector<4xf32> to vector<1x4xf32>
    %c0_10 = arith.constant 0 : index
    %c0_11 = arith.constant 0 : index
    %c0_12 = arith.constant 0 : index
    %12 = vector.load %arg5[%c0_10, %c0_11, %c0_12] : memref<1x1x4xf32, #tpu.memory_space<vmem>>, vector<1x1x4xf32>
    %13 = vector.shape_cast %12 : vector<1x1x4xf32> to vector<1x4xf32>
    %14 = vector.shape_cast %11 : vector<1x4xf32> to vector<1x1x4xf32>
    tpu.vector_store %arg5[%c0_10, %c0_11, %c0_12], %14 {strides = array<i32>} : memref<1x1x4xf32, #tpu.memory_space<vmem>>, vector<1x1x4xf32>,
    return
  }
  func.func @transform_0(%arg0: i32) -> (i32, i32) {
    %c0_i32 = arith.constant 0 : i32
    %c0_i32_0 = arith.constant 0 : i32
    return %arg0, %c0_i32 : i32, i32
  }
  func.func @transform_1(%arg0: i32) -> (i32, i32) {
    %c0_i32 = arith.constant 0 : i32
    %c0_i32_0 = arith.constant 0 : i32
    %c0_i32_1 = arith.constant 0 : i32
    return %c0_i32, %c0_i32_0 : i32, i32
  }
  func.func @transform_2(%arg0: i32) -> (i32, i32) {
    %c0_i32 = arith.constant 0 : i32
    %c0_i32_0 = arith.constant 0 : i32
    return %arg0, %c0_i32 : i32, i32
  }
  func.func @transform_3(%arg0: i32) -> (i32, i32, i32) {
    %c0_i32 = arith.constant 0 : i32
    %c0_i32_0 = arith.constant 0 : i32
    %c0_i32_1 = arith.constant 0 : i32
    return %arg0, %c0_i32, %c0_i32_0 : i32, i32, i32
  }
  func.func @transform_4(%arg0: i32) -> (i32, i32, i32) {
    %c0_i32 = arith.constant 0 : i32
    %c0_i32_0 = arith.constant 0 : i32
    %c0_i32_1 = arith.constant 0 : i32
    return %arg0, %c0_i32, %c0_i32_0 : i32, i32, i32
  }
}

module attributes {stable_mosaic.version = 11 : i64} {
  func.func @_conv3_kernel(%arg0: i32, %arg1: memref<256x16xf32, #tpu.memory_space<vmem>>, %arg2: memref<1x16xf32, #tpu.memory_space<vmem>>, %arg3: memref<1x16xf32, #tpu.memory_space<vmem>>, %arg4: memref<16x32xf32, #tpu.memory_space<vmem>>, %arg5: memref<256x32xf32, #tpu.memory_space<vmem>>, %arg6: memref<1x1x32xf32, #tpu.memory_space<vmem>>, %arg7: memref<1x1x32xf32, #tpu.memory_space<vmem>>) attributes {dimension_semantics = [#tpu.dimension_semantics<parallel>], iteration_bounds = array<i64: 2>, scalar_prefetch = 0 : i64, scratch_operands = 0 : i64, tpu.core_type = #tpu.core_type<tc>, window_params = [{transform_indices = @transform_0, window_bounds = array<i64: 256, 16>}, {pipeline_mode = #tpu.pipeline_mode<synchronous>, transform_indices = @transform_1, window_bounds = array<i64: 1, 16>}, {pipeline_mode = #tpu.pipeline_mode<synchronous>, transform_indices = @transform_2, window_bounds = array<i64: 1, 16>}, {pipeline_mode = #tpu.pipeline_mode<synchronous>, transform_indices = @transform_3, window_bounds = array<i64: 16, 32>}, {transform_indices = @transform_4, window_bounds = array<i64: 256, 32>}, {transform_indices = @transform_5, window_bounds = array<i64: 1, 1, 32>}, {transform_indices = @transform_6, window_bounds = array<i64: 1, 1, 32>}]} {
    %c0 = arith.constant 0 : index
    %c0_0 = arith.constant 0 : index
    %0 = vector.load %arg1[%c0, %c0_0] : memref<256x16xf32, #tpu.memory_space<vmem>>, vector<256x16xf32>
    %c0_1 = arith.constant 0 : index
    %c0_2 = arith.constant 0 : index
    %1 = vector.load %arg2[%c0_1, %c0_2] : memref<1x16xf32, #tpu.memory_space<vmem>>, vector<1x16xf32>
    %2 = vector.broadcast %1 : vector<1x16xf32> to vector<256x16xf32>
    %3 = arith.subf %0, %2 : vector<256x16xf32>
    %c0_3 = arith.constant 0 : index
    %c0_4 = arith.constant 0 : index
    %4 = vector.load %arg3[%c0_3, %c0_4] : memref<1x16xf32, #tpu.memory_space<vmem>>, vector<1x16xf32>
    %5 = vector.broadcast %4 : vector<1x16xf32> to vector<256x16xf32>
    %6 = arith.mulf %3, %5 : vector<256x16xf32>
    %cst = arith.constant 0.000000e+00 : f32
    %7 = vector.broadcast %cst : f32 to vector<256x16xf32>
    %8 = arith.maximumf %6, %7 : vector<256x16xf32>
    %c0_5 = arith.constant 0 : index
    %c0_6 = arith.constant 0 : index
    %9 = vector.load %arg4[%c0_5, %c0_6] : memref<16x32xf32, #tpu.memory_space<vmem>>, vector<16x32xf32>
    %cst_7 = arith.constant dense<0.000000e+00> : vector<256x32xf32>
    %10 = tpu.matmul %8, %9, %cst_7 {dimension_numbers = #tpu.dot_dimension_numbers<[1], [0], [0], [1], [0, 0, 1, 1], [], []>} : vector<256x16xf32>, vector<16x32xf32>, vector<256x32xf32> -> vector<256x32xf32>
    %c0_8 = arith.constant 0 : index
    %c0_9 = arith.constant 0 : index
    %11 = vector.load %arg5[%c0_8, %c0_9] : memref<256x32xf32, #tpu.memory_space<vmem>>, vector<256x32xf32>
    tpu.vector_store %arg5[%c0_8, %c0_9], %10 {strides = array<i32>} : memref<256x32xf32, #tpu.memory_space<vmem>>, vector<256x32xf32>,
    %cst_10 = arith.constant dense<0.000000e+00> : vector<32xf32>
    %12 = vector.multi_reduction <add>, %10, %cst_10 [0] : vector<256x32xf32> to vector<32xf32>
    %13 = vector.shape_cast %12 : vector<32xf32> to vector<1x32xf32>
    %c0_11 = arith.constant 0 : index
    %c0_12 = arith.constant 0 : index
    %c0_13 = arith.constant 0 : index
    %14 = vector.load %arg6[%c0_11, %c0_12, %c0_13] : memref<1x1x32xf32, #tpu.memory_space<vmem>>, vector<1x1x32xf32>
    %15 = vector.shape_cast %14 : vector<1x1x32xf32> to vector<1x32xf32>
    %16 = vector.shape_cast %13 : vector<1x32xf32> to vector<1x1x32xf32>
    tpu.vector_store %arg6[%c0_11, %c0_12, %c0_13], %16 {strides = array<i32>} : memref<1x1x32xf32, #tpu.memory_space<vmem>>, vector<1x1x32xf32>,
    %17 = arith.mulf %10, %10 : vector<256x32xf32>
    %cst_14 = arith.constant dense<0.000000e+00> : vector<32xf32>
    %18 = vector.multi_reduction <add>, %17, %cst_14 [0] : vector<256x32xf32> to vector<32xf32>
    %19 = vector.shape_cast %18 : vector<32xf32> to vector<1x32xf32>
    %c0_15 = arith.constant 0 : index
    %c0_16 = arith.constant 0 : index
    %c0_17 = arith.constant 0 : index
    %20 = vector.load %arg7[%c0_15, %c0_16, %c0_17] : memref<1x1x32xf32, #tpu.memory_space<vmem>>, vector<1x1x32xf32>
    %21 = vector.shape_cast %20 : vector<1x1x32xf32> to vector<1x32xf32>
    %22 = vector.shape_cast %19 : vector<1x32xf32> to vector<1x1x32xf32>
    tpu.vector_store %arg7[%c0_15, %c0_16, %c0_17], %22 {strides = array<i32>} : memref<1x1x32xf32, #tpu.memory_space<vmem>>, vector<1x1x32xf32>,
    return
  }
  func.func @transform_0(%arg0: i32) -> (i32, i32) {
    %c0_i32 = arith.constant 0 : i32
    %c0_i32_0 = arith.constant 0 : i32
    return %arg0, %c0_i32 : i32, i32
  }
  func.func @transform_1(%arg0: i32) -> (i32, i32) {
    %c0_i32 = arith.constant 0 : i32
    %c0_i32_0 = arith.constant 0 : i32
    %c0_i32_1 = arith.constant 0 : i32
    return %c0_i32, %c0_i32_0 : i32, i32
  }
  func.func @transform_2(%arg0: i32) -> (i32, i32) {
    %c0_i32 = arith.constant 0 : i32
    %c0_i32_0 = arith.constant 0 : i32
    %c0_i32_1 = arith.constant 0 : i32
    return %c0_i32, %c0_i32_0 : i32, i32
  }
  func.func @transform_3(%arg0: i32) -> (i32, i32) {
    %c0_i32 = arith.constant 0 : i32
    %c0_i32_0 = arith.constant 0 : i32
    %c0_i32_1 = arith.constant 0 : i32
    return %c0_i32, %c0_i32_0 : i32, i32
  }
  func.func @transform_4(%arg0: i32) -> (i32, i32) {
    %c0_i32 = arith.constant 0 : i32
    %c0_i32_0 = arith.constant 0 : i32
    return %arg0, %c0_i32 : i32, i32
  }
  func.func @transform_5(%arg0: i32) -> (i32, i32, i32) {
    %c0_i32 = arith.constant 0 : i32
    %c0_i32_0 = arith.constant 0 : i32
    %c0_i32_1 = arith.constant 0 : i32
    return %arg0, %c0_i32, %c0_i32_0 : i32, i32, i32
  }
  func.func @transform_6(%arg0: i32) -> (i32, i32, i32) {
    %c0_i32 = arith.constant 0 : i32
    %c0_i32_0 = arith.constant 0 : i32
    %c0_i32_1 = arith.constant 0 : i32
    return %arg0, %c0_i32, %c0_i32_0 : i32, i32, i32
  }
}

module attributes {stable_mosaic.version = 11 : i64} {
  func.func @_bn3_kernel(%arg0: i32, %arg1: memref<256x32xf32, #tpu.memory_space<vmem>>, %arg2: memref<1x32xf32, #tpu.memory_space<vmem>>, %arg3: memref<1x32xf32, #tpu.memory_space<vmem>>, %arg4: memref<256x32xf32, #tpu.memory_space<vmem>>) attributes {dimension_semantics = [#tpu.dimension_semantics<parallel>], iteration_bounds = array<i64: 2>, scalar_prefetch = 0 : i64, scratch_operands = 0 : i64, tpu.core_type = #tpu.core_type<tc>, window_params = [{transform_indices = @transform_0, window_bounds = array<i64: 256, 32>}, {pipeline_mode = #tpu.pipeline_mode<synchronous>, transform_indices = @transform_1, window_bounds = array<i64: 1, 32>}, {pipeline_mode = #tpu.pipeline_mode<synchronous>, transform_indices = @transform_2, window_bounds = array<i64: 1, 32>}, {transform_indices = @transform_3, window_bounds = array<i64: 256, 32>}]} {
    %c0 = arith.constant 0 : index
    %c0_0 = arith.constant 0 : index
    %0 = vector.load %arg1[%c0, %c0_0] : memref<256x32xf32, #tpu.memory_space<vmem>>, vector<256x32xf32>
    %c0_1 = arith.constant 0 : index
    %c0_2 = arith.constant 0 : index
    %1 = vector.load %arg2[%c0_1, %c0_2] : memref<1x32xf32, #tpu.memory_space<vmem>>, vector<1x32xf32>
    %2 = vector.broadcast %1 : vector<1x32xf32> to vector<256x32xf32>
    %3 = arith.subf %0, %2 : vector<256x32xf32>
    %c0_3 = arith.constant 0 : index
    %c0_4 = arith.constant 0 : index
    %4 = vector.load %arg3[%c0_3, %c0_4] : memref<1x32xf32, #tpu.memory_space<vmem>>, vector<1x32xf32>
    %5 = vector.broadcast %4 : vector<1x32xf32> to vector<256x32xf32>
    %6 = arith.mulf %3, %5 : vector<256x32xf32>
    %cst = arith.constant 0.000000e+00 : f32
    %7 = vector.broadcast %cst : f32 to vector<256x32xf32>
    %8 = arith.maximumf %6, %7 : vector<256x32xf32>
    %c0_5 = arith.constant 0 : index
    %c0_6 = arith.constant 0 : index
    %9 = vector.load %arg4[%c0_5, %c0_6] : memref<256x32xf32, #tpu.memory_space<vmem>>, vector<256x32xf32>
    tpu.vector_store %arg4[%c0_5, %c0_6], %8 {strides = array<i32>} : memref<256x32xf32, #tpu.memory_space<vmem>>, vector<256x32xf32>,
    return
  }
  func.func @transform_0(%arg0: i32) -> (i32, i32) {
    %c0_i32 = arith.constant 0 : i32
    %c0_i32_0 = arith.constant 0 : i32
    return %arg0, %c0_i32 : i32, i32
  }
  func.func @transform_1(%arg0: i32) -> (i32, i32) {
    %c0_i32 = arith.constant 0 : i32
    %c0_i32_0 = arith.constant 0 : i32
    %c0_i32_1 = arith.constant 0 : i32
    return %c0_i32, %c0_i32_0 : i32, i32
  }
  func.func @transform_2(%arg0: i32) -> (i32, i32) {
    %c0_i32 = arith.constant 0 : i32
    %c0_i32_0 = arith.constant 0 : i32
    %c0_i32_1 = arith.constant 0 : i32
    return %c0_i32, %c0_i32_0 : i32, i32
  }
  func.func @transform_3(%arg0: i32) -> (i32, i32) {
    %c0_i32 = arith.constant 0 : i32
    %c0_i32_0 = arith.constant 0 : i32
    return %arg0, %c0_i32 : i32, i32
  }
}

</mosaic_0001>

<bundles_post_ra>
// kernel: squeeze.27
= control target key start
LH: loop header
LB: loop body
LE: loop exit
PB: predicated region body
PF: predicated region fallthrough
CT: control target
= control target key end

     0   :  { %s37_s8 = smov 116   ;;  %vm7_vm0 = vcmask 31744   ;;  %s38_s9 = smov 120   ;;  %s55_s0 = inlined_call_operand.vmem [shape: f32[16], index: 0, kind: input, shape index: {}]   ;;  %s56_s1 = inlined_call_operand.vmem [shape: f32[4,4], index: 1, kind: output, shape index: {}]  }
   0x1   :  { %v4_v0 = vld [vmem:[%s55_s0] sm:$0x1]  ;;  %s36_s0 = smov 124  }
   0x2   :  { %5 = vst [vmem:[#allocation1] sm:$0x1] %v4_v0 }
   0x9   :  { %v9_v1 = vld [vmem:[#allocation1] sm:$0x1]  }
   0xa   :  { %v21_v2 = vld [vmem:[#allocation1] sm:$0x1]   ;;  %10 = vrot.lane.b32.xlu0 %v9_v1, %s36_s0 }
   0xb   :  { %22 = vrot.lane.b32.xlu1 %v21_v2, %s37_s8  ;;  %v6_v3 = vld [vmem:[#allocation1] sm:$0x1]  }
   0xc   :  { %v15_v4 = vld [vmem:[#allocation1] sm:$0x1]   ;;  %8 = vst.msk [vmem:[#allocation0] sm:$0x1] %vm7_vm0, %v6_v3  }
   0xe   :  { %16 = vrot.lane.b32.xlu0 %v15_v4, %s38_s9 }
  0x7c   :  { %v11_v5 = vpop.permute.xlu0 %10  }
  0x7d   :  { %v23_v6 = vpop.permute.xlu1 %22   ;;  %14 = vst.msk [vmem:[#allocation0 + $0x1] sm:$0x1] %vm7_vm0, %v11_v5  }
  0x7e   :  { %26 = vst.msk [vmem:[#allocation0 + $0x3] sm:$0x1] %vm7_vm0, %v23_v6  }
  0x80   :  { %v17_v7 = vpop.permute.xlu0 %16  }
  0x81   :  { %20 = vst.msk [vmem:[#allocation0 + $0x2] sm:$0x1] %vm7_vm0, %v17_v7  }
  0x88   :  { %v30_v8 = vld [vmem:[#allocation0] sm:$0xf] }
  0x89   :  { %32 = vst [vmem:[%s56_s1] sm:$0xf] %v30_v8 }

// kernel: tile.27
= control target key start
LH: loop header
LB: loop body
LE: loop exit
PB: predicated region body
PF: predicated region fallthrough
CT: control target
= control target key end

     0   :  { %s22_s0 = inlined_call_operand.vmem [shape: f32[4], index: 0, kind: input, shape index: {}]   ;;  %s23_s1 = inlined_call_operand.vmem [shape: f32[4,4], index: 1, kind: output, shape index: {}]  }
   0x1   :  { %v4_v0 = vld [vmem:[%s22_s0] ss:$0 sm:$0xff] }
   0x2   :  { %5 = vst [vmem:[%s23_s1] sm:$0xf] %v4_v0 }

// kernel: tile.29
= control target key start
LH: loop header
LB: loop body
LE: loop exit
PB: predicated region body
PF: predicated region fallthrough
CT: control target
= control target key end

     0   :  { %vm7_vm0 = vcmask 31744   ;;  %s37_s8 = smov 4   ;;  %s38_s9 = smov 8   ;;  %vm13_vm1 = vcmask 130144   ;;  %vm19_vm2 = vcmask 97344   ;;  %vm25_vm3 = vcmask 64544   ;;  %s55_s0 = inlined_call_operand.vmem [shape: f32[4,4], index: 0, kind: input, shape index: {}]   ;;  %s56_s1 = inlined_call_operand.vmem [shape: f32[1,16], index: 1, kind: output, shape index: {}]  }
   0x1   :  { %v4_v0 = vld [vmem:[%s55_s0] sm:$0xf]  ;;  %s36_s0 = smov 12  }
   0x2   :  { %5 = vst [vmem:[#allocation1] sm:$0xf] %v4_v0 }
   0x9   :  { %v10_v1 = vld [vmem:[#allocation1 + $0x3] sm:$0x1]   ;;  %v22_v2 = vld [vmem:[#allocation1 + $0x1] sm:$0x1]   ;;  %v6_v3 = vld [vmem:[#allocation1] sm:$0x1]  }
   0xa   :  { %11 = vrot.lane.b32.xlu0 %v10_v1, %s36_s0  ;;  %23 = vrot.lane.b32.xlu1 %v22_v2, %s37_s8  ;;  %v16_v4 = vld [vmem:[#allocation1 + $0x2] sm:$0x1]   ;;  %8 = vst.msk [vmem:[#allocation0] sm:$0x1] %vm7_vm0, %v6_v3  }
   0xe   :  { %17 = vrot.lane.b32.xlu0 %v16_v4, %s38_s9 }
  0x7c   :  { %v12_v5 = vpop.permute.xlu0 %11   ;;  %v24_v6 = vpop.permute.xlu1 %23  }
  0x7d   :  { %14 = vst.msk [vmem:[#allocation0] sm:$0x1] %vm13_vm1, %v12_v5  }
  0x80   :  { %v18_v7 = vpop.permute.xlu0 %17  }
  0x81   :  { %20 = vst.msk [vmem:[#allocation0] sm:$0x1] %vm19_vm2, %v18_v7  }
  0x82   :  { %26 = vst.msk [vmem:[#allocation0] sm:$0x1] %vm25_vm3, %v24_v6  }
  0x89   :  { %v30_v8 = vld [vmem:[#allocation0] sm:$0x1] }
  0x8a   :  { %32 = vst [vmem:[%s56_s1] sm:$0x1] %v30_v8 }

// kernel: squeeze.29
= control target key start
LH: loop header
LB: loop body
LE: loop exit
PB: predicated region body
PF: predicated region fallthrough
CT: control target
= control target key end

     0   :  { %s37_s8 = smov 104   ;;  %vm7_vm0 = vcmask 64512   ;;  %s38_s9 = smov 112   ;;  %s55_s0 = inlined_call_operand.vmem [shape: f32[32], index: 0, kind: input, shape index: {}]   ;;  %s56_s1 = inlined_call_operand.vmem [shape: f32[4,8], index: 1, kind: output, shape index: {}]  }
   0x1   :  { %v4_v0 = vld [vmem:[%s55_s0] sm:$0x1]  ;;  %s36_s0 = smov 120  }
   0x2   :  { %5 = vst [vmem:[#allocation1] sm:$0x1] %v4_v0 }
   0x9   :  { %v9_v1 = vld [vmem:[#allocation1] sm:$0x1]  }
   0xa   :  { %v21_v2 = vld [vmem:[#allocation1] sm:$0x1]   ;;  %10 = vrot.lane.b32.xlu0 %v9_v1, %s36_s0 }
   0xb   :  { %22 = vrot.lane.b32.xlu1 %v21_v2, %s37_s8  ;;  %v6_v3 = vld [vmem:[#allocation1] sm:$0x1]  }
   0xc   :  { %v15_v4 = vld [vmem:[#allocation1] sm:$0x1]   ;;  %8 = vst.msk [vmem:[#allocation0] sm:$0x1] %vm7_vm0, %v6_v3  }
   0xe   :  { %16 = vrot.lane.b32.xlu0 %v15_v4, %s38_s9 }
  0x7c   :  { %v11_v5 = vpop.permute.xlu0 %10  }
  0x7d   :  { %v23_v6 = vpop.permute.xlu1 %22   ;;  %14 = vst.msk [vmem:[#allocation0 + $0x1] sm:$0x1] %vm7_vm0, %v11_v5  }
  0x7e   :  { %26 = vst.msk [vmem:[#allocation0 + $0x3] sm:$0x1] %vm7_vm0, %v23_v6  }
  0x80   :  { %v17_v7 = vpop.permute.xlu0 %16  }
  0x81   :  { %20 = vst.msk [vmem:[#allocation0 + $0x2] sm:$0x1] %vm7_vm0, %v17_v7  }
  0x88   :  { %v30_v8 = vld [vmem:[#allocation0] sm:$0xf] }
  0x89   :  { %32 = vst [vmem:[%s56_s1] sm:$0xf] %v30_v8 }

// kernel: tile.37
= control target key start
LH: loop header
LB: loop body
LE: loop exit
PB: predicated region body
PF: predicated region fallthrough
CT: control target
= control target key end

     0   :  { %s22_s0 = inlined_call_operand.vmem [shape: f32[8], index: 0, kind: input, shape index: {}]   ;;  %s23_s1 = inlined_call_operand.vmem [shape: f32[4,8], index: 1, kind: output, shape index: {}]  }
   0x1   :  { %v4_v0 = vld [vmem:[%s22_s0] ss:$0 sm:$0xff] }
   0x2   :  { %5 = vst [vmem:[%s23_s1] sm:$0xf] %v4_v0 }

// kernel: tile.39
= control target key start
LH: loop header
LB: loop body
LE: loop exit
PB: predicated region body
PF: predicated region fallthrough
CT: control target
= control target key end

     0   :  { %vm7_vm0 = vcmask 64512   ;;  %s37_s8 = smov 8   ;;  %s38_s9 = smov 16   ;;  %vm13_vm1 = vcmask 261312   ;;  %vm19_vm2 = vcmask 195712   ;;  %vm25_vm3 = vcmask 130112   ;;  %s55_s0 = inlined_call_operand.vmem [shape: f32[4,8], index: 0, kind: input, shape index: {}]   ;;  %s56_s1 = inlined_call_operand.vmem [shape: f32[1,32], index: 1, kind: output, shape index: {}]  }
   0x1   :  { %v4_v0 = vld [vmem:[%s55_s0] sm:$0xf]  ;;  %s36_s0 = smov 24  }
   0x2   :  { %5 = vst [vmem:[#allocation1] sm:$0xf] %v4_v0 }
   0x9   :  { %v10_v1 = vld [vmem:[#allocation1 + $0x3] sm:$0x1]   ;;  %v22_v2 = vld [vmem:[#allocation1 + $0x1] sm:$0x1]   ;;  %v6_v3 = vld [vmem:[#allocation1] sm:$0x1]  }
   0xa   :  { %11 = vrot.lane.b32.xlu0 %v10_v1, %s36_s0  ;;  %23 = vrot.lane.b32.xlu1 %v22_v2, %s37_s8  ;;  %v16_v4 = vld [vmem:[#allocation1 + $0x2] sm:$0x1]   ;;  %8 = vst.msk [vmem:[#allocation0] sm:$0x1] %vm7_vm0, %v6_v3  }
   0xe   :  { %17 = vrot.lane.b32.xlu0 %v16_v4, %s38_s9 }
  0x7c   :  { %v12_v5 = vpop.permute.xlu0 %11   ;;  %v24_v6 = vpop.permute.xlu1 %23  }
  0x7d   :  { %14 = vst.msk [vmem:[#allocation0] sm:$0x1] %vm13_vm1, %v12_v5  }
  0x80   :  { %v18_v7 = vpop.permute.xlu0 %17  }
  0x81   :  { %20 = vst.msk [vmem:[#allocation0] sm:$0x1] %vm19_vm2, %v18_v7  }
  0x82   :  { %26 = vst.msk [vmem:[#allocation0] sm:$0x1] %vm25_vm3, %v24_v6  }
  0x89   :  { %v30_v8 = vld [vmem:[#allocation0] sm:$0x1] }
  0x8a   :  { %32 = vst [vmem:[%s56_s1] sm:$0x1] %v30_v8 }

// kernel: decoder_block_forward.4
= control target key start
LH: loop header
LB: loop body
LE: loop exit
PB: predicated region body
PF: predicated region fallthrough
CT: control target
= control target key end

     0   :  { %s1062_s15 = smov 0   ;;  %s1398_s0 = inlined_call_operand.vmem [shape: f32[512,16], index: 0, kind: input, shape index: {}]   ;;  %s1399_s1 = inlined_call_operand.vmem [shape: f32[16,4], index: 1, kind: input, shape index: {}]   ;;  %s1400_s2 = inlined_call_operand.vmem [shape: f32[512,4], index: 2, kind: output, shape index: {0}]   ;;  %s1401_s3 = inlined_call_operand.vmem [shape: f32[2,1,4], index: 3, kind: output, shape index: {1}]   ;;  %s1402_s4 = inlined_call_operand.vmem [shape: f32[2,1,4], index: 4, kind: output, shape index: {2}]  }
   0x1 LB: > { %s1068_s16 = sadd.s32 4294967295, %s1035_s15   ;;  %p890_p0 = scmp.ge.s32.totalorder %s1035_s15, 1  ;;  %s1035_s15 = sphi %s1062_s15, %s15_s15  }
   0x2   : > { %p168_p1 = scmp.lt.s32.totalorder %s1035_s15, 3 }
   0x4   : > { %p169_p2 = pnand %p890_p0, %p168_p1 }
   0x5   : > { %v250_v0 = vld [vmem:[%s1399_s1] sm:$0xff] (!%p169_p2)  ;;  %v251_v1 = vld [vmem:[%s1399_s1 + $0x8] sm:$0xff] (!%p169_p2)  ;;  %s891_s21 = sshll.u32 (!%p169_p2), %s1068_s16, 5  ;;  %vm252_vm0 = vcmask (!%p169_p2), 130048   ;;  %vm574_vm1 = vcmask (!%p169_p2), 31744   ;;  %p212_p4 = scmp.lt.s32.totalorder (!%p169_p2), %s1068_s16, 1 }
   0x6   : > { %172 = sbr.rel (%p169_p2) target bundleno = 311 (0x137), region = 28  ;;  %v1015_v2 = vpack.c.bf16 (!%p169_p2), %v251_v1, %v250_v0  ;;  %p201_p3 = scmp.lt.s32.totalorder (!%p169_p2), %s891_s21, 63  ;;  %vm676_vm2 = vcmask (!%p169_p2), 24576  }
   0x8   : > { %1016 = vmatprep.subr.bf16.mxu0 (!%p169_p2), %v1015_v2  ;;  %1019 = vmatprep.subr.bf16.mxu1 (!%p169_p2), %v1015_v2 }
   0x9   : > { %1018 = vmatpush3.bf16.msra.mxu0 (!%p169_p2), %v1015_v2  ;;  %1020 = vmatpush3.bf16.msra.mxu1 (!%p169_p2), %v1015_v2 }
   0xd   : > { %s1404_s21 = smov (!%p201_p3, %s891_s21), 63  ;;  %s1406_s16 = smov (!%p212_p4, %s1068_s16), 1 }
   0xe   : > { %s892_s22 = sshll.u32 %s1404_s21, 3  ;;  %s214_s5 = scalar_lea.vmem %s1401_s3, %s1406_s16 }
   0xf   : > { %s1087_s25 = scalar_lea.vmem %s1398_s0, %s892_s22  ;;  %s1158_s28 = scalar_lea.vmem %s1400_s2, %s892_s22 }
  0x10   : > { %v218_v3 = vld [vmem:[%s1087_s25] sm:$0xff]  ;;  %v219_v4 = vld [vmem:[%s1087_s25 + $0x8] sm:$0xff]  ;;  %v220_v5 = vld [vmem:[%s1087_s25 + $0x10] sm:$0xff]  ;;  %s217_s8 = scalar_lea.vmem %s1402_s4, %s1406_s16 }
  0x11   : > { %967 = vmatprep.mubr.msk.f32.mxu0 %vm252_vm0, %v218_v3  ;;  %v221_v6 = vld [vmem:[%s1087_s25 + $0x18] sm:$0xff]  ;;  %v222_v7 = vld [vmem:[%s1087_s25 + $0x20] sm:$0xff]  ;;  %v235_v9 = vld [vmem:[%s1087_s25 + $0x88] sm:$0xff] }
  0x12   : > { %968 = vmatmul.mubr.msk.f32.vlgmr.msra.gmra.mrb[0].mxu0 %vm252_vm0, %v219_v4  ;;  %v234_v8 = vld [vmem:[%s1087_s25 + $0x80] sm:$0xff]  ;;  %v236_v10 = vld [vmem:[%s1087_s25 + $0x90] sm:$0xff]  ;;  %v223_v11 = vld [vmem:[%s1087_s25 + $0x28] sm:$0xff] }
  0x13   : > { %970 = vmatprep.mubr.msk.f32.mxu0 %vm252_vm0, %v220_v5  ;;  %991 = vmatprep.mubr.msk.f32.mxu1 %vm252_vm0, %v234_v8  ;;  %v224_v12 = vld [vmem:[%s1087_s25 + $0x30] sm:$0xff]  ;;  %v237_v13 = vld [vmem:[%s1087_s25 + $0x98] sm:$0xff]  ;;  %v238_v14 = vld [vmem:[%s1087_s25 + $0xa0] sm:$0xff] }
  0x14   : > { %992 = vmatmul.mubr.msk.f32.vlgmr.msra.gmra.mrb[0].mxu1 %vm252_vm0, %v235_v9  ;;  %v225_v15 = vld [vmem:[%s1087_s25 + $0x38] sm:$0xff]  ;;  %v226_v16 = vld [vmem:[%s1087_s25 + $0x40] sm:$0xff]  ;;  %v239_v17 = vld [vmem:[%s1087_s25 + $0xa8] sm:$0xff] }
  0x15   : > { %994 = vmatprep.mubr.msk.f32.mxu1 %vm252_vm0, %v236_v10  ;;  %v240_v18 = vld [vmem:[%s1087_s25 + $0xb0] sm:$0xff]  ;;  %v227_v19 = vld [vmem:[%s1087_s25 + $0x48] sm:$0xff]  ;;  %v241_v21 = vld [vmem:[%s1087_s25 + $0xb8] sm:$0xff] }
  0x16   : > { %971 = vmatmul.mubr.msk.f32.gmra.mrb[2].mxu0 %vm252_vm0, %v221_v6  ;;  %v228_v20 = vld [vmem:[%s1087_s25 + $0x50] sm:$0xff]  ;;  %v242_v22 = vld [vmem:[%s1087_s25 + $0xc0] sm:$0xff]  ;;  %v229_v23 = vld [vmem:[%s1087_s25 + $0x58] sm:$0xff] }
  0x17   : > { %973 = vmatprep.mubr.msk.f32.mxu0 %vm252_vm0, %v222_v7  ;;  %v230_v24 = vld [vmem:[%s1087_s25 + $0x60] sm:$0xff]  ;;  %v243_v25 = vld [vmem:[%s1087_s25 + $0xc8] sm:$0xff]  ;;  %v244_v26 = vld [vmem:[%s1087_s25 + $0xd0] sm:$0xff] }
  0x18   : > { %995 = vmatmul.mubr.msk.f32.gmra.mrb[2].mxu1 %vm252_vm0, %v237_v13  ;;  %v231_v27 = vld [vmem:[%s1087_s25 + $0x68] sm:$0xff]  ;;  %v232_v28 = vld [vmem:[%s1087_s25 + $0x70] sm:$0xff]  ;;  %v245_v29 = vld [vmem:[%s1087_s25 + $0xd8] sm:$0xff] }
  0x19   : > { %997 = vmatprep.mubr.msk.f32.mxu1 %vm252_vm0, %v238_v14  ;;  %v246_v30 = vld [vmem:[%s1087_s25 + $0xe0] sm:$0xff]  ;;  %v233_v31 = vld [vmem:[%s1087_s25 + $0x78] sm:$0xff]  ;;  %v247_v32 = vld [vmem:[%s1087_s25 + $0xe8] sm:$0xff] }
  0x1a   : > { %974 = vmatmul.mubr.msk.f32.gmra.mrb[4].mxu0 %vm252_vm0, %v223_v11  ;;  %v248_v33 = vld [vmem:[%s1087_s25 + $0xf0] sm:$0xff]  ;;  %v249_v34 = vld [vmem:[%s1087_s25 + $0xf8] sm:$0xff] }
  0x1b   : > { %976 = vmatprep.mubr.msk.f32.mxu0 %vm252_vm0, %v224_v12 }
  0x1c   : > { %998 = vmatmul.mubr.msk.f32.gmra.mrb[4].mxu1 %vm252_vm0, %v239_v17 }
  0x1d   : > { %1000 = vmatprep.mubr.msk.f32.mxu1 %vm252_vm0, %v240_v18 }
  0x1e   : > { %977 = vmatmul.mubr.msk.f32.gmra.mrb[6].mxu0 %vm252_vm0, %v225_v15 }
  0x1f   : > { %979 = vmatprep.mubr.msk.f32.mxu0 %vm252_vm0, %v226_v16 }
  0x20   : > { %1001 = vmatmul.mubr.msk.f32.gmra.mrb[6].mxu1 %vm252_vm0, %v241_v21 }
  0x21   : > { %1003 = vmatprep.mubr.msk.f32.mxu1 %vm252_vm0, %v242_v22 }
  0x22   : > { %980 = vmatmul.mubr.msk.f32.gmra.mrb[8].mxu0 %vm252_vm0, %v227_v19 }
  0x23   : > { %982 = vmatprep.mubr.msk.f32.mxu0 %vm252_vm0, %v228_v20 }
  0x24   : > { %1004 = vmatmul.mubr.msk.f32.gmra.mrb[8].mxu1 %vm252_vm0, %v243_v25 }
  0x25   : > { %1006 = vmatprep.mubr.msk.f32.mxu1 %vm252_vm0, %v244_v26 }
  0x26   : > { %983 = vmatmul.mubr.msk.f32.gmra.mrb[10].mxu0 %vm252_vm0, %v229_v23 }
  0x27   : > { %985 = vmatprep.mubr.msk.f32.mxu0 %vm252_vm0, %v230_v24 }
  0x28   : > { %1007 = vmatmul.mubr.msk.f32.gmra.mrb[10].mxu1 %vm252_vm0, %v245_v29 }
  0x29   : > { %1009 = vmatprep.mubr.msk.f32.mxu1 %vm252_vm0, %v246_v30 }
  0x2a   : > { %986 = vmatmul.mubr.msk.f32.gmra.mrb[12].mxu0 %vm252_vm0, %v231_v27 }
  0x2b   : > { %988 = vmatprep.mubr.msk.f32.mxu0 %vm252_vm0, %v232_v28 }
  0x2c   : > { %1010 = vmatmul.mubr.msk.f32.gmra.mrb[12].mxu1 %vm252_vm0, %v247_v32 }
  0x2d   : > { %1012 = vmatprep.mubr.msk.f32.mxu1 %vm252_vm0, %v248_v33 }
  0x2e   : > { %989 = vmatmul.mubr.msk.f32.gmra.mrb[14].mxu0 %vm252_vm0, %v233_v31 }
  0x30   : > { %1013 = vmatmul.mubr.msk.f32.gmra.mrb[14].mxu1 %vm252_vm0, %v249_v34 }
  0xe5   : > { %v969_v35 = vpop.f32.mrb[0].mxu0 }
  0xe6   : > { %576 = vst.msk [vmem:[%s1158_s28 + $0x8] sm:$0xff] %vm574_vm1, %v969_v35  ;;  %v608_v36 = vsel %vm574_vm1, %v969_v35, 0.0  ;;  %v679_v37 = vmul.f32 %v969_v35, %v969_v35  ;;  %v415_v38 = vpop.f32.mrb[1].mxu0 }
  0xe7   : > { %575 = vst.msk [vmem:[%s1158_s28] sm:$0xff] %vm574_vm1, %v415_v38  ;;  %v607_v39 = vsel %vm574_vm1, %v415_v38, 0.0  ;;  %v678_v40 = vmul.f32 %v415_v38, %v415_v38  ;;  %v1170_v47 = vpop.f32.mrb[0].mxu1 }
  0xe8   : > { %v711_v41 = vsel %vm574_vm1, %v679_v37, 0.0  ;;  %v609_v42 = vadd.f32 %v608_v36, %v607_v39  ;;  %592 = vst.msk [vmem:[%s1158_s28 + $0x88] sm:$0xff] %vm574_vm1, %v1170_v47  ;;  %v1178_v51 = vpop.f32.mrb[1].mxu1 }
  0xe9   : > { %v710_v43 = vsel %vm574_vm1, %v678_v40, 0.0  ;;  %v972_v44 = vpop.f32.mrb[2].mxu0  ;;  %591 = vst.msk [vmem:[%s1158_s28 + $0x80] sm:$0xff] %vm574_vm1, %v1178_v51 }
  0xea   : > { %v712_v45 = vadd.f32 %v711_v41, %v710_v43  ;;  %578 = vst.msk [vmem:[%s1158_s28 + $0x18] sm:$0xff] %vm574_vm1, %v972_v44  ;;  %v425_v46 = vpop.f32.mrb[3].mxu0  ;;  %v681_v48 = vmul.f32 %v972_v44, %v972_v44  ;;  %v612_v53 = vsel %vm574_vm1, %v972_v44, 0.0 }
  0xeb   : > { %577 = vst.msk [vmem:[%s1158_s28 + $0x10] sm:$0xff] %vm574_vm1, %v425_v46  ;;  %v610_v49 = vsel %vm574_vm1, %v425_v46, 0.0  ;;  %v680_v50 = vmul.f32 %v425_v46, %v425_v46  ;;  %v1187_v59 = vpop.f32.mrb[2].mxu1 }
  0xec   : > { %v611_v52 = vadd.f32 %v610_v49, %v609_v42  ;;  %v715_v60 = vsel %vm574_vm1, %v681_v48, 0.0  ;;  %594 = vst.msk [vmem:[%s1158_s28 + $0x98] sm:$0xff] %vm574_vm1, %v1187_v59  ;;  %v1196_v0 = vpop.f32.mrb[3].mxu1 }
  0xed   : > { %v713_v54 = vsel %vm574_vm1, %v680_v50, 0.0  ;;  %v975_v55 = vpop.f32.mrb[4].mxu0  ;;  %593 = vst.msk [vmem:[%s1158_s28 + $0x90] sm:$0xff] %vm574_vm1, %v1196_v0 }
  0xee   : > { %v714_v56 = vadd.f32 %v713_v54, %v712_v45  ;;  %580 = vst.msk [vmem:[%s1158_s28 + $0x28] sm:$0xff] %vm574_vm1, %v975_v55  ;;  %v435_v57 = vpop.f32.mrb[5].mxu0  ;;  %v613_v58 = vadd.f32 %v612_v53, %v611_v52  ;;  %v683_v61 = vmul.f32 %v975_v55, %v975_v55  ;;  %v616_v3 = vsel %vm574_vm1, %v975_v55, 0.0 }
  0xef   : > { %579 = vst.msk [vmem:[%s1158_s28 + $0x20] sm:$0xff] %vm574_vm1, %v435_v57  ;;  %v614_v62 = vsel %vm574_vm1, %v435_v57, 0.0  ;;  %v682_v63 = vmul.f32 %v435_v57, %v435_v57  ;;  %v1205_v9 = vpop.f32.mrb[4].mxu1 }
  0xf0   : > { %v615_v1 = vadd.f32 %v614_v62, %v613_v58  ;;  %v716_v2 = vadd.f32 %v715_v60, %v714_v56  ;;  %v719_v10 = vsel %vm574_vm1, %v683_v61, 0.0  ;;  %596 = vst.msk [vmem:[%s1158_s28 + $0xa8] sm:$0xff] %vm574_vm1, %v1205_v9  ;;  %v1214_v14 = vpop.f32.mrb[5].mxu1 }
  0xf1   : > { %v717_v4 = vsel %vm574_vm1, %v682_v63, 0.0  ;;  %v978_v5 = vpop.f32.mrb[6].mxu0  ;;  %595 = vst.msk [vmem:[%s1158_s28 + $0xa0] sm:$0xff] %vm574_vm1, %v1214_v14 }
  0xf2   : > { %v718_v6 = vadd.f32 %v717_v4, %v716_v2  ;;  %582 = vst.msk [vmem:[%s1158_s28 + $0x38] sm:$0xff] %vm574_vm1, %v978_v5  ;;  %v445_v7 = vpop.f32.mrb[7].mxu0  ;;  %v617_v8 = vadd.f32 %v616_v3, %v615_v1  ;;  %v685_v11 = vmul.f32 %v978_v5, %v978_v5  ;;  %v620_v17 = vsel %vm574_vm1, %v978_v5, 0.0 }
  0xf3   : > { %581 = vst.msk [vmem:[%s1158_s28 + $0x30] sm:$0xff] %vm574_vm1, %v445_v7  ;;  %v618_v12 = vsel %vm574_vm1, %v445_v7, 0.0  ;;  %v684_v13 = vmul.f32 %v445_v7, %v445_v7  ;;  %v1223_v23 = vpop.f32.mrb[6].mxu1  ;;  %v694_v5 = vmul.f32 %v1178_v51, %v1178_v51 }
  0xf4   : > { %v619_v15 = vadd.f32 %v618_v12, %v617_v8  ;;  %v720_v16 = vadd.f32 %v719_v10, %v718_v6  ;;  %v723_v24 = vsel %vm574_vm1, %v685_v11, 0.0  ;;  %598 = vst.msk [vmem:[%s1158_s28 + $0xb8] sm:$0xff] %vm574_vm1, %v1223_v23  ;;  %v1232_v28 = vpop.f32.mrb[7].mxu1 }
  0xf5   : > { %v721_v18 = vsel %vm574_vm1, %v684_v13, 0.0  ;;  %v981_v19 = vpop.f32.mrb[8].mxu0  ;;  %597 = vst.msk [vmem:[%s1158_s28 + $0xb0] sm:$0xff] %vm574_vm1, %v1232_v28 }
  0xf6   : > { %v722_v20 = vadd.f32 %v721_v18, %v720_v16  ;;  %584 = vst.msk [vmem:[%s1158_s28 + $0x48] sm:$0xff] %vm574_vm1, %v981_v19  ;;  %v455_v21 = vpop.f32.mrb[9].mxu0  ;;  %v621_v22 = vadd.f32 %v620_v17, %v619_v15  ;;  %v687_v25 = vmul.f32 %v981_v19, %v981_v19  ;;  %v624_v31 = vsel %vm574_vm1, %v981_v19, 0.0 }
  0xf7   : > { %583 = vst.msk [vmem:[%s1158_s28 + $0x40] sm:$0xff] %vm574_vm1, %v455_v21  ;;  %v622_v26 = vsel %vm574_vm1, %v455_v21, 0.0  ;;  %v686_v27 = vmul.f32 %v455_v21, %v455_v21  ;;  %v1241_v37 = vpop.f32.mrb[8].mxu1  ;;  %v638_v18 = vsel %vm574_vm1, %v1178_v51, 0.0  ;;  %v695_v21 = vmul.f32 %v1170_v47, %v1170_v47 }
  0xf8   : > { %v623_v29 = vadd.f32 %v622_v26, %v621_v22  ;;  %v724_v30 = vadd.f32 %v723_v24, %v722_v20  ;;  %v727_v38 = vsel %vm574_vm1, %v687_v25, 0.0  ;;  %600 = vst.msk [vmem:[%s1158_s28 + $0xc8] sm:$0xff] %vm574_vm1, %v1241_v37  ;;  %v1250_v42 = vpop.f32.mrb[9].mxu1  ;;  %v741_v25 = vsel %vm574_vm1, %v694_v5, 0.0 }
  0xf9   : > { %v725_v32 = vsel %vm574_vm1, %v686_v27, 0.0  ;;  %v984_v33 = vpop.f32.mrb[10].mxu0  ;;  %599 = vst.msk [vmem:[%s1158_s28 + $0xc0] sm:$0xff] %vm574_vm1, %v1250_v42  ;;  %v696_v26 = vmul.f32 %v1196_v0, %v1196_v0  ;;  %v703_v5 = vmul.f32 %v1241_v37, %v1241_v37 }
  0xfa   : > { %v726_v34 = vadd.f32 %v725_v32, %v724_v30  ;;  %586 = vst.msk [vmem:[%s1158_s28 + $0x58] sm:$0xff] %vm574_vm1, %v984_v33  ;;  %v465_v35 = vpop.f32.mrb[11].mxu0  ;;  %v625_v36 = vadd.f32 %v624_v31, %v623_v29  ;;  %v689_v39 = vmul.f32 %v984_v33, %v984_v33  ;;  %v628_v45 = vsel %vm574_vm1, %v984_v33, 0.0 }
  0xfb   : > { %585 = vst.msk [vmem:[%s1158_s28 + $0x50] sm:$0xff] %vm574_vm1, %v465_v35  ;;  %v626_v40 = vsel %vm574_vm1, %v465_v35, 0.0  ;;  %v688_v41 = vmul.f32 %v465_v35, %v465_v35  ;;  %v1259_v53 = vpop.f32.mrb[10].mxu1  ;;  %v640_v31 = vsel %vm574_vm1, %v1170_v47, 0.0  ;;  %v642_v32 = vsel %vm574_vm1, %v1196_v0, 0.0 }
  0xfc   : > { %v627_v43 = vadd.f32 %v626_v40, %v625_v36  ;;  %v728_v44 = vadd.f32 %v727_v38, %v726_v34  ;;  %v731_v54 = vsel %vm574_vm1, %v689_v39, 0.0  ;;  %602 = vst.msk [vmem:[%s1158_s28 + $0xd8] sm:$0xff] %vm574_vm1, %v1259_v53  ;;  %v1268_v58 = vpop.f32.mrb[11].mxu1  ;;  %v743_v36 = vsel %vm574_vm1, %v695_v21, 0.0 }
  0xfd   : > { %v729_v46 = vsel %vm574_vm1, %v688_v41, 0.0  ;;  %v987_v48 = vpop.f32.mrb[12].mxu0  ;;  %601 = vst.msk [vmem:[%s1158_s28 + $0xd0] sm:$0xff] %vm574_vm1, %v1268_v58  ;;  %v697_v38 = vmul.f32 %v1187_v59, %v1187_v59  ;;  %v745_v39 = vsel %vm574_vm1, %v696_v26, 0.0  ;;  %v698_v40 = vmul.f32 %v1214_v14, %v1214_v14 }
  0xfe   : > { %v730_v49 = vadd.f32 %v729_v46, %v728_v44  ;;  %588 = vst.msk [vmem:[%s1158_s28 + $0x68] sm:$0xff] %vm574_vm1, %v987_v48  ;;  %v475_v50 = vpop.f32.mrb[13].mxu0  ;;  %v629_v52 = vadd.f32 %v628_v45, %v627_v43  ;;  %v691_v55 = vmul.f32 %v987_v48, %v987_v48  ;;  %v632_v62 = vsel %vm574_vm1, %v987_v48, 0.0 }
  0xff   : > { %587 = vst.msk [vmem:[%s1158_s28 + $0x60] sm:$0xff] %vm574_vm1, %v475_v50  ;;  %v630_v56 = vsel %vm574_vm1, %v475_v50, 0.0  ;;  %v690_v57 = vmul.f32 %v475_v50, %v475_v50  ;;  %v1279_v6 = vpop.f32.mrb[12].mxu1  ;;  %v644_v0 = vsel %vm574_vm1, %v1187_v59, 0.0  ;;  %v646_v43 = vsel %vm574_vm1, %v1214_v14, 0.0 }
 0x100   : > { %v631_v60 = vadd.f32 %v630_v56, %v629_v52  ;;  %v732_v61 = vadd.f32 %v731_v54, %v730_v49  ;;  %v735_v7 = vsel %vm574_vm1, %v691_v55, 0.0  ;;  %604 = vst.msk [vmem:[%s1158_s28 + $0xe8] sm:$0xff] %vm574_vm1, %v1279_v6  ;;  %v1288_v12 = vpop.f32.mrb[13].mxu1  ;;  %v747_v46 = vsel %vm574_vm1, %v697_v38, 0.0 }
 0x101   : > { %v733_v63 = vsel %vm574_vm1, %v690_v57, 0.0  ;;  %v990_v1 = vpop.f32.mrb[14].mxu0  ;;  %603 = vst.msk [vmem:[%s1158_s28 + $0xe0] sm:$0xff] %vm574_vm1, %v1288_v12  ;;  %v699_v48 = vmul.f32 %v1205_v9, %v1205_v9  ;;  %v749_v49 = vsel %vm574_vm1, %v698_v40, 0.0  ;;  %v700_v50 = vmul.f32 %v1232_v28, %v1232_v28 }
 0x102   : > { %v734_v2 = vadd.f32 %v733_v63, %v732_v61  ;;  %590 = vst.msk [vmem:[%s1158_s28 + $0x78] sm:$0xff] %vm574_vm1, %v990_v1  ;;  %v485_v3 = vpop.f32.mrb[15].mxu0  ;;  %v633_v4 = vadd.f32 %v632_v62, %v631_v60  ;;  %v693_v8 = vmul.f32 %v990_v1, %v990_v1  ;;  %v636_v16 = vsel %vm574_vm1, %v990_v1, 0.0 }
 0x103   : > { %589 = vst.msk [vmem:[%s1158_s28 + $0x70] sm:$0xff] %vm574_vm1, %v485_v3  ;;  %v634_v10 = vsel %vm574_vm1, %v485_v3, 0.0  ;;  %v692_v11 = vmul.f32 %v485_v3, %v485_v3  ;;  %v1299_v22 = vpop.f32.mrb[14].mxu1  ;;  %v648_v59 = vsel %vm574_vm1, %v1205_v9, 0.0  ;;  %v650_v14 = vsel %vm574_vm1, %v1232_v28, 0.0 }
 0x104   : > { %v635_v13 = vadd.f32 %v634_v10, %v633_v4  ;;  %v736_v15 = vadd.f32 %v735_v7, %v734_v2  ;;  %v739_v24 = vsel %vm574_vm1, %v693_v8, 0.0  ;;  %606 = vst.msk [vmem:[%s1158_s28 + $0xf8] sm:$0xff] %vm574_vm1, %v1299_v22  ;;  %v709_v51 = vmul.f32 %v1299_v22, %v1299_v22  ;;  %v1310_v27 = vpop.f32.mrb[15].mxu1 }
 0x105   : > { %v737_v17 = vsel %vm574_vm1, %v692_v11, 0.0  ;;  %605 = vst.msk [vmem:[%s1158_s28 + $0xf0] sm:$0xff] %vm574_vm1, %v1310_v27  ;;  %v751_v57 = vsel %vm574_vm1, %v699_v48, 0.0  ;;  %v701_v60 = vmul.f32 %v1223_v23, %v1223_v23  ;;  %v753_v61 = vsel %vm574_vm1, %v700_v50, 0.0 }
 0x106   : > { %v637_v19 = vadd.f32 %v636_v16, %v635_v13  ;;  %v738_v20 = vadd.f32 %v737_v17, %v736_v15  ;;  %v1320_v33 = vsel %vm574_vm1, %v709_v51, 0.0  ;;  %v702_v62 = vmul.f32 %v1250_v42, %v1250_v42 }
 0x107   : > { %v652_v9 = vsel %vm574_vm1, %v1223_v23, 0.0  ;;  %v654_v28 = vsel %vm574_vm1, %v1250_v42, 0.0  ;;  %v755_v4 = vsel %vm574_vm1, %v701_v60, 0.0  ;;  %v704_v8 = vmul.f32 %v1268_v58, %v1268_v58 }
 0x108   : > { %v740_v29 = vadd.f32 %v739_v24, %v738_v20  ;;  %v639_v30 = vadd.f32 %v638_v18, %v637_v19  ;;  %v757_v7 = vsel %vm574_vm1, %v702_v62, 0.0  ;;  %v656_v23 = vsel %vm574_vm1, %v1241_v37, 0.0 }
 0x109   : > { %v658_v42 = vsel %vm574_vm1, %v1268_v58, 0.0  ;;  %v759_v16 = vsel %vm574_vm1, %v703_v5, 0.0  ;;  %v705_v17 = vmul.f32 %v1259_v53, %v1259_v53  ;;  %v761_v18 = vsel %vm574_vm1, %v704_v8, 0.0 }
 0x10a   : > { %v742_v34 = vadd.f32 %v741_v25, %v740_v29  ;;  %v641_v35 = vadd.f32 %v640_v31, %v639_v30  ;;  %v706_v19 = vmul.f32 %v1288_v12, %v1288_v12  ;;  %v660_v37 = vsel %vm574_vm1, %v1259_v53, 0.0 }
 0x10b   : > { %v662_v58 = vsel %vm574_vm1, %v1288_v12, 0.0  ;;  %v763_v26 = vsel %vm574_vm1, %v705_v17, 0.0  ;;  %v707_v51 = vmul.f32 %v1279_v6, %v1279_v6  ;;  %v708_v30 = vmul.f32 %v1310_v27, %v1310_v27 }
 0x10c   : > { %v643_v41 = vadd.f32 %v642_v32, %v641_v35  ;;  %v744_v47 = vadd.f32 %v743_v36, %v742_v34  ;;  %v765_v29 = vsel %vm574_vm1, %v706_v19, 0.0  ;;  %v664_v53 = vsel %vm574_vm1, %v1279_v6, 0.0 }
 0x10d   : > { %v666_v12 = vsel %vm574_vm1, %v1310_v27, 0.0  ;;  %v767_v36 = vsel %vm574_vm1, %v707_v51, 0.0  ;;  %v769_v38 = vsel %vm574_vm1, %v708_v30, 0.0 }
 0x10e   : > { %v746_v44 = vadd.f32 %v745_v39, %v744_v47  ;;  %v645_v45 = vadd.f32 %v644_v0, %v643_v41  ;;  %v668_v41 = vsel %vm574_vm1, %v1299_v22, 0.0 }
 0x110   : > { %v647_v52 = vadd.f32 %v646_v43, %v645_v45  ;;  %v748_v54 = vadd.f32 %v747_v46, %v746_v44 }
 0x112   : > { %v750_v55 = vadd.f32 %v749_v49, %v748_v54  ;;  %v649_v56 = vadd.f32 %v648_v59, %v647_v52 }
 0x114   : > { %v651_v63 = vadd.f32 %v650_v14, %v649_v56  ;;  %v752_v1 = vadd.f32 %v751_v57, %v750_v55 }
 0x116   : > { %v754_v2 = vadd.f32 %v753_v61, %v752_v1  ;;  %v653_v3 = vadd.f32 %v652_v9, %v651_v63 }
 0x118   : > { %v655_v10 = vadd.f32 %v654_v28, %v653_v3  ;;  %v756_v11 = vadd.f32 %v755_v4, %v754_v2 }
 0x11a   : > { %v758_v13 = vadd.f32 %v757_v7, %v756_v11  ;;  %v657_v15 = vadd.f32 %v656_v23, %v655_v10 }
 0x11c   : > { %v659_v20 = vadd.f32 %v658_v42, %v657_v15  ;;  %v760_v21 = vadd.f32 %v759_v16, %v758_v13 }
 0x11e   : > { %v762_v24 = vadd.f32 %v761_v18, %v760_v21  ;;  %v661_v25 = vadd.f32 %v660_v37, %v659_v20 }
 0x120   : > { %v663_v31 = vadd.f32 %v662_v58, %v661_v25  ;;  %v764_v32 = vadd.f32 %v763_v26, %v762_v24 }
 0x122   : > { %v766_v34 = vadd.f32 %v765_v29, %v764_v32  ;;  %v665_v35 = vadd.f32 %v664_v53, %v663_v31 }
 0x124   : > { %v667_v39 = vadd.f32 %v666_v12, %v665_v35  ;;  %v768_v40 = vadd.f32 %v767_v36, %v766_v34 }
 0x126   : > { %v669_v47 = vadd.f32 %v668_v41, %v667_v39  ;;  %v770_v0 = vadd.f32 %v769_v38, %v768_v40 }
 0x128   : > { %v670_v43 = vrot.slane %v669_v47, 4  ;;  %v772_v6 = vadd.f32 %v1320_v33, %v770_v0 }
 0x12a   : > { %v671_v44 = vadd.f32 %v670_v43, %v669_v47  ;;  %v773_v27 = vrot.slane %v772_v6, 4 }
 0x12c   : > { %v672_v45 = vrot.slane %v671_v44, 2  ;;  %v774_v46 = vadd.f32 %v773_v27, %v772_v6 }
 0x12e   : > { %v673_v48 = vadd.f32 %v672_v45, %v671_v44  ;;  %v775_v49 = vrot.slane %v774_v46, 2 }
 0x130   : > { %v674_v50 = vrot.slane %v673_v48, 1  ;;  %v776_v52 = vadd.f32 %v775_v49, %v774_v46 }
 0x132   : > { %v675_v22 = vadd.f32 %v674_v50, %v673_v48  ;;  %v777_v54 = vrot.slane %v776_v52, 1 }
 0x134   : > { %677 = vst.msk [vmem:[%s214_s5] sm:$0x1] %vm676_vm2, %v675_v22  ;;  %v778_v33 = vadd.f32 %v777_v54, %v776_v52 }
 0x136   : > { %779 = vst.msk [vmem:[%s217_s8] sm:$0x1] %vm676_vm2, %v778_v33 }
 0x137 PF: > { %s15_s15 = sadd.s32 1, %s1035_s15  }
 0x138   : > { %p12_p5 = scmp.ge.s32.totalorder %s15_s15, 4  }
 0x13a   :  { %14 = sbr.rel (!%p12_p5) target bundleno = 1 (0x1), region = 82 }

// kernel: decoder_block_forward.6
= control target key start
LH: loop header
LB: loop body
LE: loop exit
PB: predicated region body
PF: predicated region fallthrough
CT: control target
= control target key end

     0   :  { %s1238_s21 = smov 0   ;;  %s1621_s0 = inlined_call_operand.vmem [shape: f32[512,16], index: 0, kind: input, shape index: {}]   ;;  %s1622_s1 = inlined_call_operand.vmem [shape: f32[1,16], index: 1, kind: input, shape index: {}]   ;;  %s1623_s2 = inlined_call_operand.vmem [shape: f32[1,16], index: 2, kind: input, shape index: {}]   ;;  %s1624_s3 = inlined_call_operand.vmem [shape: f32[16,32], index: 3, kind: input, shape index: {}]   ;;  %s1625_s4 = inlined_call_operand.vmem [shape: f32[512,32], index: 4, kind: output, shape index: {0}]   ;;  %s1626_s5 = inlined_call_operand.vmem [shape: f32[2,1,32], index: 5, kind: output, shape index: {1}]   ;;  %s1627_s6 = inlined_call_operand.vmem [shape: f32[2,1,32], index: 6, kind: output, shape index: {2}]  }
   0x1 LB: > { %s1244_s22 = sadd.s32 4294967295, %s1201_s21   ;;  %p1054_p0 = scmp.ge.s32.totalorder %s1201_s21, 1  ;;  %s1201_s21 = sphi %s1238_s21, %s17_s21  }
   0x2   : > { %p218_p1 = scmp.lt.s32.totalorder %s1201_s21, 3 }
   0x4   : > { %p219_p2 = pnand %p1054_p0, %p218_p1 }
   0x5   : > { %v414_v0 = vld [vmem:[%s1624_s3] sm:$0xff] (!%p219_p2)  ;;  %v415_v1 = vld [vmem:[%s1624_s3 + $0x8] sm:$0xff] (!%p219_p2)  ;;  %s1055_s27 = sshll.u32 (!%p219_p2), %s1244_s22, 5  ;;  %vm416_vm0 = vcmask (!%p219_p2), 130048   ;;  %vm738_vm1 = vcmask (!%p219_p2), 261120   ;;  %p266_p4 = scmp.lt.s32.totalorder (!%p219_p2), %s1244_s22, 1 }
   0x6   : > { %222 = sbr.rel (%p219_p2) target bundleno = 317 (0x13d), region = 36  ;;  %v1181_v2 = vpack.c.bf16 (!%p219_p2), %v415_v1, %v414_v0  ;;  %p255_p3 = scmp.lt.s32.totalorder (!%p219_p2), %s1055_s27, 63  ;;  %v1261_v3 = vld [vmem:[%s1622_s1] ss:$0 sm:$0xff] (!%p219_p2)  ;;  %vm840_vm2 = vcmask (!%p219_p2), 253952  }
   0x7   : > { %v1273_v4 = vld [vmem:[%s1623_s2] ss:$0 sm:$0xff] (!%p219_p2) }
   0x8   : > { %1182 = vmatprep.subr.bf16.mxu0 (!%p219_p2), %v1181_v2  ;;  %1185 = vmatprep.subr.bf16.mxu1 (!%p219_p2), %v1181_v2 }
   0x9   : > { %1184 = vmatpush3.bf16.msra.mxu0 (!%p219_p2), %v1181_v2  ;;  %1186 = vmatpush3.bf16.msra.mxu1 (!%p219_p2), %v1181_v2 }
   0xd   : > { %s1629_s27 = smov (!%p255_p3, %s1055_s27), 63  ;;  %s1631_s22 = smov (!%p266_p4, %s1244_s22), 1 }
   0xe   : > { %s1056_s28 = sshll.u32 %s1629_s27, 3  ;;  %s268_s17 = scalar_lea.vmem %s1626_s5, %s1631_s22 }
   0xf   : > { %s1268_s9 = scalar_lea.vmem %s1621_s0, %s1056_s28  ;;  %s1408_s14 = scalar_lea.vmem %s1625_s4, %s1056_s28 }
  0x10   : > { %v272_v5 = vld [vmem:[%s1268_s9] sm:$0xff]  ;;  %v273_v6 = vld [vmem:[%s1268_s9 + $0x8] sm:$0xff]  ;;  %v274_v7 = vld [vmem:[%s1268_s9 + $0x10] sm:$0xff]  ;;  %s271_s20 = scalar_lea.vmem %s1627_s6, %s1631_s22 }
  0x11   : > { %v311_v8 = vsub.f32 %v272_v5, %v1261_v3  ;;  %v312_v9 = vsub.f32 %v273_v6, %v1261_v3  ;;  %v313_v10 = vsub.f32 %v274_v7, %v1261_v3  ;;  %v275_v11 = vld [vmem:[%s1268_s9 + $0x18] sm:$0xff]  ;;  %v276_v12 = vld [vmem:[%s1268_s9 + $0x20] sm:$0xff]  ;;  %v277_v13 = vld [vmem:[%s1268_s9 + $0x28] sm:$0xff] }
  0x12   : > { %v314_v14 = vsub.f32 %v275_v11, %v1261_v3  ;;  %v315_v15 = vsub.f32 %v276_v12, %v1261_v3  ;;  %v278_v16 = vld [vmem:[%s1268_s9 + $0x30] sm:$0xff]  ;;  %v279_v17 = vld [vmem:[%s1268_s9 + $0x38] sm:$0xff]  ;;  %v316_v21 = vsub.f32 %v277_v13, %v1261_v3  ;;  %v280_v29 = vld [vmem:[%s1268_s9 + $0x40] sm:$0xff] }
  0x13   : > { %v350_v18 = vmul.f32 %v1273_v4, %v311_v8  ;;  %v351_v19 = vmul.f32 %v1273_v4, %v312_v9  ;;  %v352_v20 = vmul.f32 %v1273_v4, %v313_v10  ;;  %v317_v23 = vsub.f32 %v278_v16, %v1261_v3  ;;  %v281_v31 = vld [vmem:[%s1268_s9 + $0x48] sm:$0xff]  ;;  %v282_v36 = vld [vmem:[%s1268_s9 + $0x50] sm:$0xff]  ;;  %v283_v38 = vld [vmem:[%s1268_s9 + $0x58] sm:$0xff] }
  0x14   : > { %v353_v22 = vmul.f32 %v1273_v4, %v314_v14  ;;  %v318_v24 = vsub.f32 %v279_v17, %v1261_v3  ;;  %v354_v28 = vmul.f32 %v1273_v4, %v315_v15  ;;  %v355_v30 = vmul.f32 %v1273_v4, %v316_v21  ;;  %v288_v40 = vld [vmem:[%s1268_s9 + $0x80] sm:$0xff]  ;;  %v289_v41 = vld [vmem:[%s1268_s9 + $0x88] sm:$0xff]  ;;  %v290_v42 = vld [vmem:[%s1268_s9 + $0x90] sm:$0xff] }
  0x15   : > { %v382_v25 = vmax.f32 %v350_v18, 0.0  ;;  %v383_v26 = vmax.f32 %v351_v19, 0.0  ;;  %v384_v27 = vmax.f32 %v352_v20, 0.0  ;;  %v356_v33 = vmul.f32 %v1273_v4, %v317_v23  ;;  %v284_v44 = vld [vmem:[%s1268_s9 + $0x60] sm:$0xff]  ;;  %v291_v45 = vld [vmem:[%s1268_s9 + $0x98] sm:$0xff]  ;;  %v293_v55 = vld [vmem:[%s1268_s9 + $0xa8] sm:$0xff] }
  0x16   : > { %v385_v32 = vmax.f32 %v353_v22, 0.0  ;;  %v357_v34 = vmul.f32 %v1273_v4, %v318_v24  ;;  %v319_v35 = vsub.f32 %v280_v29, %v1261_v3  ;;  %v386_v37 = vmax.f32 %v354_v28, 0.0  ;;  %v292_v46 = vld [vmem:[%s1268_s9 + $0xa0] sm:$0xff]  ;;  %v294_v56 = vld [vmem:[%s1268_s9 + $0xb0] sm:$0xff]  ;;  %v285_v2 = vld [vmem:[%s1268_s9 + $0x68] sm:$0xff] }
  0x17   : > { %1133 = vmatprep.mubr.msk.f32.mxu0 %vm416_vm0, %v382_v25  ;;  %v320_v39 = vsub.f32 %v281_v31, %v1261_v3  ;;  %v321_v43 = vsub.f32 %v282_v36, %v1261_v3  ;;  %v387_v47 = vmax.f32 %v355_v30, 0.0  ;;  %v388_v48 = vmax.f32 %v356_v33, 0.0  ;;  %v286_v5 = vld [vmem:[%s1268_s9 + $0x70] sm:$0xff]  ;;  %v295_v13 = vld [vmem:[%s1268_s9 + $0xb8] sm:$0xff]  ;;  %v296_v14 = vld [vmem:[%s1268_s9 + $0xc0] sm:$0xff] }
  0x18   : > { %1134 = vmatmul.mubr.msk.f32.vlgmr.msra.gmra.mrb[0].mxu0 %vm416_vm0, %v383_v26  ;;  %v389_v49 = vmax.f32 %v357_v34, 0.0  ;;  %v358_v50 = vmul.f32 %v1273_v4, %v319_v35  ;;  %v322_v51 = vsub.f32 %v283_v38, %v1261_v3  ;;  %v327_v52 = vsub.f32 %v288_v40, %v1261_v3  ;;  %v287_v20 = vld [vmem:[%s1268_s9 + $0x78] sm:$0xff]  ;;  %v297_v28 = vld [vmem:[%s1268_s9 + $0xc8] sm:$0xff]  ;;  %v298_v29 = vld [vmem:[%s1268_s9 + $0xd0] sm:$0xff] }
  0x19   : > { %1136 = vmatprep.mubr.msk.f32.mxu0 %vm416_vm0, %v384_v27  ;;  %v328_v53 = vsub.f32 %v289_v41, %v1261_v3  ;;  %v329_v54 = vsub.f32 %v290_v42, %v1261_v3  ;;  %v359_v57 = vmul.f32 %v1273_v4, %v320_v39  ;;  %v323_v58 = vsub.f32 %v284_v44, %v1261_v3  ;;  %v299_v41 = vld [vmem:[%s1268_s9 + $0xd8] sm:$0xff]  ;;  %v300_v42 = vld [vmem:[%s1268_s9 + $0xe0] sm:$0xff] }
  0x1a   : > { %v330_v59 = vsub.f32 %v291_v45, %v1261_v3  ;;  %v331_v60 = vsub.f32 %v292_v46, %v1261_v3  ;;  %v360_v61 = vmul.f32 %v1273_v4, %v321_v43  ;;  %v366_v62 = vmul.f32 %v1273_v4, %v327_v52  ;;  %v301_v52 = vld [vmem:[%s1268_s9 + $0xe8] sm:$0xff] }
  0x1b   : > { %v367_v63 = vmul.f32 %v1273_v4, %v328_v53  ;;  %v368_v0 = vmul.f32 %v1273_v4, %v329_v54  ;;  %v390_v1 = vmax.f32 %v358_v50, 0.0  ;;  %v332_v7 = vsub.f32 %v293_v55, %v1261_v3  ;;  %v302_v53 = vld [vmem:[%s1268_s9 + $0xf0] sm:$0xff] }
  0x1c   : > { %1137 = vmatmul.mubr.msk.f32.gmra.mrb[2].mxu0 %vm416_vm0, %v385_v32  ;;  %v369_v6 = vmul.f32 %v1273_v4, %v330_v59  ;;  %v333_v8 = vsub.f32 %v294_v56, %v1261_v3  ;;  %v398_v9 = vmax.f32 %v366_v62, 0.0  ;;  %v370_v12 = vmul.f32 %v1273_v4, %v331_v60 }
  0x1d   : > { %1139 = vmatprep.mubr.msk.f32.mxu0 %vm416_vm0, %v386_v37  ;;  %v399_v10 = vmax.f32 %v367_v63, 0.0  ;;  %v400_v11 = vmax.f32 %v368_v0, 0.0  ;;  %v361_v15 = vmul.f32 %v1273_v4, %v322_v51  ;;  %v362_v16 = vmul.f32 %v1273_v4, %v323_v58 }
  0x1e   : > { %v324_v17 = vsub.f32 %v285_v2, %v1261_v3  ;;  %v325_v18 = vsub.f32 %v286_v5, %v1261_v3  ;;  %1157 = vmatprep.mubr.msk.f32.mxu1 %vm416_vm0, %v398_v9  ;;  %v391_v19 = vmax.f32 %v359_v57, 0.0  ;;  %v401_v21 = vmax.f32 %v369_v6, 0.0 }
  0x1f   : > { %1158 = vmatmul.mubr.msk.f32.vlgmr.msra.gmra.mrb[0].mxu1 %vm416_vm0, %v399_v10  ;;  %v371_v22 = vmul.f32 %v1273_v4, %v332_v7  ;;  %v334_v23 = vsub.f32 %v295_v13, %v1261_v3  ;;  %v392_v24 = vmax.f32 %v360_v61, 0.0  ;;  %v402_v25 = vmax.f32 %v370_v12, 0.0  ;;  %v303_v61 = vld [vmem:[%s1268_s9 + $0xf8] sm:$0xff] }
  0x20   : > { %1140 = vmatmul.mubr.msk.f32.gmra.mrb[4].mxu0 %vm416_vm0, %v387_v47  ;;  %1160 = vmatprep.mubr.msk.f32.mxu1 %vm416_vm0, %v400_v11  ;;  %v372_v26 = vmul.f32 %v1273_v4, %v333_v8  ;;  %v335_v27 = vsub.f32 %v296_v14, %v1261_v3  ;;  %v363_v30 = vmul.f32 %v1273_v4, %v324_v17  ;;  %v393_v33 = vmax.f32 %v361_v15, 0.0 }
  0x21   : > { %1142 = vmatprep.mubr.msk.f32.mxu0 %vm416_vm0, %v388_v48  ;;  %v364_v31 = vmul.f32 %v1273_v4, %v325_v18  ;;  %v326_v32 = vsub.f32 %v287_v20, %v1261_v3  ;;  %v403_v34 = vmax.f32 %v371_v22, 0.0  ;;  %v373_v35 = vmul.f32 %v1273_v4, %v334_v23 }
  0x22   : > { %v336_v36 = vsub.f32 %v297_v28, %v1261_v3  ;;  %v394_v37 = vmax.f32 %v362_v16, 0.0  ;;  %v404_v38 = vmax.f32 %v372_v26, 0.0  ;;  %v374_v39 = vmul.f32 %v1273_v4, %v335_v27 }
  0x23   : > { %1161 = vmatmul.mubr.msk.f32.gmra.mrb[2].mxu1 %vm416_vm0, %v401_v21  ;;  %v337_v40 = vsub.f32 %v298_v29, %v1261_v3  ;;  %v395_v43 = vmax.f32 %v363_v30, 0.0  ;;  %v365_v44 = vmul.f32 %v1273_v4, %v326_v32  ;;  %v405_v45 = vmax.f32 %v373_v35, 0.0 }
  0x24   : > { %1143 = vmatmul.mubr.msk.f32.gmra.mrb[6].mxu0 %vm416_vm0, %v389_v49  ;;  %1163 = vmatprep.mubr.msk.f32.mxu1 %vm416_vm0, %v402_v25  ;;  %v375_v46 = vmul.f32 %v1273_v4, %v336_v36  ;;  %v338_v47 = vsub.f32 %v299_v41, %v1261_v3  ;;  %v396_v48 = vmax.f32 %v364_v31, 0.0  ;;  %v406_v49 = vmax.f32 %v374_v39, 0.0 }
  0x25   : > { %1145 = vmatprep.mubr.msk.f32.mxu0 %vm416_vm0, %v390_v1  ;;  %v376_v50 = vmul.f32 %v1273_v4, %v337_v40  ;;  %v339_v51 = vsub.f32 %v300_v42, %v1261_v3  ;;  %v397_v54 = vmax.f32 %v365_v44, 0.0  ;;  %v340_v57 = vsub.f32 %v301_v52, %v1261_v3 }
  0x26   : > { %v407_v55 = vmax.f32 %v375_v46, 0.0  ;;  %v377_v56 = vmul.f32 %v1273_v4, %v338_v47  ;;  %v341_v60 = vsub.f32 %v302_v53, %v1261_v3  ;;  %v342_v0 = vsub.f32 %v303_v61, %v1261_v3 }
  0x27   : > { %1164 = vmatmul.mubr.msk.f32.gmra.mrb[4].mxu1 %vm416_vm0, %v403_v34  ;;  %v408_v58 = vmax.f32 %v376_v50, 0.0  ;;  %v378_v59 = vmul.f32 %v1273_v4, %v339_v51  ;;  %v379_v63 = vmul.f32 %v1273_v4, %v340_v57 }
  0x28   : > { %1146 = vmatmul.mubr.msk.f32.gmra.mrb[8].mxu0 %vm416_vm0, %v391_v19  ;;  %1166 = vmatprep.mubr.msk.f32.mxu1 %vm416_vm0, %v404_v38  ;;  %v409_v62 = vmax.f32 %v377_v56, 0.0  ;;  %v380_v2 = vmul.f32 %v1273_v4, %v341_v60  ;;  %v381_v6 = vmul.f32 %v1273_v4, %v342_v0 }
  0x29   : > { %1148 = vmatprep.mubr.msk.f32.mxu0 %vm416_vm0, %v392_v24  ;;  %v410_v1 = vmax.f32 %v378_v59, 0.0  ;;  %v411_v5 = vmax.f32 %v379_v63, 0.0 }
  0x2a   : > { %v412_v7 = vmax.f32 %v380_v2, 0.0  ;;  %v413_v8 = vmax.f32 %v381_v6, 0.0 }
  0x2b   : > { %1167 = vmatmul.mubr.msk.f32.gmra.mrb[6].mxu1 %vm416_vm0, %v405_v45 }
  0x2c   : > { %1149 = vmatmul.mubr.msk.f32.gmra.mrb[10].mxu0 %vm416_vm0, %v393_v33  ;;  %1169 = vmatprep.mubr.msk.f32.mxu1 %vm416_vm0, %v406_v49 }
  0x2d   : > { %1151 = vmatprep.mubr.msk.f32.mxu0 %vm416_vm0, %v394_v37 }
  0x2f   : > { %1170 = vmatmul.mubr.msk.f32.gmra.mrb[8].mxu1 %vm416_vm0, %v407_v55 }
  0x30   : > { %1152 = vmatmul.mubr.msk.f32.gmra.mrb[12].mxu0 %vm416_vm0, %v395_v43  ;;  %1172 = vmatprep.mubr.msk.f32.mxu1 %vm416_vm0, %v408_v58 }
  0x31   : > { %1154 = vmatprep.mubr.msk.f32.mxu0 %vm416_vm0, %v396_v48 }
  0x33   : > { %1173 = vmatmul.mubr.msk.f32.gmra.mrb[10].mxu1 %vm416_vm0, %v409_v62 }
  0x34   : > { %1155 = vmatmul.mubr.msk.f32.gmra.mrb[14].mxu0 %vm416_vm0, %v397_v54  ;;  %1175 = vmatprep.mubr.msk.f32.mxu1 %vm416_vm0, %v410_v1 }
  0x37   : > { %1176 = vmatmul.mubr.msk.f32.gmra.mrb[12].mxu1 %vm416_vm0, %v411_v5 }
  0x38   : > { %1178 = vmatprep.mubr.msk.f32.mxu1 %vm416_vm0, %v412_v7 }
  0x3b   : > { %1179 = vmatmul.mubr.msk.f32.gmra.mrb[14].mxu1 %vm416_vm0, %v413_v8 }
  0xeb   : > { %v1135_v3 = vpop.f32.mrb[0].mxu0 }
  0xec   : > { %740 = vst.msk [vmem:[%s1408_s14 + $0x8] sm:$0xff] %vm738_vm1, %v1135_v3  ;;  %v772_v4 = vsel %vm738_vm1, %v1135_v3, 0.0  ;;  %v843_v9 = vmul.f32 %v1135_v3, %v1135_v3  ;;  %v579_v10 = vpop.f32.mrb[1].mxu0 }
  0xed   : > { %739 = vst.msk [vmem:[%s1408_s14] sm:$0xff] %vm738_vm1, %v579_v10  ;;  %v771_v11 = vsel %vm738_vm1, %v579_v10, 0.0  ;;  %v842_v12 = vmul.f32 %v579_v10, %v579_v10 }
  0xee   : > { %v875_v13 = vsel %vm738_vm1, %v843_v9, 0.0  ;;  %v773_v14 = vadd.f32 %v772_v4, %v771_v11 }
  0xef   : > { %v874_v15 = vsel %vm738_vm1, %v842_v12, 0.0  ;;  %v1138_v16 = vpop.f32.mrb[2].mxu0 }
  0xf0   : > { %v876_v17 = vadd.f32 %v875_v13, %v874_v15  ;;  %742 = vst.msk [vmem:[%s1408_s14 + $0x18] sm:$0xff] %vm738_vm1, %v1138_v16  ;;  %v589_v18 = vpop.f32.mrb[3].mxu0  ;;  %v845_v19 = vmul.f32 %v1138_v16, %v1138_v16  ;;  %v776_v23 = vsel %vm738_vm1, %v1138_v16, 0.0 }
  0xf1   : > { %741 = vst.msk [vmem:[%s1408_s14 + $0x10] sm:$0xff] %vm738_vm1, %v589_v18  ;;  %v774_v20 = vsel %vm738_vm1, %v589_v18, 0.0  ;;  %v844_v21 = vmul.f32 %v589_v18, %v589_v18 }
  0xf2   : > { %v775_v22 = vadd.f32 %v774_v20, %v773_v14  ;;  %v879_v29 = vsel %vm738_vm1, %v845_v19, 0.0  ;;  %v1433_v38 = vpop.f32.mrb[0].mxu1 }
  0xf3   : > { %v877_v24 = vsel %vm738_vm1, %v844_v21, 0.0  ;;  %v1141_v25 = vpop.f32.mrb[4].mxu0  ;;  %756 = vst.msk [vmem:[%s1408_s14 + $0x88] sm:$0xff] %vm738_vm1, %v1433_v38  ;;  %v1440_v42 = vpop.f32.mrb[1].mxu1 }
  0xf4   : > { %v878_v26 = vadd.f32 %v877_v24, %v876_v17  ;;  %744 = vst.msk [vmem:[%s1408_s14 + $0x28] sm:$0xff] %vm738_vm1, %v1141_v25  ;;  %v599_v27 = vpop.f32.mrb[5].mxu0  ;;  %v777_v28 = vadd.f32 %v776_v23, %v775_v22  ;;  %v847_v30 = vmul.f32 %v1141_v25, %v1141_v25  ;;  %v780_v35 = vsel %vm738_vm1, %v1141_v25, 0.0  ;;  %755 = vst.msk [vmem:[%s1408_s14 + $0x80] sm:$0xff] %vm738_vm1, %v1440_v42 }
  0xf5   : > { %743 = vst.msk [vmem:[%s1408_s14 + $0x20] sm:$0xff] %vm738_vm1, %v599_v27  ;;  %v778_v31 = vsel %vm738_vm1, %v599_v27, 0.0  ;;  %v846_v32 = vmul.f32 %v599_v27, %v599_v27 }
  0xf6   : > { %v779_v33 = vadd.f32 %v778_v31, %v777_v28  ;;  %v880_v34 = vadd.f32 %v879_v29, %v878_v26  ;;  %v883_v43 = vsel %vm738_vm1, %v847_v30, 0.0  ;;  %v1451_v52 = vpop.f32.mrb[2].mxu1 }
  0xf7   : > { %v881_v36 = vsel %vm738_vm1, %v846_v32, 0.0  ;;  %v1144_v37 = vpop.f32.mrb[6].mxu0  ;;  %758 = vst.msk [vmem:[%s1408_s14 + $0x98] sm:$0xff] %vm738_vm1, %v1451_v52  ;;  %v1458_v56 = vpop.f32.mrb[3].mxu1 }
  0xf8   : > { %v882_v39 = vadd.f32 %v881_v36, %v880_v34  ;;  %746 = vst.msk [vmem:[%s1408_s14 + $0x38] sm:$0xff] %vm738_vm1, %v1144_v37  ;;  %v609_v40 = vpop.f32.mrb[7].mxu0  ;;  %v781_v41 = vadd.f32 %v780_v35, %v779_v33  ;;  %v849_v44 = vmul.f32 %v1144_v37, %v1144_v37  ;;  %v784_v49 = vsel %vm738_vm1, %v1144_v37, 0.0  ;;  %757 = vst.msk [vmem:[%s1408_s14 + $0x90] sm:$0xff] %vm738_vm1, %v1458_v56 }
  0xf9   : > { %745 = vst.msk [vmem:[%s1408_s14 + $0x30] sm:$0xff] %vm738_vm1, %v609_v40  ;;  %v782_v45 = vsel %vm738_vm1, %v609_v40, 0.0  ;;  %v848_v46 = vmul.f32 %v609_v40, %v609_v40  ;;  %v858_v34 = vmul.f32 %v1440_v42, %v1440_v42 }
  0xfa   : > { %v783_v47 = vadd.f32 %v782_v45, %v781_v41  ;;  %v884_v48 = vadd.f32 %v883_v43, %v882_v39  ;;  %v887_v57 = vsel %vm738_vm1, %v849_v44, 0.0  ;;  %v1469_v2 = vpop.f32.mrb[4].mxu1 }
  0xfb   : > { %v885_v50 = vsel %vm738_vm1, %v848_v46, 0.0  ;;  %v1147_v51 = vpop.f32.mrb[8].mxu0  ;;  %760 = vst.msk [vmem:[%s1408_s14 + $0xa8] sm:$0xff] %vm738_vm1, %v1469_v2  ;;  %v1476_v8 = vpop.f32.mrb[5].mxu1  ;;  %v802_v46 = vsel %vm738_vm1, %v1440_v42, 0.0  ;;  %v860_v42 = vmul.f32 %v1458_v56, %v1458_v56 }
  0xfc   : > { %v886_v53 = vadd.f32 %v885_v50, %v884_v48  ;;  %748 = vst.msk [vmem:[%s1408_s14 + $0x48] sm:$0xff] %vm738_vm1, %v1147_v51  ;;  %v619_v54 = vpop.f32.mrb[9].mxu0  ;;  %v785_v55 = vadd.f32 %v784_v49, %v783_v47  ;;  %v851_v58 = vmul.f32 %v1147_v51, %v1147_v51  ;;  %v788_v63 = vsel %vm738_vm1, %v1147_v51, 0.0  ;;  %759 = vst.msk [vmem:[%s1408_s14 + $0xa0] sm:$0xff] %vm738_vm1, %v1476_v8 }
  0xfd   : > { %747 = vst.msk [vmem:[%s1408_s14 + $0x40] sm:$0xff] %vm738_vm1, %v619_v54  ;;  %v786_v59 = vsel %vm738_vm1, %v619_v54, 0.0  ;;  %v850_v60 = vmul.f32 %v619_v54, %v619_v54  ;;  %v905_v54 = vsel %vm738_vm1, %v858_v34, 0.0 }
  0xfe   : > { %v787_v61 = vadd.f32 %v786_v59, %v785_v55  ;;  %v888_v62 = vadd.f32 %v887_v57, %v886_v53  ;;  %v891_v3 = vsel %vm738_vm1, %v851_v58, 0.0  ;;  %v1487_v16 = vpop.f32.mrb[6].mxu1  ;;  %v859_v53 = vmul.f32 %v1433_v38, %v1433_v38 }
  0xff   : > { %v889_v0 = vsel %vm738_vm1, %v850_v60, 0.0  ;;  %v1150_v1 = vpop.f32.mrb[10].mxu0  ;;  %762 = vst.msk [vmem:[%s1408_s14 + $0xb8] sm:$0xff] %vm738_vm1, %v1487_v16  ;;  %v1494_v20 = vpop.f32.mrb[7].mxu1  ;;  %v804_v58 = vsel %vm738_vm1, %v1433_v38, 0.0  ;;  %v806_v59 = vsel %vm738_vm1, %v1458_v56, 0.0  ;;  %v862_v38 = vmul.f32 %v1476_v8, %v1476_v8 }
 0x100   : > { %v890_v5 = vadd.f32 %v889_v0, %v888_v62  ;;  %750 = vst.msk [vmem:[%s1408_s14 + $0x58] sm:$0xff] %vm738_vm1, %v1150_v1  ;;  %v629_v6 = vpop.f32.mrb[11].mxu0  ;;  %v789_v7 = vadd.f32 %v788_v63, %v787_v61  ;;  %v853_v4 = vmul.f32 %v1150_v1, %v1150_v1  ;;  %v792_v13 = vsel %vm738_vm1, %v1150_v1, 0.0  ;;  %761 = vst.msk [vmem:[%s1408_s14 + $0xb0] sm:$0xff] %vm738_vm1, %v1494_v20 }
 0x101   : > { %749 = vst.msk [vmem:[%s1408_s14 + $0x50] sm:$0xff] %vm738_vm1, %v629_v6  ;;  %v790_v9 = vsel %vm738_vm1, %v629_v6, 0.0  ;;  %v852_v10 = vmul.f32 %v629_v6, %v629_v6  ;;  %v907_v0 = vsel %vm738_vm1, %v859_v53, 0.0  ;;  %v861_v1 = vmul.f32 %v1451_v52, %v1451_v52 }
 0x102   : > { %v791_v11 = vadd.f32 %v790_v9, %v789_v7  ;;  %v892_v12 = vadd.f32 %v891_v3, %v890_v5  ;;  %v895_v21 = vsel %vm738_vm1, %v853_v4, 0.0  ;;  %v1505_v30 = vpop.f32.mrb[8].mxu1  ;;  %v909_v5 = vsel %vm738_vm1, %v860_v42, 0.0 }
 0x103   : > { %v893_v14 = vsel %vm738_vm1, %v852_v10, 0.0  ;;  %v1153_v15 = vpop.f32.mrb[12].mxu0  ;;  %764 = vst.msk [vmem:[%s1408_s14 + $0xc8] sm:$0xff] %vm738_vm1, %v1505_v30  ;;  %v1514_v35 = vpop.f32.mrb[9].mxu1  ;;  %v808_v7 = vsel %vm738_vm1, %v1451_v52, 0.0  ;;  %v810_v3 = vsel %vm738_vm1, %v1476_v8, 0.0  ;;  %v864_v52 = vmul.f32 %v1494_v20, %v1494_v20 }
 0x104   : > { %v894_v17 = vadd.f32 %v893_v14, %v892_v12  ;;  %752 = vst.msk [vmem:[%s1408_s14 + $0x68] sm:$0xff] %vm738_vm1, %v1153_v15  ;;  %v639_v18 = vpop.f32.mrb[13].mxu0  ;;  %v793_v19 = vadd.f32 %v792_v13, %v791_v11  ;;  %v855_v22 = vmul.f32 %v1153_v15, %v1153_v15  ;;  %v796_v27 = vsel %vm738_vm1, %v1153_v15, 0.0  ;;  %763 = vst.msk [vmem:[%s1408_s14 + $0xc0] sm:$0xff] %vm738_vm1, %v1514_v35 }
 0x105   : > { %751 = vst.msk [vmem:[%s1408_s14 + $0x60] sm:$0xff] %vm738_vm1, %v639_v18  ;;  %v794_v23 = vsel %vm738_vm1, %v639_v18, 0.0  ;;  %v854_v24 = vmul.f32 %v639_v18, %v639_v18  ;;  %v911_v13 = vsel %vm738_vm1, %v861_v1, 0.0  ;;  %v863_v14 = vmul.f32 %v1469_v2, %v1469_v2 }
 0x106   : > { %v795_v25 = vadd.f32 %v794_v23, %v793_v19  ;;  %v896_v26 = vadd.f32 %v895_v21, %v894_v17  ;;  %v899_v36 = vsel %vm738_vm1, %v855_v22, 0.0  ;;  %v1527_v47 = vpop.f32.mrb[10].mxu1  ;;  %v913_v15 = vsel %vm738_vm1, %v862_v38, 0.0 }
 0x107   : > { %v897_v28 = vsel %vm738_vm1, %v854_v24, 0.0  ;;  %v1156_v29 = vpop.f32.mrb[14].mxu0  ;;  %766 = vst.msk [vmem:[%s1408_s14 + $0xd8] sm:$0xff] %vm738_vm1, %v1527_v47  ;;  %v709_v50 = vpop.f32.mrb[11].mxu1  ;;  %v812_v19 = vsel %vm738_vm1, %v1469_v2, 0.0  ;;  %v814_v21 = vsel %vm738_vm1, %v1494_v20, 0.0  ;;  %v867_v34 = vmul.f32 %v1505_v30, %v1505_v30 }
 0x108   : > { %v898_v31 = vadd.f32 %v897_v28, %v896_v26  ;;  %754 = vst.msk [vmem:[%s1408_s14 + $0x78] sm:$0xff] %vm738_vm1, %v1156_v29  ;;  %v649_v32 = vpop.f32.mrb[15].mxu0  ;;  %v797_v33 = vadd.f32 %v796_v27, %v795_v25  ;;  %v857_v37 = vmul.f32 %v1156_v29, %v1156_v29  ;;  %v800_v44 = vsel %vm738_vm1, %v1156_v29, 0.0  ;;  %765 = vst.msk [vmem:[%s1408_s14 + $0xd0] sm:$0xff] %vm738_vm1, %v709_v50 }
 0x109   : > { %753 = vst.msk [vmem:[%s1408_s14 + $0x70] sm:$0xff] %vm738_vm1, %v649_v32  ;;  %v798_v39 = vsel %vm738_vm1, %v649_v32, 0.0  ;;  %v856_v40 = vmul.f32 %v649_v32, %v649_v32  ;;  %v915_v24 = vsel %vm738_vm1, %v863_v14, 0.0  ;;  %v865_v25 = vmul.f32 %v1487_v16, %v1487_v16 }
 0x10a   : > { %v799_v41 = vadd.f32 %v798_v39, %v797_v33  ;;  %v900_v43 = vadd.f32 %v899_v36, %v898_v31  ;;  %v903_v51 = vsel %vm738_vm1, %v857_v37, 0.0  ;;  %v1544_v60 = vpop.f32.mrb[12].mxu1  ;;  %v917_v26 = vsel %vm738_vm1, %v864_v52, 0.0 }
 0x10b   : > { %v901_v45 = vsel %vm738_vm1, %v856_v40, 0.0  ;;  %768 = vst.msk [vmem:[%s1408_s14 + $0xe8] sm:$0xff] %vm738_vm1, %v1544_v60  ;;  %v719_v63 = vpop.f32.mrb[13].mxu1  ;;  %v866_v27 = vmul.f32 %v1514_v35, %v1514_v35  ;;  %v816_v2 = vsel %vm738_vm1, %v1487_v16, 0.0  ;;  %v818_v20 = vsel %vm738_vm1, %v1514_v35, 0.0 }
 0x10c   : > { %v801_v48 = vadd.f32 %v800_v44, %v799_v41  ;;  %v902_v49 = vadd.f32 %v901_v45, %v900_v43  ;;  %767 = vst.msk [vmem:[%s1408_s14 + $0xe0] sm:$0xff] %vm738_vm1, %v719_v63  ;;  %v919_v33 = vsel %vm738_vm1, %v865_v25, 0.0  ;;  %v868_v37 = vmul.f32 %v709_v50, %v709_v50 }
 0x10d   : > { %v921_v36 = vsel %vm738_vm1, %v866_v27, 0.0  ;;  %v820_v41 = vsel %vm738_vm1, %v1505_v30, 0.0  ;;  %v822_v16 = vsel %vm738_vm1, %v709_v50, 0.0  ;;  %v923_v35 = vsel %vm738_vm1, %v867_v34, 0.0 }
 0x10e   : > { %v904_v55 = vadd.f32 %v903_v51, %v902_v49  ;;  %v803_v57 = vadd.f32 %v802_v46, %v801_v48  ;;  %v1180_v4 = vpop.f32.mrb[14].mxu1  ;;  %v869_v45 = vmul.f32 %v1527_v47, %v1527_v47  ;;  %v925_v46 = vsel %vm738_vm1, %v868_v37, 0.0 }
 0x10f   : > { %770 = vst.msk [vmem:[%s1408_s14 + $0xf8] sm:$0xff] %vm738_vm1, %v1180_v4  ;;  %v873_v11 = vmul.f32 %v1180_v4, %v1180_v4  ;;  %v729_v12 = vpop.f32.mrb[15].mxu1  ;;  %v870_v48 = vmul.f32 %v719_v63, %v719_v63  ;;  %v824_v53 = vsel %vm738_vm1, %v1527_v47, 0.0 }
 0x110   : > { %v906_v61 = vadd.f32 %v905_v54, %v904_v55  ;;  %v805_v62 = vadd.f32 %v804_v58, %v803_v57  ;;  %769 = vst.msk [vmem:[%s1408_s14 + $0xf0] sm:$0xff] %vm738_vm1, %v729_v12  ;;  %v826_v54 = vsel %vm738_vm1, %v719_v63, 0.0  ;;  %v927_v50 = vsel %vm738_vm1, %v869_v45, 0.0 }
 0x111   : > { %v935_v18 = vsel %vm738_vm1, %v873_v11, 0.0  ;;  %v871_v55 = vmul.f32 %v1544_v60, %v1544_v60  ;;  %v929_v57 = vsel %vm738_vm1, %v870_v48, 0.0  ;;  %v872_v58 = vmul.f32 %v729_v12, %v729_v12 }
 0x112   : > { %v807_v56 = vadd.f32 %v806_v59, %v805_v62  ;;  %v908_v6 = vadd.f32 %v907_v0, %v906_v61  ;;  %v828_v62 = vsel %vm738_vm1, %v1544_v60, 0.0  ;;  %v830_v47 = vsel %vm738_vm1, %v729_v12, 0.0 }
 0x113   : > { %v931_v1 = vsel %vm738_vm1, %v871_v55, 0.0 }
 0x114   : > { %v910_v9 = vadd.f32 %v909_v5, %v908_v6  ;;  %v809_v10 = vadd.f32 %v808_v7, %v807_v56  ;;  %v933_v5 = vsel %vm738_vm1, %v872_v58, 0.0  ;;  %v832_v6 = vsel %vm738_vm1, %v1180_v4, 0.0 }
 0x116   : > { %v811_v8 = vadd.f32 %v810_v3, %v809_v10  ;;  %v912_v17 = vadd.f32 %v911_v13, %v910_v9 }
 0x118   : > { %v914_v22 = vadd.f32 %v913_v15, %v912_v17  ;;  %v813_v23 = vadd.f32 %v812_v19, %v811_v8 }
 0x11a   : > { %v815_v28 = vadd.f32 %v814_v21, %v813_v23  ;;  %v916_v29 = vadd.f32 %v915_v24, %v914_v22 }
 0x11c   : > { %v918_v31 = vadd.f32 %v917_v26, %v916_v29  ;;  %v817_v32 = vadd.f32 %v816_v2, %v815_v28 }
 0x11e   : > { %v819_v39 = vadd.f32 %v818_v20, %v817_v32  ;;  %v920_v40 = vadd.f32 %v919_v33, %v918_v31 }
 0x120   : > { %v922_v43 = vadd.f32 %v921_v36, %v920_v40  ;;  %v821_v44 = vadd.f32 %v820_v41, %v819_v39 }
 0x122   : > { %v823_v49 = vadd.f32 %v822_v16, %v821_v44  ;;  %v924_v51 = vadd.f32 %v923_v35, %v922_v43 }
 0x124   : > { %v926_v30 = vadd.f32 %v925_v46, %v924_v51  ;;  %v825_v42 = vadd.f32 %v824_v53, %v823_v49 }
 0x126   : > { %v827_v59 = vadd.f32 %v826_v54, %v825_v42  ;;  %v928_v61 = vadd.f32 %v927_v50, %v926_v30 }
 0x128   : > { %v930_v0 = vadd.f32 %v929_v57, %v928_v61  ;;  %v829_v63 = vadd.f32 %v828_v62, %v827_v59 }
 0x12a   : > { %v831_v38 = vadd.f32 %v830_v47, %v829_v63  ;;  %v932_v56 = vadd.f32 %v931_v1, %v930_v0 }
 0x12c   : > { %v833_v7 = vadd.f32 %v832_v6, %v831_v38  ;;  %v934_v3 = vadd.f32 %v933_v5, %v932_v56 }
 0x12e   : > { %v834_v9 = vrot.slane %v833_v7, 4  ;;  %v936_v10 = vadd.f32 %v935_v18, %v934_v3 }
 0x130   : > { %v835_v11 = vadd.f32 %v834_v9, %v833_v7  ;;  %v937_v60 = vrot.slane %v936_v10, 4 }
 0x132   : > { %v836_v13 = vrot.slane %v835_v11, 2  ;;  %v938_v12 = vadd.f32 %v937_v60, %v936_v10 }
 0x134   : > { %v837_v14 = vadd.f32 %v836_v13, %v835_v11  ;;  %v939_v15 = vrot.slane %v938_v12, 2 }
 0x136   : > { %v838_v52 = vrot.slane %v837_v14, 1  ;;  %v940_v8 = vadd.f32 %v939_v15, %v938_v12 }
 0x138   : > { %v839_v4 = vadd.f32 %v838_v52, %v837_v14  ;;  %v941_v17 = vrot.slane %v940_v8, 1 }
 0x13a   : > { %841 = vst.msk [vmem:[%s268_s17] sm:$0x1] %vm840_vm2, %v839_v4  ;;  %v942_v18 = vadd.f32 %v941_v17, %v940_v8 }
 0x13c   : > { %943 = vst.msk [vmem:[%s271_s20] sm:$0x1] %vm840_vm2, %v942_v18 }
 0x13d PF: > { %s17_s21 = sadd.s32 1, %s1201_s21  }
 0x13e   : > { %p14_p5 = scmp.ge.s32.totalorder %s17_s21, 4  }
 0x140   :  { %16 = sbr.rel (!%p14_p5) target bundleno = 1 (0x1), region = 90 }

// kernel: decoder_block_forward.5
= control target key start
LH: loop header
LB: loop body
LE: loop exit
PB: predicated region body
PF: predicated region fallthrough
CT: control target
= control target key end

     0   :  { %s3145_s24 = smov 0   ;;  %s4000_s0 = inlined_call_operand.vmem [shape: f32[2,256,4], index: 0, kind: input, shape index: {}]   ;;  %s4001_s1 = inlined_call_operand.vmem [shape: f32[1,4], index: 1, kind: input, shape index: {}]   ;;  %s4002_s2 = inlined_call_operand.vmem [shape: f32[1,4], index: 2, kind: input, shape index: {}]   ;;  %s4003_s3 = inlined_call_operand.vmem [shape: f32[256,1], index: 3, kind: input, shape index: {}]   ;;  %s4004_s4 = inlined_call_operand.vmem [shape: f32[4,4,16], index: 4, kind: input, shape index: {}]   ;;  %s4005_s5 = inlined_call_operand.vmem [shape: f32[2,256,16], index: 5, kind: output, shape index: {0}]   ;;  %s4006_s6 = inlined_call_operand.vmem [shape: f32[2,1,16], index: 6, kind: output, shape index: {1}]   ;;  %s4007_s7 = inlined_call_operand.vmem [shape: f32[2,1,16], index: 7, kind: output, shape index: {2}]  }
   0x1 LB: > { %s2505_s25 = sadd.s32 4294967295, %s3101_s24   ;;  %p2509_p0 = scmp.ge.s32.totalorder %s3101_s24, 1  ;;  %s3101_s24 = sphi %s3145_s24, %s18_s24  }
   0x2   : > { %p242_p1 = scmp.lt.s32.totalorder %s3101_s24, 3 }
   0x4   : > { %p243_p2 = pnand %p2509_p0, %p242_p1 }
   0x5   : > { %v476_v0 = vld [vmem:[%s4003_s3 + $0x10] sm:$0xff] (!%p243_p2)  ;;  %v474_v1 = vld [vmem:[%s4003_s3] sm:$0xff] (!%p243_p2)  ;;  %p280_p3 = scmp.lt.s32.totalorder (!%p243_p2), %s2505_s25, 1  ;;  %v3103_v2 = vmov (!%p243_p2), 0   ;;  %vm438_vm0 = vcmask (!%p243_p2), 31744   ;;  %v3104_v3 = vmov (!%p243_p2), 0.0  }
   0x6   : > { %246 = sbr.rel (%p243_p2) target bundleno = 500 (0x1f4), region = 40  ;;  %3094 = vset.pattern.permute.xlu1 (!%p243_p2), %v3103_v2  ;;  %3093 = vset.pattern.permute.xlu0 (!%p243_p2), %v3103_v2  ;;  %439 = vst.msk [vmem:[#allocation2 + $0x100] sm:$0xff] (!%p243_p2), %vm438_vm0, %v3104_v3  ;;  %440 = vst.msk [vmem:[#allocation2 + $0x108] sm:$0xff] (!%p243_p2), %vm438_vm0, %v3104_v3  ;;  %v477_v4 = vld [vmem:[%s4003_s3 + $0x18] sm:$0xff] (!%p243_p2)  ;;  %v475_v5 = vld [vmem:[%s4003_s3 + $0x8] sm:$0xff] (!%p243_p2)  ;;  %vm925_vm1 = vcmask (!%p243_p2), 1043456  }
   0x7   : > { %550 = vperm.xlu1 (!%p243_p2), %3094, %v476_v0   ;;  %540 = vperm.xlu0 (!%p243_p2), %3093, %v474_v1   ;;  %441 = vst.msk [vmem:[#allocation2 + $0x110] sm:$0xff] (!%p243_p2), %vm438_vm0, %v3104_v3  ;;  %v479_v6 = vld [vmem:[%s4003_s3 + $0x28] sm:$0xff] (!%p243_p2)  ;;  %v478_v7 = vld [vmem:[%s4003_s3 + $0x20] sm:$0xff] (!%p243_p2)  ;;  %v481_v8 = vld [vmem:[%s4003_s3 + $0x38] sm:$0xff] (!%p243_p2)  ;;  %vm2194_vm2 = vcmask (!%p243_p2), 130048   ;;  %vm2296_vm3 = vcmask (!%p243_p2), 122880  }
   0x8   : > { %v480_v9 = vld [vmem:[%s4003_s3 + $0x30] sm:$0xff] (!%p243_p2)  ;;  %v2583_v10 = vld [vmem:[%s4004_s4 + $0x8] sm:$0xf] (!%p243_p2)  ;;  %v3198_v12 = vld [vmem:[%s4001_s1] ss:$0 sm:$0xff] (!%p243_p2) }
   0x9   : > { %2887 = vmatprep.subr.msk.mxu0 (!%p243_p2), %vm925_vm1, %v2583_v10  ;;  %v3203_v13 = vld [vmem:[%s4002_s2] ss:$0 sm:$0xff] (!%p243_p2)  ;;  %v483_v28 = vld [vmem:[%s4003_s3 + $0x48] sm:$0xff] (!%p243_p2)  ;;  %v485_v53 = vld [vmem:[%s4003_s3 + $0x58] sm:$0xff] (!%p243_p2) }
   0xa   : > { %2888 = vmatpush3.msk.msra.mxu0 (!%p243_p2), %vm925_vm1, %v2583_v10  ;;  %v482_v29 = vld [vmem:[%s4003_s3 + $0x40] sm:$0xff] (!%p243_p2)  ;;  %v484_v54 = vld [vmem:[%s4003_s3 + $0x50] sm:$0xff] (!%p243_p2)  ;;  %v487_v0 = vld [vmem:[%s4003_s3 + $0x68] sm:$0xff] (!%p243_p2) }
   0xb   : > { %555 = vperm.xlu1 (!%p243_p2), %3094, %v477_v4   ;;  %545 = vperm.xlu0 (!%p243_p2), %3093, %v475_v5   ;;  %v486_v1 = vld [vmem:[%s4003_s3 + $0x60] sm:$0xff] (!%p243_p2) }
   0xd   : > { %s4047_s25 = smov (!%p280_p3, %s2505_s25), 1 }
   0xe   : > { %s2653_s11 = sshll.u32 %s4047_s25, 8  ;;  %s292_s30 = scalar_lea.vmem %s4006_s6, %s4047_s25 }
   0xf   : > { %s3182_s18 = scalar_lea.vmem %s4000_s0, %s2653_s11  ;;  %565 = vperm.xlu1 %3094, %v479_v6   ;;  %560 = vperm.xlu0 %3093, %v478_v7   ;;  %s3833_s28 = scalar_lea.vmem %s4005_s5, %s2653_s11 }
  0x10   : > { %v298_v11 = vld [vmem:[%s3182_s18 + $0x10] sm:$0xff]  ;;  %v299_v15 = vld [vmem:[%s3182_s18 + $0x18] sm:$0xff]  ;;  %v300_v16 = vld [vmem:[%s3182_s18 + $0x20] sm:$0xff]  ;;  %s295_s10 = scalar_lea.vmem %s4007_s7, %s4047_s25 }
  0x11   : > { %v337_v14 = vsub.f32 %v298_v11, %v3198_v12  ;;  %v301_v17 = vld [vmem:[%s3182_s18 + $0x28] sm:$0xff]  ;;  %v338_v18 = vsub.f32 %v299_v15, %v3198_v12  ;;  %v339_v19 = vsub.f32 %v300_v16, %v3198_v12  ;;  %v302_v21 = vld [vmem:[%s3182_s18 + $0x30] sm:$0xff]  ;;  %v303_v22 = vld [vmem:[%s3182_s18 + $0x38] sm:$0xff] }
  0x12   : > { %v340_v20 = vsub.f32 %v301_v17, %v3198_v12  ;;  %v304_v23 = vld [vmem:[%s3182_s18 + $0x40] sm:$0xff]  ;;  %v341_v25 = vsub.f32 %v302_v21, %v3198_v12  ;;  %v342_v26 = vsub.f32 %v303_v22, %v3198_v12  ;;  %v305_v27 = vld [vmem:[%s3182_s18 + $0x48] sm:$0xff]  ;;  %v306_v34 = vld [vmem:[%s3182_s18 + $0x50] sm:$0xff] }
  0x13   : > { %575 = vperm.xlu1 %3094, %v481_v8   ;;  %570 = vperm.xlu0 %3093, %v480_v9   ;;  %v3217_v24 = vmul.f32 %v3203_v13, %v337_v14  ;;  %v3229_v30 = vmul.f32 %v3203_v13, %v338_v18  ;;  %v3232_v31 = vmul.f32 %v3203_v13, %v339_v19  ;;  %v307_v39 = vld [vmem:[%s3182_s18 + $0x58] sm:$0xff]  ;;  %v308_v40 = vld [vmem:[%s3182_s18 + $0x60] sm:$0xff]  ;;  %v309_v41 = vld [vmem:[%s3182_s18 + $0x68] sm:$0xff] }
  0x14   : > { %v3235_v32 = vmul.f32 %v3203_v13, %v340_v20  ;;  %v343_v33 = vsub.f32 %v304_v23, %v3198_v12  ;;  %v3241_v36 = vmul.f32 %v3203_v13, %v341_v25  ;;  %v3244_v37 = vmul.f32 %v3203_v13, %v342_v26  ;;  %v310_v46 = vld [vmem:[%s3182_s18 + $0x70] sm:$0xff]  ;;  %v311_v47 = vld [vmem:[%s3182_s18 + $0x78] sm:$0xff]  ;;  %v312_v52 = vld [vmem:[%s3182_s18 + $0x80] sm:$0xff] }
  0x15   : > { %v408_v35 = vmax.f32 %v3217_v24, 0.0  ;;  %v344_v38 = vsub.f32 %v305_v27, %v3198_v12  ;;  %v409_v42 = vmax.f32 %v3229_v30, 0.0  ;;  %v410_v43 = vmax.f32 %v3232_v31, 0.0  ;;  %v313_v59 = vld [vmem:[%s3182_s18 + $0x88] sm:$0xff]  ;;  %v314_v6 = vld [vmem:[%s3182_s18 + $0x90] sm:$0xff]  ;;  %v315_v7 = vld [vmem:[%s3182_s18 + $0x98] sm:$0xff] }
  0x16   : > { %v411_v44 = vmax.f32 %v3235_v32, 0.0  ;;  %v3254_v45 = vmul.f32 %v3203_v13, %v343_v33  ;;  %v412_v48 = vmax.f32 %v3241_v36, 0.0  ;;  %v413_v49 = vmax.f32 %v3244_v37, 0.0  ;;  %v316_v14 = vld [vmem:[%s3182_s18 + $0xa0] sm:$0xff]  ;;  %v317_v15 = vld [vmem:[%s3182_s18 + $0xa8] sm:$0xff]  ;;  %v318_v16 = vld [vmem:[%s3182_s18 + $0xb0] sm:$0xff] }
  0x17   : > { %585 = vperm.xlu1 %3094, %v483_v28   ;;  %580 = vperm.xlu0 %3093, %v482_v29   ;;  %444 = vst.msk [vmem:[#allocation2 + $0x10] sm:$0xff] %vm438_vm0, %v408_v35  ;;  %v3264_v50 = vmul.f32 %v3203_v13, %v344_v38  ;;  %v345_v51 = vsub.f32 %v306_v34, %v3198_v12  ;;  %445 = vst.msk [vmem:[#allocation2 + $0x18] sm:$0xff] %vm438_vm0, %v409_v42  ;;  %v319_v21 = vld [vmem:[%s3182_s18 + $0xb8] sm:$0xff]  ;;  %v2516_v22 = vld [vmem:[%s4004_s4 + $0x4] sm:$0xf] }
  0x18   : > { %446 = vst.msk [vmem:[#allocation2 + $0x20] sm:$0xff] %vm438_vm0, %v410_v43  ;;  %447 = vst.msk [vmem:[#allocation2 + $0x28] sm:$0xff] %vm438_vm0, %v411_v44  ;;  %v414_v55 = vmax.f32 %v3254_v45, 0.0  ;;  %v346_v56 = vsub.f32 %v307_v39, %v3198_v12  ;;  %v347_v57 = vsub.f32 %v308_v40, %v3198_v12  ;;  %v348_v58 = vsub.f32 %v309_v41, %v3198_v12  ;;  %v320_v28 = vld [vmem:[%s3182_s18 + $0xc0] sm:$0xff]  ;;  %v2617_v29 = vld [vmem:[%s4004_s4 + $0xc] sm:$0xf] }
  0x19   : > { %448 = vst.msk [vmem:[#allocation2 + $0x30] sm:$0xff] %vm438_vm0, %v412_v48  ;;  %449 = vst.msk [vmem:[#allocation2 + $0x38] sm:$0xff] %vm438_vm0, %v413_v49  ;;  %v415_v60 = vmax.f32 %v3264_v50, 0.0  ;;  %v3296_v61 = vmul.f32 %v3203_v13, %v345_v51  ;;  %v349_v62 = vsub.f32 %v310_v46, %v3198_v12  ;;  %v350_v63 = vsub.f32 %v311_v47, %v3198_v12  ;;  %v321_v41 = vld [vmem:[%s3182_s18 + $0xc8] sm:$0xff]  ;;  %v3378_v46 = vld [vmem:[%s4004_s4] sm:$0xf] }
  0x1a   : > { %450 = vst.msk [vmem:[#allocation2 + $0x40] sm:$0xff] %vm438_vm0, %v414_v55  ;;  %v3310_v2 = vmul.f32 %v3203_v13, %v346_v56  ;;  %v3313_v3 = vmul.f32 %v3203_v13, %v347_v57  ;;  %v3316_v4 = vmul.f32 %v3203_v13, %v348_v58  ;;  %v351_v5 = vsub.f32 %v312_v52, %v3198_v12  ;;  %v489_v57 = vld [vmem:[%s4003_s3 + $0x78] sm:$0xff]  ;;  %v488_v58 = vld [vmem:[%s4003_s3 + $0x70] sm:$0xff] }
  0x1b   : > { %595 = vperm.xlu1 %3094, %v485_v53   ;;  %590 = vperm.xlu0 %3093, %v484_v54   ;;  %451 = vst.msk [vmem:[#allocation2 + $0x48] sm:$0xff] %vm438_vm0, %v415_v60  ;;  %v416_v8 = vmax.f32 %v3296_v61, 0.0  ;;  %v3326_v9 = vmul.f32 %v3203_v13, %v349_v62  ;;  %v3329_v10 = vmul.f32 %v3203_v13, %v350_v63 }
  0x1c   : > { %v352_v11 = vsub.f32 %v313_v59, %v3198_v12  ;;  %v417_v17 = vmax.f32 %v3310_v2, 0.0  ;;  %v418_v18 = vmax.f32 %v3313_v3, 0.0  ;;  %v4026_v19 = vmax.f32 %v3316_v4, 0.0  ;;  %2787 = vmatprep.subr.msk.mxu1 %vm925_vm1, %v2516_v22  ;;  %2937 = vmatprep.subr.msk.mxu0 %vm925_vm1, %v2617_v29 }
  0x1d   : > { %v3339_v20 = vmul.f32 %v3203_v13, %v351_v5  ;;  %452 = vst.msk [vmem:[#allocation2 + $0x50] sm:$0xff] %vm438_vm0, %v416_v8  ;;  %v4025_v23 = vmax.f32 %v3326_v9, 0.0  ;;  %v4024_v25 = vmax.f32 %v3329_v10, 0.0  ;;  %v353_v27 = vsub.f32 %v314_v6, %v3198_v12  ;;  %2788 = vmatpush3.msk.msra.mxu1 %vm925_vm1, %v2516_v22 }
  0x1e   : > { %v3351_v26 = vmul.f32 %v3203_v13, %v352_v11  ;;  %v730_v33 = vld [vmem:[#allocation2 + $0x10] sm:$0xff]  ;;  %453 = vst.msk [vmem:[#allocation2 + $0x58] sm:$0xff] %vm438_vm0, %v417_v17  ;;  %454 = vst.msk [vmem:[#allocation2 + $0x60] sm:$0xff] %vm438_vm0, %v418_v18  ;;  %v354_v38 = vsub.f32 %v315_v7, %v3198_v12  ;;  %v355_v39 = vsub.f32 %v316_v14, %v3198_v12  ;;  %v731_v47 = vld [vmem:[#allocation2 + $0x18] sm:$0xff]  ;;  %2837 = vmatprep.subr.msk.mxu1 %vm925_vm1, %v3378_v46 }
  0x1f   : > { %455 = vst.msk [vmem:[#allocation2 + $0x68] sm:$0xff] %vm438_vm0, %v4026_v19  ;;  %v4023_v34 = vmax.f32 %v3339_v20, 0.0  ;;  %v356_v40 = vsub.f32 %v317_v15, %v3198_v12  ;;  %605 = vperm.xlu1 %3094, %v487_v0   ;;  %600 = vperm.xlu0 %3093, %v486_v1   ;;  %v732_v51 = vld [vmem:[#allocation2 + $0x20] sm:$0xff]  ;;  %456 = vst.msk [vmem:[#allocation2 + $0x70] sm:$0xff] %vm438_vm0, %v4025_v23  ;;  %v3388_v53 = vmul.f32 %v3203_v13, %v353_v27  ;;  %v322_v1 = vld [vmem:[%s3182_s18 + $0xd0] sm:$0xff] }
  0x20   : > { %457 = vst.msk [vmem:[#allocation2 + $0x78] sm:$0xff] %vm438_vm0, %v4024_v25  ;;  %v4022_v52 = vmax.f32 %v3351_v26, 0.0  ;;  %v357_v54 = vsub.f32 %v318_v16, %v3198_v12  ;;  %v358_v56 = vsub.f32 %v319_v21, %v3198_v12  ;;  %2889 = vmatprep.mubr.msk.f32.mxu0 %vm438_vm0, %v730_v33  ;;  %v3403_v59 = vmul.f32 %v3203_v13, %v354_v38  ;;  %v323_v14 = vld [vmem:[%s3182_s18 + $0xd8] sm:$0xff]  ;;  %v324_v15 = vld [vmem:[%s3182_s18 + $0xe0] sm:$0xff]  ;;  %v325_v16 = vld [vmem:[%s3182_s18 + $0xe8] sm:$0xff] }
  0x21   : > { %458 = vst.msk [vmem:[#allocation2 + $0x80] sm:$0xff] %vm438_vm0, %v4023_v34  ;;  %v3406_v62 = vmul.f32 %v3203_v13, %v355_v39  ;;  %v3409_v63 = vmul.f32 %v3203_v13, %v356_v40  ;;  %v359_v0 = vsub.f32 %v320_v28, %v3198_v12  ;;  %2890 = vmatmul.mubr.msk.f32.vlgmr.msra.gmra.mrb[0].mxu0 %vm438_vm0, %v731_v47  ;;  %v4008_v5 = vmax.f32 %v3388_v53, 0.0  ;;  %v733_v21 = vld [vmem:[#allocation2 + $0x28] sm:$0xff]  ;;  %v326_v38 = vld [vmem:[%s3182_s18 + $0xf0] sm:$0xff]  ;;  %v327_v39 = vld [vmem:[%s3182_s18 + $0xf8] sm:$0xff] }
  0x22   : > { %459 = vst.msk [vmem:[#allocation2 + $0x88] sm:$0xff] %vm438_vm0, %v4022_v52  ;;  %v3419_v6 = vmul.f32 %v3203_v13, %v357_v54  ;;  %v3422_v7 = vmul.f32 %v3203_v13, %v358_v56  ;;  %v360_v11 = vsub.f32 %v321_v41, %v3198_v12  ;;  %2892 = vmatprep.mubr.msk.f32.mxu0 %vm438_vm0, %v732_v51  ;;  %v4021_v22 = vmax.f32 %v3403_v59, 0.0  ;;  %v734_v40 = vld [vmem:[#allocation2 + $0x30] sm:$0xff]  ;;  %v296_v56 = vld [vmem:[%s3182_s18] sm:$0xff] }
  0x23   : > { %v4010_v27 = vmax.f32 %v3406_v62, 0.0  ;;  %v4009_v28 = vmax.f32 %v3409_v63, 0.0  ;;  %v3435_v33 = vmul.f32 %v3203_v13, %v359_v0  ;;  %2938 = vmatpush3.msk.msra.mxu0 %vm925_vm1, %v2617_v29  ;;  %615 = vperm.xlu1 %3094, %v489_v57   ;;  %460 = vst.msk [vmem:[#allocation2 + $0x90] sm:$0xff] %vm438_vm0, %v4008_v5  ;;  %v361_v54 = vsub.f32 %v322_v1, %v3198_v12  ;;  %v491_v29 = vld [vmem:[%s4003_s3 + $0x88] sm:$0xff]  ;;  %v490_v57 = vld [vmem:[%s4003_s3 + $0x80] sm:$0xff]  ;;  %v766_v23 = vld [vmem:[#allocation2 + $0x31] sm:$0xff] }
  0x24   : > { %610 = vperm.xlu0 %3093, %v488_v58   ;;  %v4014_v41 = vmax.f32 %v3419_v6, 0.0  ;;  %v4011_v47 = vmax.f32 %v3422_v7, 0.0  ;;  %v3446_v51 = vmul.f32 %v3203_v13, %v360_v11  ;;  %461 = vst.msk [vmem:[#allocation2 + $0x98] sm:$0xff] %vm438_vm0, %v4021_v22  ;;  %v362_v0 = vsub.f32 %v323_v14, %v3198_v12  ;;  %v297_v5 = vld [vmem:[%s3182_s18 + $0x8] sm:$0xff]  ;;  %v509_v22 = vld [vmem:[#allocation2 + $0x19] sm:$0xff] }
  0x25   : > { %462 = vst.msk [vmem:[#allocation2 + $0xa0] sm:$0xff] %vm438_vm0, %v4010_v27  ;;  %463 = vst.msk [vmem:[#allocation2 + $0xa8] sm:$0xff] %vm438_vm0, %v4009_v28  ;;  %v4013_v58 = vmax.f32 %v3435_v33, 0.0  ;;  %v363_v1 = vsub.f32 %v324_v15, %v3198_v12  ;;  %v364_v11 = vsub.f32 %v325_v16, %v3198_v12  ;;  %2893 = vmatmul.mubr.msk.f32.gmra.mrb[2].mxu0 %vm438_vm0, %v733_v21  ;;  %v735_v16 = vld [vmem:[#allocation2 + $0x38] sm:$0xff]  ;;  %v4027_v24 = vmax.f32 %v3316_v4, 0.0 }
  0x26   : > { %464 = vst.msk [vmem:[#allocation2 + $0xb0] sm:$0xff] %vm438_vm0, %v4014_v41  ;;  %465 = vst.msk [vmem:[#allocation2 + $0xb8] sm:$0xff] %vm438_vm0, %v4011_v47  ;;  %v4012_v28 = vmax.f32 %v3446_v51, 0.0  ;;  %v3479_v27 = vmul.f32 %v3203_v13, %v361_v54  ;;  %v365_v14 = vsub.f32 %v326_v38, %v3198_v12  ;;  %v366_v15 = vsub.f32 %v327_v39, %v3198_v12  ;;  %v736_v39 = vld [vmem:[#allocation2 + $0x40] sm:$0xff]  ;;  %v737_v41 = vld [vmem:[#allocation2 + $0x48] sm:$0xff] }
  0x27   : > { %2895 = vmatprep.mubr.msk.f32.mxu0 %vm438_vm0, %v734_v40  ;;  %466 = vst.msk [vmem:[#allocation2 + $0xc0] sm:$0xff] %vm438_vm0, %v4013_v58  ;;  %v3488_v21 = vmul.f32 %v3203_v13, %v362_v0  ;;  %v3491_v47 = vmul.f32 %v3203_v13, %v363_v1  ;;  %v3494_v54 = vmul.f32 %v3203_v13, %v364_v11  ;;  %v4028_v30 = vmax.f32 %v3326_v9, 0.0 }
  0x28   : > { %v335_v38 = vsub.f32 %v296_v56, %v3198_v12  ;;  %625 = vperm.xlu1 %3094, %v491_v29   ;;  %620 = vperm.xlu0 %3093, %v490_v57   ;;  %467 = vst.msk [vmem:[#allocation2 + $0xc8] sm:$0xff] %vm438_vm0, %v4012_v28  ;;  %v4020_v40 = vmax.f32 %v3479_v27, 0.0  ;;  %v3502_v0 = vmul.f32 %v3203_v13, %v365_v14  ;;  %v493_v56 = vld [vmem:[%s4003_s3 + $0x98] sm:$0xff]  ;;  %v492_v29 = vld [vmem:[%s4003_s3 + $0x90] sm:$0xff]  ;;  %v4029_v31 = vmax.f32 %v3329_v10, 0.0 }
  0x29   : > { %v3505_v1 = vmul.f32 %v3203_v13, %v366_v15  ;;  %v336_v11 = vsub.f32 %v297_v5, %v3198_v12  ;;  %v4019_v57 = vmax.f32 %v3488_v21, 0.0  ;;  %v4018_v28 = vmax.f32 %v3491_v47, 0.0  ;;  %2896 = vmatmul.mubr.msk.f32.gmra.mrb[4].mxu0 %vm438_vm0, %v735_v16 }
  0x2a   : > { %v4017_v14 = vmax.f32 %v3494_v54, 0.0  ;;  %v3518_v58 = vmul.f32 %v3203_v13, %v335_v38  ;;  %468 = vst.msk [vmem:[#allocation2 + $0xd0] sm:$0xff] %vm438_vm0, %v4020_v40  ;;  %v4016_v12 = vmax.f32 %v3502_v0, 0.0  ;;  %2898 = vmatprep.mubr.msk.f32.mxu0 %vm438_vm0, %v736_v39  ;;  %v495_v39 = vld [vmem:[%s4003_s3 + $0xa8] sm:$0xff]  ;;  %v4030_v32 = vmax.f32 %v3339_v20, 0.0 }
  0x2b   : > { %v4015_v5 = vmax.f32 %v3505_v1, 0.0  ;;  %v3527_v15 = vmul.f32 %v3203_v13, %v336_v11  ;;  %469 = vst.msk [vmem:[#allocation2 + $0xd8] sm:$0xff] %vm438_vm0, %v4019_v57  ;;  %470 = vst.msk [vmem:[#allocation2 + $0xe0] sm:$0xff] %vm438_vm0, %v4018_v28  ;;  %v738_v13 = vld [vmem:[#allocation2 + $0x50] sm:$0xff]  ;;  %v494_v11 = vld [vmem:[%s4003_s3 + $0xa0] sm:$0xff]  ;;  %v4032_v36 = vmax.f32 %v3388_v53, 0.0 }
  0x2c   : > { %471 = vst.msk [vmem:[#allocation2 + $0xe8] sm:$0xff] %vm438_vm0, %v4017_v14  ;;  %v406_v16 = vmax.f32 %v3518_v58, 0.0  ;;  %635 = vperm.xlu1 %3094, %v493_v56   ;;  %630 = vperm.xlu0 %3093, %v492_v29   ;;  %472 = vst.msk [vmem:[#allocation2 + $0xf0] sm:$0xff] %vm438_vm0, %v4016_v12  ;;  %v739_v56 = vld [vmem:[#allocation2 + $0x58] sm:$0xff]  ;;  %v740_v29 = vld [vmem:[#allocation2 + $0x60] sm:$0xff]  ;;  %v4033_v37 = vmax.f32 %v3403_v59, 0.0 }
  0x2d   : > { %473 = vst.msk [vmem:[#allocation2 + $0xf8] sm:$0xff] %vm438_vm0, %v4015_v5  ;;  %v407_v38 = vmax.f32 %v3527_v15, 0.0  ;;  %2899 = vmatmul.mubr.msk.f32.gmra.mrb[6].mxu0 %vm438_vm0, %v737_v41  ;;  %v497_v5 = vld [vmem:[%s4003_s3 + $0xb8] sm:$0xff]  ;;  %v496_v12 = vld [vmem:[%s4003_s3 + $0xb0] sm:$0xff]  ;;  %v741_v41 = vld [vmem:[#allocation2 + $0x68] sm:$0xff]  ;;  %v4037_v45 = vmax.f32 %v3422_v7, 0.0 }
  0x2e   : > { %442 = vst.msk [vmem:[#allocation2] sm:$0xff] %vm438_vm0, %v406_v16  ;;  %2901 = vmatprep.mubr.msk.f32.mxu0 %vm438_vm0, %v738_v13  ;;  %v742_v13 = vld [vmem:[#allocation2 + $0x70] sm:$0xff]  ;;  %v743_v14 = vld [vmem:[#allocation2 + $0x78] sm:$0xff]  ;;  %v764_v40 = vld [vmem:[#allocation2 + $0x21] sm:$0xff]  ;;  %v4040_v50 = vmax.f32 %v3479_v27, 0.0  ;;  %v4043_v61 = vmax.f32 %v3494_v54, 0.0 }
  0x2f   : > { %443 = vst.msk [vmem:[#allocation2 + $0x8] sm:$0xff] %vm438_vm0, %v407_v38  ;;  %v4044_v2 = vmax.f32 %v3502_v0, 0.0  ;;  %v4045_v3 = vmax.f32 %v3505_v1, 0.0 }
  0x30   : > { %645 = vperm.xlu1 %3094, %v495_v39   ;;  %640 = vperm.xlu0 %3093, %v494_v11   ;;  %v499_v39 = vld [vmem:[%s4003_s3 + $0xc8] sm:$0xff]  ;;  %v498_v11 = vld [vmem:[%s4003_s3 + $0xc0] sm:$0xff] }
  0x31   : > { %2902 = vmatmul.mubr.msk.f32.gmra.mrb[8].mxu0 %vm438_vm0, %v739_v56  ;;  %v744_v56 = vld [vmem:[#allocation2 + $0x80] sm:$0xff]  ;;  %v754_v28 = vld [vmem:[#allocation2 + $0xd0] sm:$0xff] }
  0x32   : > { %2904 = vmatprep.mubr.msk.f32.mxu0 %vm438_vm0, %v740_v29  ;;  %v745_v29 = vld [vmem:[#allocation2 + $0x88] sm:$0xff] }
  0x34   : > { %655 = vperm.xlu1 %3094, %v497_v5   ;;  %650 = vperm.xlu0 %3093, %v496_v12   ;;  %v501_v12 = vld [vmem:[%s4003_s3 + $0xd8] sm:$0xff]  ;;  %v500_v5 = vld [vmem:[%s4003_s3 + $0xd0] sm:$0xff] }
  0x35   : > { %2905 = vmatmul.mubr.msk.f32.gmra.mrb[10].mxu0 %vm438_vm0, %v741_v41  ;;  %v746_v41 = vld [vmem:[#allocation2 + $0x90] sm:$0xff] }
  0x36   : > { %2907 = vmatprep.mubr.msk.f32.mxu0 %vm438_vm0, %v742_v13  ;;  %v503_v13 = vld [vmem:[%s4003_s3 + $0xe8] sm:$0xff] }
  0x38   : > { %665 = vperm.xlu1 %3094, %v499_v39   ;;  %660 = vperm.xlu0 %3093, %v498_v11   ;;  %v502_v39 = vld [vmem:[%s4003_s3 + $0xe0] sm:$0xff]  ;;  %v747_v11 = vld [vmem:[#allocation2 + $0x98] sm:$0xff] }
  0x39   : > { %2908 = vmatmul.mubr.msk.f32.gmra.mrb[12].mxu0 %vm438_vm0, %v743_v14  ;;  %v748_v14 = vld [vmem:[#allocation2 + $0xa0] sm:$0xff] }
  0x3a   : > { %2910 = vmatprep.mubr.msk.f32.mxu0 %vm438_vm0, %v744_v56  ;;  %v505_v56 = vld [vmem:[%s4003_s3 + $0xf8] sm:$0xff] }
  0x3c   : > { %675 = vperm.xlu1 %3094, %v501_v12   ;;  %670 = vperm.xlu0 %3093, %v500_v5   ;;  %v504_v12 = vld [vmem:[%s4003_s3 + $0xf0] sm:$0xff]  ;;  %v749_v5 = vld [vmem:[#allocation2 + $0xa8] sm:$0xff] }
  0x3d   : > { %2911 = vmatmul.mubr.msk.f32.gmra.mrb[14].mxu0 %vm438_vm0, %v745_v29  ;;  %v750_v29 = vld [vmem:[#allocation2 + $0xb0] sm:$0xff] }
  0x3e   : > { %2913 = vmatprep.mubr.msk.f32.mxu0 %vm438_vm0, %v746_v41  ;;  %v751_v41 = vld [vmem:[#allocation2 + $0xb8] sm:$0xff] }
  0x40   : > { %685 = vperm.xlu1 %3094, %v503_v13   ;;  %680 = vperm.xlu0 %3093, %v502_v39   ;;  %v752_v13 = vld [vmem:[#allocation2 + $0xc0] sm:$0xff]  ;;  %v753_v39 = vld [vmem:[#allocation2 + $0xc8] sm:$0xff] }
  0x41   : > { %2914 = vmatmul.mubr.msk.f32.gmra.mrb[16].mxu0 %vm438_vm0, %v747_v11  ;;  %v755_v11 = vld [vmem:[#allocation2 + $0xd8] sm:$0xff] }
  0x42   : > { %2916 = vmatprep.mubr.msk.f32.mxu0 %vm438_vm0, %v748_v14  ;;  %v756_v14 = vld [vmem:[#allocation2 + $0xe0] sm:$0xff] }
  0x44   : > { %695 = vperm.xlu1 %3094, %v505_v56   ;;  %690 = vperm.xlu0 %3093, %v504_v12   ;;  %v757_v56 = vld [vmem:[#allocation2 + $0xe8] sm:$0xff]  ;;  %v758_v12 = vld [vmem:[#allocation2 + $0xf0] sm:$0xff] }
  0x45   : > { %2917 = vmatmul.mubr.msk.f32.gmra.mrb[18].mxu0 %vm438_vm0, %v749_v5  ;;  %v759_v5 = vld [vmem:[#allocation2 + $0xf8] sm:$0xff] }
  0x46   : > { %2919 = vmatprep.mubr.msk.f32.mxu0 %vm438_vm0, %v750_v29  ;;  %v760_v29 = vld [vmem:[#allocation2 + $0x100] sm:$0xff] }
  0x49   : > { %2920 = vmatmul.mubr.msk.f32.gmra.mrb[20].mxu0 %vm438_vm0, %v751_v41  ;;  %v761_v41 = vld [vmem:[#allocation2 + $0x108] sm:$0xff] }
  0x4a   : > { %2922 = vmatprep.mubr.msk.f32.mxu0 %vm438_vm0, %v752_v13  ;;  %v506_v13 = vld [vmem:[#allocation2 + $0x1] sm:$0xff] }
  0x4d   : > { %2923 = vmatmul.mubr.msk.f32.gmra.mrb[22].mxu0 %vm438_vm0, %v753_v39 }
  0x4e   : > { %2925 = vmatprep.mubr.msk.f32.mxu0 %vm438_vm0, %v754_v28  ;;  %v508_v28 = vld [vmem:[#allocation2 + $0x11] sm:$0xff] }
  0x51   : > { %2926 = vmatmul.mubr.msk.f32.gmra.mrb[24].mxu0 %vm438_vm0, %v755_v11 }
  0x52   : > { %2928 = vmatprep.mubr.msk.f32.mxu0 %vm438_vm0, %v756_v14 }
  0x55   : > { %2929 = vmatmul.mubr.msk.f32.gmra.mrb[26].mxu0 %vm438_vm0, %v757_v56  ;;  %v507_v56 = vld [vmem:[#allocation2 + $0x9] sm:$0xff] }
  0x56   : > { %2931 = vmatprep.mubr.msk.f32.mxu0 %vm438_vm0, %v758_v12 }
  0x59   : > { %2932 = vmatmul.mubr.msk.f32.gmra.mrb[28].mxu0 %vm438_vm0, %v759_v5 }
  0x5a   : > { %2934 = vmatprep.mubr.msk.f32.mxu0 %vm438_vm0, %v760_v29 }
  0x5d   : > { %2935 = vmatmul.mubr.msk.f32.gmra.mrb[30].mxu0 %vm438_vm0, %v761_v41  ;;  %v765_v41 = vld [vmem:[#allocation2 + $0x29] sm:$0xff] }
  0x86   : > { %v551_v39 = vpop.permute.xlu1 %550  ;;  %v541_v11 = vpop.permute.xlu0 %540 }
  0x87   : > { %v794_v14 = vmul.f32 %v541_v11, %v508_v28  ;;  %v698_v57 = vmul.f32 %v541_v11, %v506_v13  ;;  %v700_v12 = vmul.f32 %v551_v39, %v508_v28  ;;  %v796_v29 = vmul.f32 %v764_v40, %v551_v39  ;;  %v768_v39 = vld [vmem:[#allocation2 + $0x41] sm:$0xff] }
  0x89   : > { %2789 = vmatprep.mubr.msk.f32.mxu1 %vm438_vm0, %v698_v57  ;;  %2939 = vmatprep.mubr.msk.f32.mxu0 %vm438_vm0, %v794_v14 }
  0x8a   : > { %v556_v5 = vpop.permute.xlu1 %555  ;;  %v546_v52 = vpop.permute.xlu0 %545 }
  0x8b   : > { %v699_v34 = vmul.f32 %v546_v52, %v507_v56  ;;  %v795_v25 = vmul.f32 %v546_v52, %v509_v22  ;;  %v701_v57 = vmul.f32 %v556_v5, %v509_v22  ;;  %v797_v28 = vmul.f32 %v765_v41, %v556_v5  ;;  %v767_v52 = vld [vmem:[#allocation2 + $0x39] sm:$0xff]  ;;  %v770_v5 = vld [vmem:[#allocation2 + $0x51] sm:$0xff] }
  0x8d   : > { %2790 = vmatmul.mubr.msk.f32.vlgmr.msra.gmra.mrb[0].mxu1 %vm438_vm0, %v699_v34  ;;  %2940 = vmatmul.mubr.msk.f32.vlgmr.msra.gmra.mrb[0].mxu0 %vm438_vm0, %v795_v25 }
  0x8e   : > { %2838 = vmatpush3.msk.msra.mxu1 %vm925_vm1, %v3378_v46  ;;  %v566_v13 = vpop.permute.xlu1 %565  ;;  %v561_v11 = vpop.permute.xlu0 %560  ;;  %2792 = vmatprep.mubr.msk.f32.mxu1 %vm438_vm0, %v700_v12 }
  0x8f   : > { %v702_v14 = vmul.f32 %v764_v40, %v561_v11  ;;  %v798_v19 = vmul.f32 %v766_v23, %v561_v11  ;;  %2942 = vmatprep.mubr.msk.f32.mxu0 %vm438_vm0, %v796_v29  ;;  %v703_v46 = vmul.f32 %v765_v41, %v566_v13  ;;  %v799_v56 = vmul.f32 %v767_v52, %v566_v13  ;;  %v769_v40 = vld [vmem:[#allocation2 + $0x49] sm:$0xff]  ;;  %v771_v41 = vld [vmem:[#allocation2 + $0x59] sm:$0xff]  ;;  %v772_v13 = vld [vmem:[#allocation2 + $0x61] sm:$0xff] }
  0x91   : > { %2793 = vmatmul.mubr.msk.f32.gmra.mrb[2].mxu1 %vm438_vm0, %v701_v57  ;;  %2943 = vmatmul.mubr.msk.f32.gmra.mrb[2].mxu0 %vm438_vm0, %v797_v28 }
  0x92   : > { %v576_v25 = vpop.permute.xlu1 %575  ;;  %v571_v34 = vpop.permute.xlu0 %570  ;;  %2795 = vmatprep.mubr.msk.f32.mxu1 %vm438_vm0, %v702_v14  ;;  %2945 = vmatprep.mubr.msk.f32.mxu0 %vm438_vm0, %v798_v19 }
  0x93   : > { %v704_v22 = vmul.f32 %v766_v23, %v571_v34  ;;  %v800_v12 = vmul.f32 %v768_v39, %v571_v34  ;;  %v705_v57 = vmul.f32 %v767_v52, %v576_v25  ;;  %v801_v28 = vmul.f32 %v769_v40, %v576_v25  ;;  %v773_v52 = vld [vmem:[#allocation2 + $0x69] sm:$0xff]  ;;  %v774_v25 = vld [vmem:[#allocation2 + $0x71] sm:$0xff] }
  0x95   : > { %2796 = vmatmul.mubr.msk.f32.gmra.mrb[4].mxu1 %vm438_vm0, %v703_v46  ;;  %2946 = vmatmul.mubr.msk.f32.gmra.mrb[4].mxu0 %vm438_vm0, %v799_v56 }
  0x96   : > { %v586_v29 = vpop.permute.xlu1 %585  ;;  %v581_v11 = vpop.permute.xlu0 %580  ;;  %2798 = vmatprep.mubr.msk.f32.mxu1 %vm438_vm0, %v704_v22  ;;  %2948 = vmatprep.mubr.msk.f32.mxu0 %vm438_vm0, %v800_v12 }
  0x97   : > { %v706_v14 = vmul.f32 %v768_v39, %v581_v11  ;;  %v802_v19 = vmul.f32 %v770_v5, %v581_v11  ;;  %v707_v46 = vmul.f32 %v769_v40, %v586_v29  ;;  %v803_v56 = vmul.f32 %v771_v41, %v586_v29  ;;  %v775_v40 = vld [vmem:[#allocation2 + $0x79] sm:$0xff]  ;;  %v776_v29 = vld [vmem:[#allocation2 + $0x81] sm:$0xff] }
  0x99   : > { %2799 = vmatmul.mubr.msk.f32.gmra.mrb[6].mxu1 %vm438_vm0, %v705_v57  ;;  %2949 = vmatmul.mubr.msk.f32.gmra.mrb[6].mxu0 %vm438_vm0, %v801_v28 }
  0x9a   : > { %v596_v23 = vpop.permute.xlu1 %595  ;;  %v591_v34 = vpop.permute.xlu0 %590  ;;  %2801 = vmatprep.mubr.msk.f32.mxu1 %vm438_vm0, %v706_v14  ;;  %2951 = vmatprep.mubr.msk.f32.mxu0 %vm438_vm0, %v802_v19 }
  0x9b   : > { %v708_v22 = vmul.f32 %v770_v5, %v591_v34  ;;  %v804_v12 = vmul.f32 %v772_v13, %v591_v34  ;;  %v709_v57 = vmul.f32 %v771_v41, %v596_v23  ;;  %v805_v28 = vmul.f32 %v773_v52, %v596_v23  ;;  %v777_v41 = vld [vmem:[#allocation2 + $0x89] sm:$0xff]  ;;  %v778_v23 = vld [vmem:[#allocation2 + $0x91] sm:$0xff] }
  0x9d   : > { %2802 = vmatmul.mubr.msk.f32.gmra.mrb[8].mxu1 %vm438_vm0, %v707_v46  ;;  %2952 = vmatmul.mubr.msk.f32.gmra.mrb[8].mxu0 %vm438_vm0, %v803_v56 }
  0x9e   : > { %v606_v39 = vpop.permute.xlu1 %605  ;;  %v601_v11 = vpop.permute.xlu0 %600  ;;  %2804 = vmatprep.mubr.msk.f32.mxu1 %vm438_vm0, %v708_v22  ;;  %2954 = vmatprep.mubr.msk.f32.mxu0 %vm438_vm0, %v804_v12 }
  0x9f   : > { %v710_v14 = vmul.f32 %v772_v13, %v601_v11  ;;  %v806_v19 = vmul.f32 %v774_v25, %v601_v11  ;;  %v711_v46 = vmul.f32 %v773_v52, %v606_v39  ;;  %v807_v56 = vmul.f32 %v775_v40, %v606_v39  ;;  %v779_v52 = vld [vmem:[#allocation2 + $0x99] sm:$0xff]  ;;  %v780_v39 = vld [vmem:[#allocation2 + $0xa1] sm:$0xff] }
  0xa1   : > { %2805 = vmatmul.mubr.msk.f32.gmra.mrb[10].mxu1 %vm438_vm0, %v709_v57  ;;  %2955 = vmatmul.mubr.msk.f32.gmra.mrb[10].mxu0 %vm438_vm0, %v805_v28 }
  0xa2   : > { %v616_v5 = vpop.permute.xlu1 %615  ;;  %2807 = vmatprep.mubr.msk.f32.mxu1 %vm438_vm0, %v710_v14  ;;  %2957 = vmatprep.mubr.msk.f32.mxu0 %vm438_vm0, %v806_v19 }
  0xa3   : > { %v611_v34 = vpop.permute.xlu0 %610  ;;  %v713_v57 = vmul.f32 %v775_v40, %v616_v5  ;;  %v809_v28 = vmul.f32 %v777_v41, %v616_v5  ;;  %v781_v40 = vld [vmem:[#allocation2 + $0xa9] sm:$0xff]  ;;  %v782_v5 = vld [vmem:[#allocation2 + $0xb1] sm:$0xff] }
  0xa4   : > { %v712_v22 = vmul.f32 %v774_v25, %v611_v34  ;;  %v808_v12 = vmul.f32 %v776_v29, %v611_v34 }
  0xa5   : > { %2808 = vmatmul.mubr.msk.f32.gmra.mrb[12].mxu1 %vm438_vm0, %v711_v46  ;;  %2958 = vmatmul.mubr.msk.f32.gmra.mrb[12].mxu0 %vm438_vm0, %v807_v56 }
  0xa6   : > { %2810 = vmatprep.mubr.msk.f32.mxu1 %vm438_vm0, %v712_v22  ;;  %2960 = vmatprep.mubr.msk.f32.mxu0 %vm438_vm0, %v808_v12 }
  0xa7   : > { %v626_v13 = vpop.permute.xlu1 %625  ;;  %v621_v11 = vpop.permute.xlu0 %620 }
  0xa8   : > { %v714_v14 = vmul.f32 %v776_v29, %v621_v11  ;;  %v810_v19 = vmul.f32 %v778_v23, %v621_v11  ;;  %v715_v46 = vmul.f32 %v777_v41, %v626_v13  ;;  %v811_v56 = vmul.f32 %v779_v52, %v626_v13  ;;  %v783_v41 = vld [vmem:[#allocation2 + $0xb9] sm:$0xff]  ;;  %v784_v13 = vld [vmem:[#allocation2 + $0xc1] sm:$0xff] }
  0xa9   : > { %2811 = vmatmul.mubr.msk.f32.gmra.mrb[14].mxu1 %vm438_vm0, %v713_v57  ;;  %2961 = vmatmul.mubr.msk.f32.gmra.mrb[14].mxu0 %vm438_vm0, %v809_v28 }
  0xaa   : > { %2813 = vmatprep.mubr.msk.f32.mxu1 %vm438_vm0, %v714_v14  ;;  %2963 = vmatprep.mubr.msk.f32.mxu0 %vm438_vm0, %v810_v19 }
  0xab   : > { %v636_v25 = vpop.permute.xlu1 %635  ;;  %v631_v34 = vpop.permute.xlu0 %630 }
  0xac   : > { %v716_v22 = vmul.f32 %v778_v23, %v631_v34  ;;  %v812_v12 = vmul.f32 %v780_v39, %v631_v34  ;;  %v717_v57 = vmul.f32 %v779_v52, %v636_v25  ;;  %v813_v28 = vmul.f32 %v781_v40, %v636_v25  ;;  %v785_v52 = vld [vmem:[#allocation2 + $0xc9] sm:$0xff]  ;;  %v786_v25 = vld [vmem:[#allocation2 + $0xd1] sm:$0xff] }
  0xad   : > { %2814 = vmatmul.mubr.msk.f32.gmra.mrb[16].mxu1 %vm438_vm0, %v715_v46  ;;  %2964 = vmatmul.mubr.msk.f32.gmra.mrb[16].mxu0 %vm438_vm0, %v811_v56 }
  0xae   : > { %2816 = vmatprep.mubr.msk.f32.mxu1 %vm438_vm0, %v716_v22  ;;  %2966 = vmatprep.mubr.msk.f32.mxu0 %vm438_vm0, %v812_v12 }
  0xaf   : > { %v646_v29 = vpop.permute.xlu1 %645  ;;  %v641_v11 = vpop.permute.xlu0 %640 }
  0xb0   : > { %v718_v14 = vmul.f32 %v780_v39, %v641_v11  ;;  %v814_v19 = vmul.f32 %v782_v5, %v641_v11  ;;  %v719_v46 = vmul.f32 %v781_v40, %v646_v29  ;;  %v815_v56 = vmul.f32 %v783_v41, %v646_v29  ;;  %v787_v40 = vld [vmem:[#allocation2 + $0xd9] sm:$0xff]  ;;  %v788_v29 = vld [vmem:[#allocation2 + $0xe1] sm:$0xff] }
  0xb1   : > { %2817 = vmatmul.mubr.msk.f32.gmra.mrb[18].mxu1 %vm438_vm0, %v717_v57  ;;  %2967 = vmatmul.mubr.msk.f32.gmra.mrb[18].mxu0 %vm438_vm0, %v813_v28 }
  0xb2   : > { %2819 = vmatprep.mubr.msk.f32.mxu1 %vm438_vm0, %v718_v14  ;;  %2969 = vmatprep.mubr.msk.f32.mxu0 %vm438_vm0, %v814_v19 }
  0xb3   : > { %v656_v23 = vpop.permute.xlu1 %655  ;;  %v651_v34 = vpop.permute.xlu0 %650 }
  0xb4   : > { %v720_v22 = vmul.f32 %v782_v5, %v651_v34  ;;  %v816_v12 = vmul.f32 %v784_v13, %v651_v34  ;;  %v721_v57 = vmul.f32 %v783_v41, %v656_v23  ;;  %v817_v28 = vmul.f32 %v785_v52, %v656_v23  ;;  %v789_v41 = vld [vmem:[#allocation2 + $0xe9] sm:$0xff]  ;;  %v790_v23 = vld [vmem:[#allocation2 + $0xf1] sm:$0xff] }
  0xb5   : > { %2820 = vmatmul.mubr.msk.f32.gmra.mrb[20].mxu1 %vm438_vm0, %v719_v46  ;;  %2970 = vmatmul.mubr.msk.f32.gmra.mrb[20].mxu0 %vm438_vm0, %v815_v56 }
  0xb6   : > { %2822 = vmatprep.mubr.msk.f32.mxu1 %vm438_vm0, %v720_v22  ;;  %2972 = vmatprep.mubr.msk.f32.mxu0 %vm438_vm0, %v816_v12 }
  0xb7   : > { %v666_v39 = vpop.permute.xlu1 %665  ;;  %v661_v11 = vpop.permute.xlu0 %660 }
  0xb8   : > { %v722_v14 = vmul.f32 %v784_v13, %v661_v11  ;;  %v818_v19 = vmul.f32 %v786_v25, %v661_v11  ;;  %v723_v46 = vmul.f32 %v785_v52, %v666_v39  ;;  %v819_v56 = vmul.f32 %v787_v40, %v666_v39  ;;  %v791_v52 = vld [vmem:[#allocation2 + $0xf9] sm:$0xff]  ;;  %v792_v39 = vld [vmem:[#allocation2 + $0x101] sm:$0xff] }
  0xb9   : > { %2823 = vmatmul.mubr.msk.f32.gmra.mrb[22].mxu1 %vm438_vm0, %v721_v57  ;;  %2973 = vmatmul.mubr.msk.f32.gmra.mrb[22].mxu0 %vm438_vm0, %v817_v28 }
  0xba   : > { %2825 = vmatprep.mubr.msk.f32.mxu1 %vm438_vm0, %v722_v14  ;;  %2975 = vmatprep.mubr.msk.f32.mxu0 %vm438_vm0, %v818_v19 }
  0xbb   : > { %v676_v5 = vpop.permute.xlu1 %675  ;;  %v671_v34 = vpop.permute.xlu0 %670 }
  0xbc   : > { %v724_v22 = vmul.f32 %v786_v25, %v671_v34  ;;  %v820_v12 = vmul.f32 %v788_v29, %v671_v34  ;;  %v725_v57 = vmul.f32 %v787_v40, %v676_v5  ;;  %v821_v28 = vmul.f32 %v789_v41, %v676_v5  ;;  %v793_v40 = vld [vmem:[#allocation2 + $0x109] sm:$0xff] }
  0xbd   : > { %2826 = vmatmul.mubr.msk.f32.gmra.mrb[24].mxu1 %vm438_vm0, %v723_v46  ;;  %2976 = vmatmul.mubr.msk.f32.gmra.mrb[24].mxu0 %vm438_vm0, %v819_v56 }
  0xbe   : > { %2828 = vmatprep.mubr.msk.f32.mxu1 %vm438_vm0, %v724_v22  ;;  %2978 = vmatprep.mubr.msk.f32.mxu0 %vm438_vm0, %v820_v12 }
  0xbf   : > { %v686_v13 = vpop.permute.xlu1 %685  ;;  %v681_v11 = vpop.permute.xlu0 %680 }
  0xc0   : > { %v726_v14 = vmul.f32 %v788_v29, %v681_v11  ;;  %v822_v19 = vmul.f32 %v790_v23, %v681_v11  ;;  %v727_v34 = vmul.f32 %v789_v41, %v686_v13  ;;  %v823_v46 = vmul.f32 %v791_v52, %v686_v13 }
  0xc1   : > { %2829 = vmatmul.mubr.msk.f32.gmra.mrb[26].mxu1 %vm438_vm0, %v725_v57  ;;  %2979 = vmatmul.mubr.msk.f32.gmra.mrb[26].mxu0 %vm438_vm0, %v821_v28 }
  0xc2   : > { %2831 = vmatprep.mubr.msk.f32.mxu1 %vm438_vm0, %v726_v14  ;;  %2981 = vmatprep.mubr.msk.f32.mxu0 %vm438_vm0, %v822_v19 }
  0xc3   : > { %v691_v25 = vpop.permute.xlu0 %690  ;;  %v696_v12 = vpop.permute.xlu1 %695 }
  0xc4   : > { %v728_v56 = vmul.f32 %v790_v23, %v691_v25  ;;  %v824_v22 = vmul.f32 %v792_v39, %v691_v25  ;;  %v729_v29 = vmul.f32 %v791_v52, %v696_v12  ;;  %v825_v5 = vmul.f32 %v793_v40, %v696_v12 }
  0xc5   : > { %2832 = vmatmul.mubr.msk.f32.gmra.mrb[28].mxu1 %vm438_vm0, %v727_v34  ;;  %2982 = vmatmul.mubr.msk.f32.gmra.mrb[28].mxu0 %vm438_vm0, %v823_v46 }
  0xc6   : > { %2834 = vmatprep.mubr.msk.f32.mxu1 %vm438_vm0, %v728_v56  ;;  %2984 = vmatprep.mubr.msk.f32.mxu0 %vm438_vm0, %v824_v22 }
  0xc9   : > { %2835 = vmatmul.mubr.msk.f32.gmra.mrb[30].mxu1 %vm438_vm0, %v729_v29  ;;  %2985 = vmatmul.mubr.msk.f32.gmra.mrb[30].mxu0 %vm438_vm0, %v825_v5 }
  0xca   : > { %2839 = vmatprep.mubr.msk.f32.mxu1 %vm438_vm0, %v406_v16 }
  0xcd   : > { %2840 = vmatmul.mubr.msk.f32.vlgmr.msra.gmra.mrb[0].mxu1 %vm438_vm0, %v407_v38 }
  0xce   : > { %2842 = vmatprep.mubr.msk.f32.mxu1 %vm438_vm0, %v408_v35  ;;  %v4031_v35 = vmax.f32 %v3351_v26, 0.0 }
  0xd1   : > { %2843 = vmatmul.mubr.msk.f32.gmra.mrb[2].mxu1 %vm438_vm0, %v409_v42  ;;  %v4034_v42 = vmax.f32 %v3406_v62, 0.0 }
  0xd2   : > { %2845 = vmatprep.mubr.msk.f32.mxu1 %vm438_vm0, %v410_v43  ;;  %v4035_v43 = vmax.f32 %v3409_v63, 0.0 }
  0xd5   : > { %2846 = vmatmul.mubr.msk.f32.gmra.mrb[4].mxu1 %vm438_vm0, %v411_v44  ;;  %v4036_v44 = vmax.f32 %v3419_v6, 0.0 }
  0xd6   : > { %2848 = vmatprep.mubr.msk.f32.mxu1 %vm438_vm0, %v412_v48  ;;  %v4038_v48 = vmax.f32 %v3435_v33, 0.0 }
  0xd9   : > { %2849 = vmatmul.mubr.msk.f32.gmra.mrb[6].mxu1 %vm438_vm0, %v413_v49  ;;  %v4039_v49 = vmax.f32 %v3446_v51, 0.0 }
  0xda   : > { %2851 = vmatprep.mubr.msk.f32.mxu1 %vm438_vm0, %v414_v55  ;;  %v4041_v55 = vmax.f32 %v3488_v21, 0.0 }
  0xdd   : > { %2852 = vmatmul.mubr.msk.f32.gmra.mrb[8].mxu1 %vm438_vm0, %v415_v60  ;;  %v4042_v60 = vmax.f32 %v3491_v47, 0.0 }
  0xde   : > { %2854 = vmatprep.mubr.msk.f32.mxu1 %vm438_vm0, %v416_v8 }
  0xe1   : > { %2855 = vmatmul.mubr.msk.f32.gmra.mrb[10].mxu1 %vm438_vm0, %v417_v17 }
  0xe2   : > { %2857 = vmatprep.mubr.msk.f32.mxu1 %vm438_vm0, %v418_v18 }
  0xe5   : > { %2858 = vmatmul.mubr.msk.f32.gmra.mrb[12].mxu1 %vm438_vm0, %v4027_v24 }
  0xe6   : > { %2860 = vmatprep.mubr.msk.f32.mxu1 %vm438_vm0, %v4028_v30 }
  0xe9   : > { %2861 = vmatmul.mubr.msk.f32.gmra.mrb[14].mxu1 %vm438_vm0, %v4029_v31 }
  0xea   : > { %2863 = vmatprep.mubr.msk.f32.mxu1 %vm438_vm0, %v4030_v32 }
  0xed   : > { %2864 = vmatmul.mubr.msk.f32.gmra.mrb[16].mxu1 %vm438_vm0, %v4031_v35 }
  0xee   : > { %2866 = vmatprep.mubr.msk.f32.mxu1 %vm438_vm0, %v4032_v36 }
  0xf1   : > { %2867 = vmatmul.mubr.msk.f32.gmra.mrb[18].mxu1 %vm438_vm0, %v4033_v37 }
  0xf2   : > { %2869 = vmatprep.mubr.msk.f32.mxu1 %vm438_vm0, %v4034_v42 }
  0xf5   : > { %2870 = vmatmul.mubr.msk.f32.gmra.mrb[20].mxu1 %vm438_vm0, %v4035_v43 }
  0xf6   : > { %2872 = vmatprep.mubr.msk.f32.mxu1 %vm438_vm0, %v4036_v44 }
  0xf9   : > { %2873 = vmatmul.mubr.msk.f32.gmra.mrb[22].mxu1 %vm438_vm0, %v4037_v45 }
  0xfa   : > { %2875 = vmatprep.mubr.msk.f32.mxu1 %vm438_vm0, %v4038_v48 }
  0xfd   : > { %2876 = vmatmul.mubr.msk.f32.gmra.mrb[24].mxu1 %vm438_vm0, %v4039_v49 }
  0xfe   : > { %2878 = vmatprep.mubr.msk.f32.mxu1 %vm438_vm0, %v4040_v50 }
 0x101   : > { %2879 = vmatmul.mubr.msk.f32.gmra.mrb[26].mxu1 %vm438_vm0, %v4041_v55 }
 0x102   : > { %2881 = vmatprep.mubr.msk.f32.mxu1 %vm438_vm0, %v4042_v60 }
 0x105   : > { %2882 = vmatmul.mubr.msk.f32.gmra.mrb[28].mxu1 %vm438_vm0, %v4043_v61 }
 0x106   : > { %2884 = vmatprep.mubr.msk.f32.mxu1 %vm438_vm0, %v4044_v2 }
 0x109   : > { %2885 = vmatmul.mubr.msk.f32.gmra.mrb[30].mxu1 %vm438_vm0, %v4045_v3 }
 0x160   : > { %v2941_v4 = vpop.f32.mrb[0].mxu0 }
 0x161   : > { %v2003_v8 = vpop.f32.mrb[1].mxu0 }
 0x164   : > { %v2944_v9 = vpop.f32.mrb[2].mxu0 }
 0x165   : > { %v2013_v10 = vpop.f32.mrb[3].mxu0 }
 0x168   : > { %v2947_v17 = vpop.f32.mrb[4].mxu0 }
 0x169   : > { %v2023_v18 = vpop.f32.mrb[5].mxu0 }
 0x16c   : > { %v3776_v20 = vpop.f32.mrb[6].mxu0 }
 0x16d   : > { %v3778_v26 = vpop.f32.mrb[7].mxu0 }
 0x170   : > { %v3780_v53 = vpop.f32.mrb[8].mxu0 }
 0x171   : > { %v3782_v59 = vpop.f32.mrb[9].mxu0 }
 0x174   : > { %v3784_v62 = vpop.f32.mrb[10].mxu0 }
 0x175   : > { %v3786_v63 = vpop.f32.mrb[11].mxu0 }
 0x178   : > { %v3788_v6 = vpop.f32.mrb[12].mxu0 }
 0x179   : > { %v3790_v7 = vpop.f32.mrb[13].mxu0 }
 0x17c   : > { %v3792_v27 = vpop.f32.mrb[14].mxu0 }
 0x17d   : > { %v3794_v33 = vpop.f32.mrb[15].mxu0 }
 0x180   : > { %v3796_v47 = vpop.f32.mrb[16].mxu0 }
 0x181   : > { %v3798_v51 = vpop.f32.mrb[17].mxu0 }
 0x184   : > { %v3800_v58 = vpop.f32.mrb[18].mxu0 }
 0x185   : > { %v3802_v21 = vpop.f32.mrb[19].mxu0 }
 0x188   : > { %v3804_v54 = vpop.f32.mrb[20].mxu0 }
 0x189   : > { %v3806_v0 = vpop.f32.mrb[21].mxu0 }
 0x18c   : > { %v3808_v1 = vpop.f32.mrb[22].mxu0 }
 0x18d   : > { %v3810_v15 = vpop.f32.mrb[23].mxu0 }
 0x190   : > { %v3812_v16 = vpop.f32.mrb[24].mxu0 }
 0x191   : > { %v3814_v38 = vpop.f32.mrb[25].mxu0 }
 0x194   : > { %v3816_v41 = vpop.f32.mrb[26].mxu0 }
 0x195   : > { %v3818_v23 = vpop.f32.mrb[27].mxu0 }
 0x198   : > { %v3820_v13 = vpop.f32.mrb[28].mxu0 }
 0x199   : > { %v3822_v11 = vpop.f32.mrb[29].mxu0 }
 0x19c   : > { %v3824_v57 = vpop.f32.mrb[30].mxu0 }
 0x19d   : > { %v3826_v28 = vpop.f32.mrb[31].mxu0 }
 0x1a0   : > { %v2841_v14 = vpop.f32.mrb[0].mxu1 }
 0x1a1   : > { %v2987_v19 = vadd.f32 %v2941_v4, %v2841_v14  ;;  %v1319_v52 = vpop.f32.mrb[1].mxu1 }
 0x1a2   : > { %v2988_v39 = vadd.f32 %v2003_v8, %v1319_v52 }
 0x1a3   : > { %2196 = vst.msk [vmem:[%s3833_s28 + $0x8] sm:$0xff] %vm2194_vm2, %v2987_v19  ;;  %v2228_v25 = vsel %vm2194_vm2, %v2987_v19, 0.0  ;;  %v2299_v34 = vmul.f32 %v2987_v19, %v2987_v19 }
 0x1a4   : > { %2195 = vst.msk [vmem:[%s3833_s28] sm:$0xff] %vm2194_vm2, %v2988_v39  ;;  %v2227_v46 = vsel %vm2194_vm2, %v2988_v39, 0.0  ;;  %v2298_v56 = vmul.f32 %v2988_v39, %v2988_v39  ;;  %v2844_v22 = vpop.f32.mrb[2].mxu1 }
 0x1a5   : > { %v2331_v12 = vsel %vm2194_vm2, %v2299_v34, 0.0  ;;  %v2229_v40 = vadd.f32 %v2228_v25, %v2227_v46  ;;  %v2989_v29 = vadd.f32 %v2944_v9, %v2844_v22  ;;  %v1329_v5 = vpop.f32.mrb[3].mxu1 }
 0x1a6   : > { %v2330_v24 = vsel %vm2194_vm2, %v2298_v56, 0.0  ;;  %v2990_v30 = vadd.f32 %v2013_v10, %v1329_v5 }
 0x1a7   : > { %v2332_v31 = vadd.f32 %v2331_v12, %v2330_v24  ;;  %2198 = vst.msk [vmem:[%s3833_s28 + $0x18] sm:$0xff] %vm2194_vm2, %v2989_v29  ;;  %v2301_v32 = vmul.f32 %v2989_v29, %v2989_v29  ;;  %v2232_v45 = vsel %vm2194_vm2, %v2989_v29, 0.0 }
 0x1a8   : > { %2197 = vst.msk [vmem:[%s3833_s28 + $0x10] sm:$0xff] %vm2194_vm2, %v2990_v30  ;;  %v2230_v35 = vsel %vm2194_vm2, %v2990_v30, 0.0  ;;  %v2300_v36 = vmul.f32 %v2990_v30, %v2990_v30  ;;  %v2847_v37 = vpop.f32.mrb[4].mxu1 }
 0x1a9   : > { %v2231_v42 = vadd.f32 %v2230_v35, %v2229_v40  ;;  %v2991_v43 = vadd.f32 %v2947_v17, %v2847_v37  ;;  %v1339_v44 = vpop.f32.mrb[5].mxu1  ;;  %v2335_v60 = vsel %vm2194_vm2, %v2301_v32, 0.0 }
 0x1aa   : > { %v2333_v48 = vsel %vm2194_vm2, %v2300_v36, 0.0  ;;  %v2992_v49 = vadd.f32 %v2023_v18, %v1339_v44 }
 0x1ab   : > { %v2334_v50 = vadd.f32 %v2333_v48, %v2332_v31  ;;  %2200 = vst.msk [vmem:[%s3833_s28 + $0x28] sm:$0xff] %vm2194_vm2, %v2991_v43  ;;  %v2233_v55 = vadd.f32 %v2232_v45, %v2231_v42  ;;  %v2303_v61 = vmul.f32 %v2991_v43, %v2991_v43  ;;  %v2236_v18 = vsel %vm2194_vm2, %v2991_v43, 0.0 }
 0x1ac   : > { %2199 = vst.msk [vmem:[%s3833_s28 + $0x20] sm:$0xff] %vm2194_vm2, %v2992_v49  ;;  %v2234_v2 = vsel %vm2194_vm2, %v2992_v49, 0.0  ;;  %v2302_v3 = vmul.f32 %v2992_v49, %v2992_v49  ;;  %v2850_v4 = vpop.f32.mrb[6].mxu1 }
 0x1ad   : > { %v2235_v8 = vadd.f32 %v2234_v2, %v2233_v55  ;;  %v2336_v9 = vadd.f32 %v2335_v60, %v2334_v50  ;;  %v2993_v10 = vadd.f32 %v3776_v20, %v2850_v4  ;;  %v1349_v17 = vpop.f32.mrb[7].mxu1  ;;  %v2339_v25 = vsel %vm2194_vm2, %v2303_v61, 0.0 }
 0x1ae   : > { %v2337_v14 = vsel %vm2194_vm2, %v2302_v3, 0.0  ;;  %v2994_v19 = vadd.f32 %v3778_v26, %v1349_v17 }
 0x1af   : > { %v2338_v52 = vadd.f32 %v2337_v14, %v2336_v9  ;;  %2202 = vst.msk [vmem:[%s3833_s28 + $0x38] sm:$0xff] %vm2194_vm2, %v2993_v10  ;;  %v2237_v39 = vadd.f32 %v2236_v18, %v2235_v8  ;;  %v2305_v34 = vmul.f32 %v2993_v10, %v2993_v10  ;;  %v2240_v29 = vsel %vm2194_vm2, %v2993_v10, 0.0 }
 0x1b0   : > { %2201 = vst.msk [vmem:[%s3833_s28 + $0x30] sm:$0xff] %vm2194_vm2, %v2994_v19  ;;  %v2238_v20 = vsel %vm2194_vm2, %v2994_v19, 0.0  ;;  %v2304_v46 = vmul.f32 %v2994_v19, %v2994_v19  ;;  %v2853_v56 = vpop.f32.mrb[8].mxu1 }
 0x1b1   : > { %v2239_v22 = vadd.f32 %v2238_v20, %v2237_v39  ;;  %v2340_v12 = vadd.f32 %v2339_v25, %v2338_v52  ;;  %v2995_v40 = vadd.f32 %v3780_v53, %v2853_v56  ;;  %v1359_v26 = vpop.f32.mrb[9].mxu1  ;;  %v2343_v32 = vsel %vm2194_vm2, %v2305_v34, 0.0 }
 0x1b2   : > { %v2341_v5 = vsel %vm2194_vm2, %v2304_v46, 0.0  ;;  %v2996_v24 = vadd.f32 %v3782_v59, %v1359_v26 }
 0x1b3   : > { %v2342_v30 = vadd.f32 %v2341_v5, %v2340_v12  ;;  %2204 = vst.msk [vmem:[%s3833_s28 + $0x48] sm:$0xff] %vm2194_vm2, %v2995_v40  ;;  %v2241_v31 = vadd.f32 %v2240_v29, %v2239_v22  ;;  %v2307_v35 = vmul.f32 %v2995_v40, %v2995_v40  ;;  %v2244_v45 = vsel %vm2194_vm2, %v2995_v40, 0.0 }
 0x1b4   : > { %2203 = vst.msk [vmem:[%s3833_s28 + $0x40] sm:$0xff] %vm2194_vm2, %v2996_v24  ;;  %v2242_v53 = vsel %vm2194_vm2, %v2996_v24, 0.0  ;;  %v2306_v36 = vmul.f32 %v2996_v24, %v2996_v24  ;;  %v2856_v37 = vpop.f32.mrb[10].mxu1 }
 0x1b5   : > { %v2243_v42 = vadd.f32 %v2242_v53, %v2241_v31  ;;  %v2344_v43 = vadd.f32 %v2343_v32, %v2342_v30  ;;  %v2997_v44 = vadd.f32 %v3784_v62, %v2856_v37  ;;  %v1369_v59 = vpop.f32.mrb[11].mxu1  ;;  %v2347_v60 = vsel %vm2194_vm2, %v2307_v35, 0.0 }
 0x1b6   : > { %v2345_v48 = vsel %vm2194_vm2, %v2306_v36, 0.0  ;;  %v2998_v49 = vadd.f32 %v3786_v63, %v1369_v59 }
 0x1b7   : > { %v2346_v50 = vadd.f32 %v2345_v48, %v2344_v43  ;;  %2206 = vst.msk [vmem:[%s3833_s28 + $0x58] sm:$0xff] %vm2194_vm2, %v2997_v44  ;;  %v2245_v55 = vadd.f32 %v2244_v45, %v2243_v42  ;;  %v2309_v61 = vmul.f32 %v2997_v44, %v2997_v44  ;;  %v2248_v10 = vsel %vm2194_vm2, %v2997_v44, 0.0 }
 0x1b8   : > { %2205 = vst.msk [vmem:[%s3833_s28 + $0x50] sm:$0xff] %vm2194_vm2, %v2998_v49  ;;  %v2246_v62 = vsel %vm2194_vm2, %v2998_v49, 0.0  ;;  %v2308_v2 = vmul.f32 %v2998_v49, %v2998_v49  ;;  %v2859_v3 = vpop.f32.mrb[12].mxu1 }
 0x1b9   : > { %v2247_v4 = vadd.f32 %v2246_v62, %v2245_v55  ;;  %v2348_v8 = vadd.f32 %v2347_v60, %v2346_v50  ;;  %v2999_v9 = vadd.f32 %v3788_v6, %v2859_v3  ;;  %v1379_v63 = vpop.f32.mrb[13].mxu1  ;;  %v2351_v52 = vsel %vm2194_vm2, %v2309_v61, 0.0 }
 0x1ba   : > { %v2349_v17 = vsel %vm2194_vm2, %v2308_v2, 0.0  ;;  %v3000_v18 = vadd.f32 %v3790_v7, %v1379_v63 }
 0x1bb   : > { %v2350_v14 = vadd.f32 %v2349_v17, %v2348_v8  ;;  %2208 = vst.msk [vmem:[%s3833_s28 + $0x68] sm:$0xff] %vm2194_vm2, %v2999_v9  ;;  %v2249_v19 = vadd.f32 %v2248_v10, %v2247_v4  ;;  %v2311_v39 = vmul.f32 %v2999_v9, %v2999_v9  ;;  %v2252_v22 = vsel %vm2194_vm2, %v2999_v9, 0.0 }
 0x1bc   : > { %2207 = vst.msk [vmem:[%s3833_s28 + $0x60] sm:$0xff] %vm2194_vm2, %v3000_v18  ;;  %v2250_v6 = vsel %vm2194_vm2, %v3000_v18, 0.0  ;;  %v2310_v25 = vmul.f32 %v3000_v18, %v3000_v18  ;;  %v2862_v34 = vpop.f32.mrb[14].mxu1 }
 0x1bd   : > { %v2251_v20 = vadd.f32 %v2250_v6, %v2249_v19  ;;  %v2352_v46 = vadd.f32 %v2351_v52, %v2350_v14  ;;  %v3001_v56 = vadd.f32 %v3792_v27, %v2862_v34  ;;  %v1389_v7 = vpop.f32.mrb[15].mxu1  ;;  %v2355_v5 = vsel %vm2194_vm2, %v2311_v39, 0.0 }
 0x1be   : > { %v2353_v12 = vsel %vm2194_vm2, %v2310_v25, 0.0  ;;  %v3002_v40 = vadd.f32 %v3794_v33, %v1389_v7 }
 0x1bf   : > { %v2354_v26 = vadd.f32 %v2353_v12, %v2352_v46  ;;  %2210 = vst.msk [vmem:[%s3833_s28 + $0x78] sm:$0xff] %vm2194_vm2, %v3001_v56  ;;  %v2253_v29 = vadd.f32 %v2252_v22, %v2251_v20  ;;  %v2313_v24 = vmul.f32 %v3001_v56, %v3001_v56  ;;  %v2256_v36 = vsel %vm2194_vm2, %v3001_v56, 0.0 }
 0x1c0   : > { %2209 = vst.msk [vmem:[%s3833_s28 + $0x70] sm:$0xff] %vm2194_vm2, %v3002_v40  ;;  %v2254_v27 = vsel %vm2194_vm2, %v3002_v40, 0.0  ;;  %v2312_v30 = vmul.f32 %v3002_v40, %v3002_v40  ;;  %v2865_v31 = vpop.f32.mrb[16].mxu1 }
 0x1c1   : > { %v2255_v32 = vadd.f32 %v2254_v27, %v2253_v29  ;;  %v2356_v35 = vadd.f32 %v2355_v5, %v2354_v26  ;;  %v3003_v53 = vadd.f32 %v3796_v47, %v2865_v31  ;;  %v1399_v33 = vpop.f32.mrb[17].mxu1  ;;  %v2359_v59 = vsel %vm2194_vm2, %v2313_v24, 0.0 }
 0x1c2   : > { %v2357_v37 = vsel %vm2194_vm2, %v2312_v30, 0.0  ;;  %v3004_v42 = vadd.f32 %v3798_v51, %v1399_v33 }
 0x1c3   : > { %v2358_v43 = vadd.f32 %v2357_v37, %v2356_v35  ;;  %2212 = vst.msk [vmem:[%s3833_s28 + $0x88] sm:$0xff] %vm2194_vm2, %v3003_v53  ;;  %v2257_v44 = vadd.f32 %v2256_v36, %v2255_v32  ;;  %v2315_v45 = vmul.f32 %v3003_v53, %v3003_v53  ;;  %v2260_v61 = vsel %vm2194_vm2, %v3003_v53, 0.0 }
 0x1c4   : > { %2211 = vst.msk [vmem:[%s3833_s28 + $0x80] sm:$0xff] %vm2194_vm2, %v3004_v42  ;;  %v2258_v47 = vsel %vm2194_vm2, %v3004_v42, 0.0  ;;  %v2314_v48 = vmul.f32 %v3004_v42, %v3004_v42  ;;  %v2868_v49 = vpop.f32.mrb[18].mxu1 }
 0x1c5   : > { %v2259_v50 = vadd.f32 %v2258_v47, %v2257_v44  ;;  %v2360_v55 = vadd.f32 %v2359_v59, %v2358_v43  ;;  %v3005_v60 = vadd.f32 %v3800_v58, %v2868_v49  ;;  %v1409_v51 = vpop.f32.mrb[19].mxu1  ;;  %v2363_v8 = vsel %vm2194_vm2, %v2315_v45, 0.0 }
 0x1c6   : > { %v2361_v62 = vsel %vm2194_vm2, %v2314_v48, 0.0  ;;  %v3006_v2 = vadd.f32 %v3802_v21, %v1409_v51 }
 0x1c7   : > { %v2362_v3 = vadd.f32 %v2361_v62, %v2360_v55  ;;  %2214 = vst.msk [vmem:[%s3833_s28 + $0x98] sm:$0xff] %vm2194_vm2, %v3005_v60  ;;  %v2261_v4 = vadd.f32 %v2260_v61, %v2259_v50  ;;  %v2317_v9 = vmul.f32 %v3005_v60, %v3005_v60  ;;  %v2264_v19 = vsel %vm2194_vm2, %v3005_v60, 0.0 }
 0x1c8   : > { %2213 = vst.msk [vmem:[%s3833_s28 + $0x90] sm:$0xff] %vm2194_vm2, %v3006_v2  ;;  %v2262_v58 = vsel %vm2194_vm2, %v3006_v2, 0.0  ;;  %v2316_v63 = vmul.f32 %v3006_v2, %v3006_v2  ;;  %v2871_v10 = vpop.f32.mrb[20].mxu1 }
 0x1c9   : > { %v2263_v17 = vadd.f32 %v2262_v58, %v2261_v4  ;;  %v2364_v18 = vadd.f32 %v2363_v8, %v2362_v3  ;;  %v3007_v14 = vadd.f32 %v3804_v54, %v2871_v10  ;;  %v1419_v21 = vpop.f32.mrb[21].mxu1  ;;  %v2367_v34 = vsel %vm2194_vm2, %v2317_v9, 0.0 }
 0x1ca   : > { %v2365_v52 = vsel %vm2194_vm2, %v2316_v63, 0.0  ;;  %v3008_v39 = vadd.f32 %v3806_v0, %v1419_v21 }
 0x1cb   : > { %v2366_v6 = vadd.f32 %v2365_v52, %v2364_v18  ;;  %2216 = vst.msk [vmem:[%s3833_s28 + $0xa8] sm:$0xff] %vm2194_vm2, %v3007_v14  ;;  %v2265_v25 = vadd.f32 %v2264_v19, %v2263_v17  ;;  %v2319_v20 = vmul.f32 %v3007_v14, %v3007_v14  ;;  %v2268_v40 = vsel %vm2194_vm2, %v3007_v14, 0.0 }
 0x1cc   : > { %2215 = vst.msk [vmem:[%s3833_s28 + $0xa0] sm:$0xff] %vm2194_vm2, %v3008_v39  ;;  %v2266_v54 = vsel %vm2194_vm2, %v3008_v39, 0.0  ;;  %v2318_v46 = vmul.f32 %v3008_v39, %v3008_v39  ;;  %v2874_v56 = vpop.f32.mrb[22].mxu1 }
 0x1cd   : > { %v2267_v7 = vadd.f32 %v2266_v54, %v2265_v25  ;;  %v2368_v22 = vadd.f32 %v2367_v34, %v2366_v6  ;;  %v3009_v12 = vadd.f32 %v3808_v1, %v2874_v56  ;;  %v1429_v0 = vpop.f32.mrb[23].mxu1  ;;  %v2371_v27 = vsel %vm2194_vm2, %v2319_v20, 0.0 }
 0x1ce   : > { %v2369_v26 = vsel %vm2194_vm2, %v2318_v46, 0.0  ;;  %v3010_v29 = vadd.f32 %v3810_v15, %v1429_v0 }
 0x1cf   : > { %v2370_v5 = vadd.f32 %v2369_v26, %v2368_v22  ;;  %2218 = vst.msk [vmem:[%s3833_s28 + $0xb8] sm:$0xff] %vm2194_vm2, %v3009_v12  ;;  %v2269_v24 = vadd.f32 %v2268_v40, %v2267_v7  ;;  %v2321_v30 = vmul.f32 %v3009_v12, %v3009_v12  ;;  %v2272_v36 = vsel %vm2194_vm2, %v3009_v12, 0.0 }
 0x1d0   : > { %2217 = vst.msk [vmem:[%s3833_s28 + $0xb0] sm:$0xff] %vm2194_vm2, %v3010_v29  ;;  %v2270_v1 = vsel %vm2194_vm2, %v3010_v29, 0.0  ;;  %v2320_v31 = vmul.f32 %v3010_v29, %v3010_v29  ;;  %v2877_v32 = vpop.f32.mrb[24].mxu1 }
 0x1d1   : > { %v2271_v35 = vadd.f32 %v2270_v1, %v2269_v24  ;;  %v2372_v53 = vadd.f32 %v2371_v27, %v2370_v5  ;;  %v3011_v33 = vadd.f32 %v3812_v16, %v2877_v32  ;;  %v1439_v15 = vpop.f32.mrb[25].mxu1  ;;  %v2375_v59 = vsel %vm2194_vm2, %v2321_v30, 0.0 }
 0x1d2   : > { %v2373_v37 = vsel %vm2194_vm2, %v2320_v31, 0.0  ;;  %v3012_v42 = vadd.f32 %v3814_v38, %v1439_v15 }
 0x1d3   : > { %v2374_v43 = vadd.f32 %v2373_v37, %v2372_v53  ;;  %2220 = vst.msk [vmem:[%s3833_s28 + $0xc8] sm:$0xff] %vm2194_vm2, %v3011_v33  ;;  %v2273_v44 = vadd.f32 %v2272_v36, %v2271_v35  ;;  %v2323_v45 = vmul.f32 %v3011_v33, %v3011_v33  ;;  %v2276_v60 = vsel %vm2194_vm2, %v3011_v33, 0.0 }
 0x1d4   : > { %2219 = vst.msk [vmem:[%s3833_s28 + $0xc0] sm:$0xff] %vm2194_vm2, %v3012_v42  ;;  %v2274_v16 = vsel %vm2194_vm2, %v3012_v42, 0.0  ;;  %v2322_v47 = vmul.f32 %v3012_v42, %v3012_v42  ;;  %v2880_v48 = vpop.f32.mrb[26].mxu1 }
 0x1d5   : > { %v2275_v49 = vadd.f32 %v2274_v16, %v2273_v44  ;;  %v2376_v50 = vadd.f32 %v2375_v59, %v2374_v43  ;;  %v3013_v55 = vadd.f32 %v3816_v41, %v2880_v48  ;;  %v1449_v38 = vpop.f32.mrb[27].mxu1  ;;  %v2379_v3 = vsel %vm2194_vm2, %v2323_v45, 0.0 }
 0x1d6   : > { %v2377_v51 = vsel %vm2194_vm2, %v2322_v47, 0.0  ;;  %v3014_v61 = vadd.f32 %v3818_v23, %v1449_v38 }
 0x1d7   : > { %v2378_v62 = vadd.f32 %v2377_v51, %v2376_v50  ;;  %2222 = vst.msk [vmem:[%s3833_s28 + $0xd8] sm:$0xff] %vm2194_vm2, %v3013_v55  ;;  %v2277_v2 = vadd.f32 %v2276_v60, %v2275_v49  ;;  %v2325_v4 = vmul.f32 %v3013_v55, %v3013_v55  ;;  %v2280_v17 = vsel %vm2194_vm2, %v3013_v55, 0.0 }
 0x1d8   : > { %2221 = vst.msk [vmem:[%s3833_s28 + $0xd0] sm:$0xff] %vm2194_vm2, %v3014_v61  ;;  %v2278_v41 = vsel %vm2194_vm2, %v3014_v61, 0.0  ;;  %v2324_v8 = vmul.f32 %v3014_v61, %v3014_v61  ;;  %v2883_v9 = vpop.f32.mrb[28].mxu1 }
 0x1d9   : > { %v2279_v58 = vadd.f32 %v2278_v41, %v2277_v2  ;;  %v2380_v63 = vadd.f32 %v2379_v3, %v2378_v62  ;;  %v3015_v10 = vadd.f32 %v3820_v13, %v2883_v9  ;;  %v1459_v23 = vpop.f32.mrb[29].mxu1  ;;  %v2383_v52 = vsel %vm2194_vm2, %v2325_v4, 0.0 }
 0x1da   : > { %v2381_v18 = vsel %vm2194_vm2, %v2324_v8, 0.0  ;;  %v3016_v14 = vadd.f32 %v3822_v11, %v1459_v23 }
 0x1db   : > { %v2382_v21 = vadd.f32 %v2381_v18, %v2380_v63  ;;  %2224 = vst.msk [vmem:[%s3833_s28 + $0xe8] sm:$0xff] %vm2194_vm2, %v3015_v10  ;;  %v2281_v19 = vadd.f32 %v2280_v17, %v2279_v58  ;;  %v2327_v39 = vmul.f32 %v3015_v10, %v3015_v10  ;;  %v2284_v46 = vsel %vm2194_vm2, %v3015_v10, 0.0 }
 0x1dc   : > { %2223 = vst.msk [vmem:[%s3833_s28 + $0xe0] sm:$0xff] %vm2194_vm2, %v3016_v14  ;;  %v2282_v13 = vsel %vm2194_vm2, %v3016_v14, 0.0  ;;  %v2326_v6 = vmul.f32 %v3016_v14, %v3016_v14  ;;  %v2886_v25 = vpop.f32.mrb[30].mxu1 }
 0x1dd   : > { %v2283_v34 = vadd.f32 %v2282_v13, %v2281_v19  ;;  %v2384_v20 = vadd.f32 %v2383_v52, %v2382_v21  ;;  %v3017_v54 = vadd.f32 %v3824_v57, %v2886_v25  ;;  %v1469_v11 = vpop.f32.mrb[31].mxu1  ;;  %v2387_v40 = vsel %vm2194_vm2, %v2327_v39, 0.0 }
 0x1de   : > { %v2385_v56 = vsel %vm2194_vm2, %v2326_v6, 0.0  ;;  %v3018_v7 = vadd.f32 %v3826_v28, %v1469_v11 }
 0x1df   : > { %v2386_v22 = vadd.f32 %v2385_v56, %v2384_v20  ;;  %2226 = vst.msk [vmem:[%s3833_s28 + $0xf8] sm:$0xff] %vm2194_vm2, %v3017_v54  ;;  %v2329_v12 = vmul.f32 %v3017_v54, %v3017_v54  ;;  %v2285_v0 = vadd.f32 %v2284_v46, %v2283_v34  ;;  %v2288_v27 = vsel %vm2194_vm2, %v3017_v54, 0.0 }
 0x1e0   : > { %2225 = vst.msk [vmem:[%s3833_s28 + $0xf0] sm:$0xff] %vm2194_vm2, %v3018_v7  ;;  %v2286_v26 = vsel %vm2194_vm2, %v3018_v7, 0.0  ;;  %v2328_v29 = vmul.f32 %v3018_v7, %v3018_v7 }
 0x1e1   : > { %v2391_v57 = vsel %vm2194_vm2, %v2329_v12, 0.0  ;;  %v2287_v5 = vadd.f32 %v2286_v26, %v2285_v0  ;;  %v2388_v24 = vadd.f32 %v2387_v40, %v2386_v22 }
 0x1e2   : > { %v2389_v28 = vsel %vm2194_vm2, %v2328_v29, 0.0 }
 0x1e3   : > { %v2289_v30 = vadd.f32 %v2288_v27, %v2287_v5  ;;  %v2390_v1 = vadd.f32 %v2389_v28, %v2388_v24 }
 0x1e5   : > { %v2290_v31 = vrot.slane %v2289_v30, 4  ;;  %v2392_v32 = vadd.f32 %v2391_v57, %v2390_v1 }
 0x1e7   : > { %v2291_v35 = vadd.f32 %v2290_v31, %v2289_v30  ;;  %v2393_v53 = vrot.slane %v2392_v32, 4 }
 0x1e9   : > { %v2292_v33 = vrot.slane %v2291_v35, 2  ;;  %v2394_v15 = vadd.f32 %v2393_v53, %v2392_v32 }
 0x1eb   : > { %v2293_v36 = vadd.f32 %v2292_v33, %v2291_v35  ;;  %v2395_v37 = vrot.slane %v2394_v15, 2 }
 0x1ed   : > { %v2294_v42 = vrot.slane %v2293_v36, 1  ;;  %v2396_v43 = vadd.f32 %v2395_v37, %v2394_v15 }
 0x1ef   : > { %v2295_v44 = vadd.f32 %v2294_v42, %v2293_v36  ;;  %v2397_v59 = vrot.slane %v2396_v43, 1 }
 0x1f1   : > { %2297 = vst.msk [vmem:[%s292_s30] sm:$0x1] %vm2296_vm3, %v2295_v44  ;;  %v2398_v45 = vadd.f32 %v2397_v59, %v2396_v43 }
 0x1f3   : > { %2399 = vst.msk [vmem:[%s295_s10] sm:$0x1] %vm2296_vm3, %v2398_v45 }
 0x1f4 PF: > { %s18_s24 = sadd.s32 1, %s3101_s24  }
 0x1f5   : > { %p15_p4 = scmp.ge.s32.totalorder %s18_s24, 4  }
 0x1f7   :  { %17 = sbr.rel (!%p15_p4) target bundleno = 1 (0x1), region = 97 }

// kernel: decoder_block_forward.7
= control target key start
LH: loop header
LB: loop body
LE: loop exit
PB: predicated region body
PF: predicated region fallthrough
CT: control target
= control target key end

     0   :  { %s454_s12 = smov 0   ;;  %s645_s0 = inlined_call_operand.vmem [shape: f32[512,32], index: 0, kind: input, shape index: {}]   ;;  %s646_s1 = inlined_call_operand.vmem [shape: f32[1,32], index: 1, kind: input, shape index: {}]   ;;  %s647_s2 = inlined_call_operand.vmem [shape: f32[1,32], index: 2, kind: input, shape index: {}]   ;;  %s648_s3 = inlined_call_operand.vmem [shape: f32[512,32], index: 3, kind: output, shape index: {}]  }
   0x1 LB: > { %s405_s13 = sadd.s32 4294967295, %s432_s12   ;;  %p409_p0 = scmp.ge.s32.totalorder %s432_s12, 1  ;;  %s432_s12 = sphi %s454_s12, %s13_s12  }
   0x2   : > { %p138_p1 = scmp.lt.s32.totalorder %s432_s12, 3 }
   0x4   : > { %p139_p2 = pnand %p409_p0, %p138_p1 }
   0x5   : > { %s410_s14 = sshll.u32 (!%p139_p2), %s405_s13, 5  ;;  %v465_v0 = vld [vmem:[%s646_s1] ss:$0 sm:$0xff] (!%p139_p2)  ;;  %vm316_vm0 = vcmask (!%p139_p2), 261120  }
   0x6   : > { %142 = sbr.rel (%p139_p2) target bundleno = 46 (0x2e), region = 32  ;;  %p163_p3 = scmp.lt.s32.totalorder (!%p139_p2), %s410_s14, 63  ;;  %v475_v1 = vld [vmem:[%s647_s2] ss:$0 sm:$0xff] (!%p139_p2) }
   0xd   : > { %s650_s14 = smov (!%p163_p3, %s410_s14), 63 }
   0xe   : > { %s411_s15 = sshll.u32 %s650_s14, 3 }
   0xf   : > { %s470_s20 = scalar_lea.vmem %s645_s0, %s411_s15  ;;  %s498_s25 = scalar_lea.vmem %s648_s3, %s411_s15 }
  0x10   : > { %v174_v2 = vld [vmem:[%s470_s20] sm:$0xff]  ;;  %v175_v3 = vld [vmem:[%s470_s20 + $0x8] sm:$0xff]  ;;  %v176_v4 = vld [vmem:[%s470_s20 + $0x10] sm:$0xff] }
  0x11   : > { %v213_v5 = vsub.f32 %v174_v2, %v465_v0  ;;  %v214_v6 = vsub.f32 %v175_v3, %v465_v0  ;;  %v215_v7 = vsub.f32 %v176_v4, %v465_v0  ;;  %v177_v8 = vld [vmem:[%s470_s20 + $0x18] sm:$0xff]  ;;  %v178_v9 = vld [vmem:[%s470_s20 + $0x20] sm:$0xff]  ;;  %v179_v10 = vld [vmem:[%s470_s20 + $0x28] sm:$0xff] }
  0x12   : > { %v216_v11 = vsub.f32 %v177_v8, %v465_v0  ;;  %v217_v12 = vsub.f32 %v178_v9, %v465_v0  ;;  %v218_v13 = vsub.f32 %v179_v10, %v465_v0  ;;  %v180_v14 = vld [vmem:[%s470_s20 + $0x30] sm:$0xff]  ;;  %v181_v15 = vld [vmem:[%s470_s20 + $0x38] sm:$0xff]  ;;  %v182_v24 = vld [vmem:[%s470_s20 + $0x40] sm:$0xff] }
  0x13   : > { %v252_v16 = vmul.f32 %v475_v1, %v213_v5  ;;  %v253_v17 = vmul.f32 %v475_v1, %v214_v6  ;;  %v254_v18 = vmul.f32 %v475_v1, %v215_v7  ;;  %v219_v19 = vsub.f32 %v180_v14, %v465_v0  ;;  %v183_v25 = vld [vmem:[%s470_s20 + $0x48] sm:$0xff]  ;;  %v184_v26 = vld [vmem:[%s470_s20 + $0x50] sm:$0xff]  ;;  %v185_v31 = vld [vmem:[%s470_s20 + $0x58] sm:$0xff] }
  0x14   : > { %v255_v20 = vmul.f32 %v475_v1, %v216_v11  ;;  %v256_v21 = vmul.f32 %v475_v1, %v217_v12  ;;  %v257_v22 = vmul.f32 %v475_v1, %v218_v13  ;;  %v220_v23 = vsub.f32 %v181_v15, %v465_v0  ;;  %v186_v32 = vld [vmem:[%s470_s20 + $0x60] sm:$0xff]  ;;  %v187_v33 = vld [vmem:[%s470_s20 + $0x68] sm:$0xff]  ;;  %v188_v38 = vld [vmem:[%s470_s20 + $0x70] sm:$0xff] }
  0x15   : > { %v284_v27 = vmax.f32 %v252_v16, 0.0  ;;  %v285_v28 = vmax.f32 %v253_v17, 0.0  ;;  %v286_v29 = vmax.f32 %v254_v18, 0.0  ;;  %v258_v30 = vmul.f32 %v475_v1, %v219_v19  ;;  %v189_v43 = vld [vmem:[%s470_s20 + $0x78] sm:$0xff]  ;;  %v190_v56 = vld [vmem:[%s470_s20 + $0x80] sm:$0xff]  ;;  %v191_v57 = vld [vmem:[%s470_s20 + $0x88] sm:$0xff] }
  0x16   : > { %v287_v34 = vmax.f32 %v255_v20, 0.0  ;;  %v288_v35 = vmax.f32 %v256_v21, 0.0  ;;  %v289_v36 = vmax.f32 %v257_v22, 0.0  ;;  %v259_v37 = vmul.f32 %v475_v1, %v220_v23  ;;  %v192_v58 = vld [vmem:[%s470_s20 + $0x90] sm:$0xff]  ;;  %v193_v63 = vld [vmem:[%s470_s20 + $0x98] sm:$0xff]  ;;  %v194_v2 = vld [vmem:[%s470_s20 + $0xa0] sm:$0xff] }
  0x17   : > { %317 = vst.msk [vmem:[%s498_s25] sm:$0xff] %vm316_vm0, %v284_v27  ;;  %318 = vst.msk [vmem:[%s498_s25 + $0x8] sm:$0xff] %vm316_vm0, %v285_v28  ;;  %v290_v39 = vmax.f32 %v258_v30, 0.0  ;;  %v221_v40 = vsub.f32 %v182_v24, %v465_v0  ;;  %v222_v41 = vsub.f32 %v183_v25, %v465_v0  ;;  %v223_v42 = vsub.f32 %v184_v26, %v465_v0  ;;  %v195_v3 = vld [vmem:[%s470_s20 + $0xa8] sm:$0xff]  ;;  %v196_v8 = vld [vmem:[%s470_s20 + $0xb0] sm:$0xff] }
  0x18   : > { %319 = vst.msk [vmem:[%s498_s25 + $0x10] sm:$0xff] %vm316_vm0, %v286_v29  ;;  %320 = vst.msk [vmem:[%s498_s25 + $0x18] sm:$0xff] %vm316_vm0, %v287_v34  ;;  %v291_v44 = vmax.f32 %v259_v37, 0.0  ;;  %v224_v45 = vsub.f32 %v185_v31, %v465_v0  ;;  %v225_v46 = vsub.f32 %v186_v32, %v465_v0  ;;  %v226_v47 = vsub.f32 %v187_v33, %v465_v0  ;;  %v197_v13 = vld [vmem:[%s470_s20 + $0xb8] sm:$0xff]  ;;  %v198_v26 = vld [vmem:[%s470_s20 + $0xc0] sm:$0xff] }
  0x19   : > { %321 = vst.msk [vmem:[%s498_s25 + $0x20] sm:$0xff] %vm316_vm0, %v288_v35  ;;  %322 = vst.msk [vmem:[%s498_s25 + $0x28] sm:$0xff] %vm316_vm0, %v289_v36  ;;  %v260_v48 = vmul.f32 %v475_v1, %v221_v40  ;;  %v261_v49 = vmul.f32 %v475_v1, %v222_v41  ;;  %v262_v50 = vmul.f32 %v475_v1, %v223_v42  ;;  %v199_v27 = vld [vmem:[%s470_s20 + $0xc8] sm:$0xff]  ;;  %v200_v28 = vld [vmem:[%s470_s20 + $0xd0] sm:$0xff] }
  0x1a   : > { %323 = vst.msk [vmem:[%s498_s25 + $0x30] sm:$0xff] %vm316_vm0, %v290_v39  ;;  %v227_v51 = vsub.f32 %v188_v38, %v465_v0  ;;  %324 = vst.msk [vmem:[%s498_s25 + $0x38] sm:$0xff] %vm316_vm0, %v291_v44  ;;  %v263_v52 = vmul.f32 %v475_v1, %v224_v45  ;;  %v264_v53 = vmul.f32 %v475_v1, %v225_v46  ;;  %v201_v33 = vld [vmem:[%s470_s20 + $0xd8] sm:$0xff]  ;;  %v202_v34 = vld [vmem:[%s470_s20 + $0xe0] sm:$0xff] }
  0x1b   : > { %v265_v54 = vmul.f32 %v475_v1, %v226_v47  ;;  %v228_v55 = vsub.f32 %v189_v43, %v465_v0  ;;  %v292_v59 = vmax.f32 %v260_v48, 0.0  ;;  %v293_v60 = vmax.f32 %v261_v49, 0.0  ;;  %v203_v35 = vld [vmem:[%s470_s20 + $0xe8] sm:$0xff]  ;;  %v204_v40 = vld [vmem:[%s470_s20 + $0xf0] sm:$0xff]  ;;  %v205_v45 = vld [vmem:[%s470_s20 + $0xf8] sm:$0xff] }
  0x1c   : > { %v294_v61 = vmax.f32 %v262_v50, 0.0  ;;  %v266_v62 = vmul.f32 %v475_v1, %v227_v51  ;;  %v295_v4 = vmax.f32 %v263_v52, 0.0  ;;  %v296_v5 = vmax.f32 %v264_v53, 0.0 }
  0x1d   : > { %v297_v6 = vmax.f32 %v265_v54, 0.0  ;;  %v267_v7 = vmul.f32 %v475_v1, %v228_v55  ;;  %325 = vst.msk [vmem:[%s498_s25 + $0x40] sm:$0xff] %vm316_vm0, %v292_v59  ;;  %326 = vst.msk [vmem:[%s498_s25 + $0x48] sm:$0xff] %vm316_vm0, %v293_v60  ;;  %v229_v10 = vsub.f32 %v190_v56, %v465_v0  ;;  %v230_v11 = vsub.f32 %v191_v57, %v465_v0 }
  0x1e   : > { %327 = vst.msk [vmem:[%s498_s25 + $0x50] sm:$0xff] %vm316_vm0, %v294_v61  ;;  %v298_v9 = vmax.f32 %v266_v62, 0.0  ;;  %v231_v12 = vsub.f32 %v192_v58, %v465_v0  ;;  %328 = vst.msk [vmem:[%s498_s25 + $0x58] sm:$0xff] %vm316_vm0, %v295_v4  ;;  %v232_v15 = vsub.f32 %v193_v63, %v465_v0  ;;  %v233_v16 = vsub.f32 %v194_v2, %v465_v0 }
  0x1f   : > { %329 = vst.msk [vmem:[%s498_s25 + $0x60] sm:$0xff] %vm316_vm0, %v296_v5  ;;  %330 = vst.msk [vmem:[%s498_s25 + $0x68] sm:$0xff] %vm316_vm0, %v297_v6  ;;  %v299_v14 = vmax.f32 %v267_v7, 0.0  ;;  %v234_v17 = vsub.f32 %v195_v3, %v465_v0  ;;  %v268_v18 = vmul.f32 %v475_v1, %v229_v10  ;;  %v269_v19 = vmul.f32 %v475_v1, %v230_v11 }
  0x20   : > { %331 = vst.msk [vmem:[%s498_s25 + $0x70] sm:$0xff] %vm316_vm0, %v298_v9  ;;  %v270_v20 = vmul.f32 %v475_v1, %v231_v12  ;;  %v235_v21 = vsub.f32 %v196_v8, %v465_v0  ;;  %v271_v22 = vmul.f32 %v475_v1, %v232_v15  ;;  %v272_v23 = vmul.f32 %v475_v1, %v233_v16 }
  0x21   : > { %332 = vst.msk [vmem:[%s498_s25 + $0x78] sm:$0xff] %vm316_vm0, %v299_v14  ;;  %v273_v24 = vmul.f32 %v475_v1, %v234_v17  ;;  %v236_v25 = vsub.f32 %v197_v13, %v465_v0  ;;  %v300_v29 = vmax.f32 %v268_v18, 0.0  ;;  %v301_v30 = vmax.f32 %v269_v19, 0.0 }
  0x22   : > { %v302_v31 = vmax.f32 %v270_v20, 0.0  ;;  %v274_v32 = vmul.f32 %v475_v1, %v235_v21  ;;  %v303_v36 = vmax.f32 %v271_v22, 0.0  ;;  %v304_v37 = vmax.f32 %v272_v23, 0.0 }
  0x23   : > { %v305_v38 = vmax.f32 %v273_v24, 0.0  ;;  %v275_v39 = vmul.f32 %v475_v1, %v236_v25  ;;  %333 = vst.msk [vmem:[%s498_s25 + $0x80] sm:$0xff] %vm316_vm0, %v300_v29  ;;  %334 = vst.msk [vmem:[%s498_s25 + $0x88] sm:$0xff] %vm316_vm0, %v301_v30  ;;  %v237_v42 = vsub.f32 %v198_v26, %v465_v0  ;;  %v238_v43 = vsub.f32 %v199_v27, %v465_v0 }
  0x24   : > { %335 = vst.msk [vmem:[%s498_s25 + $0x90] sm:$0xff] %vm316_vm0, %v302_v31  ;;  %v306_v41 = vmax.f32 %v274_v32, 0.0  ;;  %v239_v44 = vsub.f32 %v200_v28, %v465_v0  ;;  %336 = vst.msk [vmem:[%s498_s25 + $0x98] sm:$0xff] %vm316_vm0, %v303_v36  ;;  %v240_v47 = vsub.f32 %v201_v33, %v465_v0  ;;  %v241_v48 = vsub.f32 %v202_v34, %v465_v0 }
  0x25   : > { %337 = vst.msk [vmem:[%s498_s25 + $0xa0] sm:$0xff] %vm316_vm0, %v304_v37  ;;  %338 = vst.msk [vmem:[%s498_s25 + $0xa8] sm:$0xff] %vm316_vm0, %v305_v38  ;;  %v307_v46 = vmax.f32 %v275_v39, 0.0  ;;  %v242_v49 = vsub.f32 %v203_v35, %v465_v0  ;;  %v276_v50 = vmul.f32 %v475_v1, %v237_v42  ;;  %v277_v51 = vmul.f32 %v475_v1, %v238_v43 }
  0x26   : > { %339 = vst.msk [vmem:[%s498_s25 + $0xb0] sm:$0xff] %vm316_vm0, %v306_v41  ;;  %v278_v52 = vmul.f32 %v475_v1, %v239_v44  ;;  %v243_v53 = vsub.f32 %v204_v40, %v465_v0  ;;  %v279_v54 = vmul.f32 %v475_v1, %v240_v47  ;;  %v280_v55 = vmul.f32 %v475_v1, %v241_v48 }
  0x27   : > { %340 = vst.msk [vmem:[%s498_s25 + $0xb8] sm:$0xff] %vm316_vm0, %v307_v46  ;;  %v281_v56 = vmul.f32 %v475_v1, %v242_v49  ;;  %v244_v57 = vsub.f32 %v205_v45, %v465_v0  ;;  %v308_v58 = vmax.f32 %v276_v50, 0.0  ;;  %v309_v59 = vmax.f32 %v277_v51, 0.0 }
  0x28   : > { %v310_v60 = vmax.f32 %v278_v52, 0.0  ;;  %v282_v61 = vmul.f32 %v475_v1, %v243_v53  ;;  %v311_v62 = vmax.f32 %v279_v54, 0.0  ;;  %v312_v63 = vmax.f32 %v280_v55, 0.0 }
  0x29   : > { %v313_v2 = vmax.f32 %v281_v56, 0.0  ;;  %v283_v3 = vmul.f32 %v475_v1, %v244_v57  ;;  %341 = vst.msk [vmem:[%s498_s25 + $0xc0] sm:$0xff] %vm316_vm0, %v308_v58  ;;  %342 = vst.msk [vmem:[%s498_s25 + $0xc8] sm:$0xff] %vm316_vm0, %v309_v59 }
  0x2a   : > { %343 = vst.msk [vmem:[%s498_s25 + $0xd0] sm:$0xff] %vm316_vm0, %v310_v60  ;;  %v314_v4 = vmax.f32 %v282_v61, 0.0  ;;  %344 = vst.msk [vmem:[%s498_s25 + $0xd8] sm:$0xff] %vm316_vm0, %v311_v62 }
  0x2b   : > { %345 = vst.msk [vmem:[%s498_s25 + $0xe0] sm:$0xff] %vm316_vm0, %v312_v63  ;;  %346 = vst.msk [vmem:[%s498_s25 + $0xe8] sm:$0xff] %vm316_vm0, %v313_v2  ;;  %v315_v0 = vmax.f32 %v283_v3, 0.0 }
  0x2c   : > { %347 = vst.msk [vmem:[%s498_s25 + $0xf0] sm:$0xff] %vm316_vm0, %v314_v4 }
  0x2d   : > { %348 = vst.msk [vmem:[%s498_s25 + $0xf8] sm:$0xff] %vm316_vm0, %v315_v0 }
  0x2e PF: > { %s13_s12 = sadd.s32 1, %s432_s12  }
  0x2f   : > { %p10_p4 = scmp.ge.s32.totalorder %s13_s12, 4  }
  0x31   :  { %12 = sbr.rel (!%p10_p4) target bundleno = 1 (0x1), region = 62 }

</bundles_post_ra>
